<compile_context>
chip_gen: v7x
topology: tpu7x:2x2x1
jax: 0.10.0
libtpu: 0.0.40
codegen_flags: <defaults>
</compile_context>

<pallas_src>
import functools

import jax
import jax.numpy as jnp
from jax.experimental import pallas as pl
from jax.experimental.pallas import tpu as pltpu


EPS = 1e-5           # torch BatchNorm2d default
SLOPE = 0.2          # LeakyReLU negative slope
OUT_LANES = 128      # lane-dense output slab width (real scalar is lane 0)


# ----------------------------------------------------------------------------
# Fused Pallas kernel
# ----------------------------------------------------------------------------
def _conv_branch(slab, pos, cfgs, params, H0, B):
    """Run one conv branch on a (B*H0, Cin) slab (batch folded into rows).

    slab: (L, Cin) activations; pos: (L, 1) original in-batch row position (f32).
    Rows whose window would cross a batch boundary produce garbage values that are
    masked out of BN stats and never read by later valid rows."""
    L = slab.shape[0]
    Ho = H0
    for cfg, prm in zip(cfgs, params):
        kh, dh, bn = cfg["kh"], cfg["dh"], cfg["bn"]
        W = prm["w"][...]                          # (kh, Cin, OC): loaded once per layer
        reach = dh * (kh - 1)
        Lo = L - reach
        Ho = Ho - reach

        # --- convolution: one whole-batch matmul per tap, f32 MXU accumulation ---
        z = jnp.dot(slab[0:Lo, :], W[0], preferred_element_type=jnp.float32)
        for i in range(1, kh):
            z = z + jnp.dot(slab[i * dh:i * dh + Lo, :], W[i],
                            preferred_element_type=jnp.float32)

        if bn:
            # --- BatchNorm: training-mode batch stats over the B*Ho valid rows ---
            valid = pos[0:Lo, :] < float(Ho)                       # (Lo, 1)
            zm = jnp.where(valid, z, 0.0)
            inv_n = 1.0 / float(B * Ho)
            mean = zm.sum(axis=0, keepdims=True) * inv_n
            var = jnp.maximum((zm * zm).sum(axis=0, keepdims=True) * inv_n
                              - mean * mean, 0.0)                  # biased, like torch
            scale = jax.lax.rsqrt(var + EPS) * prm["gamma"][...]
            shift = prm["beta"][...] - mean * scale
            z = z * scale + shift
        else:
            z = z + prm["b"][...]                                  # bias only when no BN

        slab = jnp.where(z > 0, z, SLOPE * z)                      # LeakyReLU(0.2)
        L = Lo
    return slab                                 # (L_final, 128); valid rows at b*H0


def fused_disc_kernel(*refs, B, pep_cfg, mhc_cfg, H0_pep, H0_mhc):
    out_ref = refs[-1]                                             # (B, 128)
    it = iter(refs[:-1])
    x1_ref = next(it)                                              # (B*10, 12)
    x2_ref = next(it)                                              # (B*46, 12)
    pos1_ref = next(it)                                            # (B*10, 1)
    pos2_ref = next(it)                                            # (B*46, 1)

    def take(cfgs):
        prms = []
        for c in cfgs:
            p = {"w": next(it)}
            if c["bn"]:
                p["gamma"] = next(it)
                p["beta"] = next(it)
            else:
                p["b"] = next(it)
            prms.append(p)
        return prms

    pep_prm = take(pep_cfg)
    mhc_prm = take(mhc_cfg)
    s1_ref = next(it)                                              # (B, L_pep_final)
    s2_ref = next(it)                                              # (B, L_mhc_final)
    w1p_ref = next(it)                                             # (128, 128) fc1 rows (pep)
    w1m_ref = next(it)                                             # (128, 128) fc1 rows (mhc)
    b1_ref = next(it)                                              # (1, 128)
    w2_ref = next(it)                                              # (128, 128) (only col 0 real)
    b2_ref = next(it)                                              # (1, 128)

    # TODO(synk): on v7x the two independent branches could run on separate TensorCores
    # (pl.core_map over a 2-core mesh); kept single-core here (v5e/v6e have 1 TC).
    pep_slab = _conv_branch(x1_ref[...], pos1_ref[...], pep_cfg, pep_prm, H0_pep, B)
    mhc_slab = _conv_branch(x2_ref[...], pos2_ref[...], mhc_cfg, mhc_prm, H0_mhc, B)

    # Gather per-batch feature rows (row b*H0) into dense (B, 128) matrices via one
    # tiny selection matmul per branch (no in-kernel reshapes / strided slices).
    pep_feat = jnp.dot(s1_ref[...], pep_slab, preferred_element_type=jnp.float32)
    mhc_feat = jnp.dot(s2_ref[...], mhc_slab, preferred_element_type=jnp.float32)

    # Head, fully batched: cat([pep, mhc]) @ w1 == pep @ w1[:128] + mhc @ w1[128:]
    h = (jnp.dot(pep_feat, w1p_ref[...], preferred_element_type=jnp.float32)
         + jnp.dot(mhc_feat, w1m_ref[...], preferred_element_type=jnp.float32)
         + b1_ref[...])
    h = jnp.maximum(h, 0.0)
    o = jnp.dot(h, w2_ref[...], preferred_element_type=jnp.float32) + b2_ref[...]
    # sigmoid via EUP exp + approximate reciprocal; single lane-dense store.
    out_ref[...] = pl.reciprocal(1.0 + jnp.exp(-o), approx=True)


# ----------------------------------------------------------------------------
# Wrapper
# ----------------------------------------------------------------------------
def _flatten_branch(layers):
    flat = []
    for L in layers:
        flat.append(L["w"])
        if L["bn"]:
            flat += [L["gamma"], L["beta"]]
        else:
            flat.append(L["b"])
    return flat


def _branch_meta(layers, H0, B):
    cfg = tuple(dict(kh=L["kh"], dh=L["dh"], bn=L["bn"]) for L in layers)
    reach = sum(L["dh"] * (L["kh"] - 1) for L in layers)
    L_final = B * H0 - reach
    pos = (jnp.arange(B * H0, dtype=jnp.float32) % H0).reshape(B * H0, 1)
    sel = (jnp.arange(L_final)[None, :]
           == (jnp.arange(B) * H0)[:, None]).astype(jnp.float32)   # (B, L_final)
    return cfg, pos, sel


def discriminator_forward(x1, x2, pep_layers, mhc_layers, head):
    B = x1.shape[0]
    H0_pep, H0_mhc = x1.shape[2], x2.shape[2]
    pep_cfg, pos1, sel1 = _branch_meta(pep_layers, H0_pep, B)
    mhc_cfg, pos2, sel2 = _branch_meta(mhc_layers, H0_mhc, B)

    # Fold batch into the row (sublane) axis in the wrapper (free layout plumbing).
    x1_slab = x1[:, 0, :, :].reshape(B * H0_pep, x1.shape[3])
    x2_slab = x2[:, 0, :, :].reshape(B * H0_mhc, x2.shape[3])

    args = ([x1_slab, x2_slab, pos1, pos2]
            + _flatten_branch(pep_layers) + _flatten_branch(mhc_layers)
            + [sel1, sel2, head["w1p"], head["w1m"], head["b1"], head["w2"], head["b2"]])

    # Grid-less call: everything (weights + activations, well under 1 MB) lives in
    # VMEM for the whole forward.  A batch-chunk grid only becomes useful at B>=16.
    vmem = pl.BlockSpec(memory_space=pltpu.MemorySpace.VMEM)
    out_padded = pl.pallas_call(
        functools.partial(fused_disc_kernel, B=B, pep_cfg=pep_cfg, mhc_cfg=mhc_cfg,
                          H0_pep=H0_pep, H0_mhc=H0_mhc),
        out_shape=jax.ShapeDtypeStruct((B, OUT_LANES), jnp.float32),
        in_specs=[vmem] * len(args),
        out_specs=vmem,
    )(*args)
    return out_padded[:, :1]                                       # real scalar is lane 0


# ----------------------------------------------------------------------------
# Parameter construction (deterministic; torch-shaped originals kept for the ref)
# ----------------------------------------------------------------------------
def make_conv_layer(key, oc, ic, kh, kw, dh, use_bn):
    kw_key, kb_key = jax.random.split(key)
    w = 0.05 * jax.random.normal(kw_key, (oc, ic, kh, kw), jnp.float32)  # torch (OC,IC,KH,KW)
    b = 0.05 * jax.random.normal(kb_key, (oc,), jnp.float32)

    if kw > 1:   # first layer: ic == 1, kernel spans the full embed width
        taps = jnp.transpose(w[:, 0, :, :], (1, 2, 0))                   # (kh, kw, oc)
    else:        # (kh, 1) kernels applied to (rows, Cin) activations
        taps = jnp.transpose(w[:, :, :, 0], (2, 1, 0))                   # (kh, ic, oc)

    layer = dict(kh=kh, dh=dh, bn=use_bn, w=taps, w_torch=w, b_torch=b)
    if use_bn:
        # conv bias is exactly cancelled by BN mean subtraction -> folded away
        layer["gamma"] = jnp.ones((1, oc), jnp.float32)                  # torch BN defaults
        layer["beta"] = jnp.zeros((1, oc), jnp.float32)
    else:
        layer["b"] = b[None, :]                                          # (1, oc)
    return layer


def build_params(key):
    keys = jax.random.split(key, 16)
    # Discriminator_peptide: channels=1, features=16, embed=12
    pep = [
        make_conv_layer(keys[0], 16, 1, 3, 12, 1, False),
        make_conv_layer(keys[1], 32, 16, 5, 1, 1, True),
        make_conv_layer(keys[2], 64, 32, 3, 1, 1, True),
        make_conv_layer(keys[3], 128, 64, 2, 1, 1, True),
    ]
    # Discriminator_MHC: channels=1, features=16, embed=12
    mhc = [
        make_conv_layer(keys[4], 16, 1, 15, 12, 1, False),
        make_conv_layer(keys[5], 32, 16, 9, 1, 2, True),
        make_conv_layer(keys[6], 64, 32, 5, 1, 2, True),
        make_conv_layer(keys[7], 128, 64, 3, 1, 2, True),
        make_conv_layer(keys[8], 128, 128, 4, 1, 1, True),
    ]
    w1 = 0.05 * jax.random.normal(keys[9], (256, 128), jnp.float32)
    b1 = 0.05 * jax.random.normal(keys[10], (1, 128), jnp.float32)
    w2 = 0.05 * jax.random.normal(keys[11], (128, 1), jnp.float32)
    b2 = 0.05 * jax.random.normal(keys[12], (1, 1), jnp.float32)
    head = dict(
        w1=w1, b1=b1, w2_raw=w2, b2_raw=b2,
        w1p=w1[:128], w1m=w1[128:],
        w2=jnp.pad(w2, ((0, 0), (0, OUT_LANES - 1))),
        b2=jnp.pad(b2, ((0, 0), (0, OUT_LANES - 1))),
    )
    return pep, mhc, head


# ----------------------------------------------------------------------------
# Pure-JAX reference (lax.conv) used only as an in-script correctness check
# ----------------------------------------------------------------------------
def ref_forward(x1, x2, pep_layers, mhc_layers, head):
    hi = jax.lax.Precision.HIGHEST

    def branch(x, layers):
        h = x
        for L in layers:
            h = jax.lax.conv_general_dilated(
                h, L["w_torch"], window_strides=(1, 1), padding="VALID",
                rhs_dilation=(L["dh"], 1),
                dimension_numbers=("NCHW", "OIHW", "NCHW"), precision=hi)
            if L["bn"]:
                mean = jnp.mean(h, axis=(0, 2, 3), keepdims=True)
                var = jnp.mean((h - mean) ** 2, axis=(0, 2, 3), keepdims=True)
                h = (h - mean) * jax.lax.rsqrt(var + EPS)     # gamma=1, beta=0
            else:
                h = h + L["b_torch"].reshape(1, -1, 1, 1)
            h = jnp.where(h > 0, h, SLOPE * h)
        return h.reshape(h.shape[0], -1)

    o = jnp.concatenate([branch(x1, pep_layers), branch(x2, mhc_layers)], axis=1)
    hfc = jnp.maximum(jnp.dot(o, head["w1"], precision=hi) + head["b1"], 0.0)
    return jax.nn.sigmoid(jnp.dot(hfc, head["w2_raw"], precision=hi) + head["b2_raw"])


# ----------------------------------------------------------------------------
if __name__ == "__main__":
    key = jax.random.PRNGKey(0)
    k_x1, k_x2, k_params = jax.random.split(key, 3)

    B = 2
    x1 = jax.random.normal(k_x1, (B, 1, 10, 12), jnp.float32)   # peptide (NCHW)
    x2 = jax.random.normal(k_x2, (B, 1, 46, 12), jnp.float32)   # MHC (NCHW)

    pep_layers, mhc_layers, head = build_params(k_params)

    fwd = jax.jit(lambda a, b: discriminator_forward(a, b, pep_layers, mhc_layers, head))
    out = jax.block_until_ready(fwd(x1, x2))

    assert out.shape == (B, 1), out.shape
    ref = ref_forward(x1, x2, pep_layers, mhc_layers, head)
    assert jnp.allclose(out, ref, atol=2e-3, rtol=2e-3), (out, ref)
    assert bool(jnp.all((out >= 0.0) & (out <= 1.0)))
    print("KERNEL_OK")
</pallas_src>

<mosaic_0001>
module attributes {stable_mosaic.version = 11 : i64} {
  func.func @fused_disc_kernel(%arg0: memref<20x12xf32, #tpu.memory_space<vmem>>, %arg1: memref<92x12xf32, #tpu.memory_space<vmem>>, %arg2: memref<20x1xf32, #tpu.memory_space<vmem>>, %arg3: memref<92x1xf32, #tpu.memory_space<vmem>>, %arg4: memref<3x12x16xf32, #tpu.memory_space<vmem>>, %arg5: memref<1x16xf32, #tpu.memory_space<vmem>>, %arg6: memref<5x16x32xf32, #tpu.memory_space<vmem>>, %arg7: memref<1x32xf32, #tpu.memory_space<vmem>>, %arg8: memref<1x32xf32, #tpu.memory_space<vmem>>, %arg9: memref<3x32x64xf32, #tpu.memory_space<vmem>>, %arg10: memref<1x64xf32, #tpu.memory_space<vmem>>, %arg11: memref<1x64xf32, #tpu.memory_space<vmem>>, %arg12: memref<2x64x128xf32, #tpu.memory_space<vmem>>, %arg13: memref<1x128xf32, #tpu.memory_space<vmem>>, %arg14: memref<1x128xf32, #tpu.memory_space<vmem>>, %arg15: memref<15x12x16xf32, #tpu.memory_space<vmem>>, %arg16: memref<1x16xf32, #tpu.memory_space<vmem>>, %arg17: memref<9x16x32xf32, #tpu.memory_space<vmem>>, %arg18: memref<1x32xf32, #tpu.memory_space<vmem>>, %arg19: memref<1x32xf32, #tpu.memory_space<vmem>>, %arg20: memref<5x32x64xf32, #tpu.memory_space<vmem>>, %arg21: memref<1x64xf32, #tpu.memory_space<vmem>>, %arg22: memref<1x64xf32, #tpu.memory_space<vmem>>, %arg23: memref<3x64x128xf32, #tpu.memory_space<vmem>>, %arg24: memref<1x128xf32, #tpu.memory_space<vmem>>, %arg25: memref<1x128xf32, #tpu.memory_space<vmem>>, %arg26: memref<4x128x128xf32, #tpu.memory_space<vmem>>, %arg27: memref<1x128xf32, #tpu.memory_space<vmem>>, %arg28: memref<1x128xf32, #tpu.memory_space<vmem>>, %arg29: memref<2x11xf32, #tpu.memory_space<vmem>>, %arg30: memref<2x47xf32, #tpu.memory_space<vmem>>, %arg31: memref<128x128xf32, #tpu.memory_space<vmem>>, %arg32: memref<128x128xf32, #tpu.memory_space<vmem>>, %arg33: memref<1x128xf32, #tpu.memory_space<vmem>>, %arg34: memref<128x128xf32, #tpu.memory_space<vmem>>, %arg35: memref<1x128xf32, #tpu.memory_space<vmem>>, %arg36: memref<2x128xf32, #tpu.memory_space<vmem>>) attributes {dimension_semantics = [], scalar_prefetch = 0 : i64, scratch_operands = 0 : i64, tpu.core_type = #tpu.core_type<tc>} {
    %c0 = arith.constant 0 : index
    %c0_0 = arith.constant 0 : index
    %0 = vector.load %arg0[%c0, %c0_0] : memref<20x12xf32, #tpu.memory_space<vmem>>, vector<20x12xf32>
    %c0_1 = arith.constant 0 : index
    %c0_2 = arith.constant 0 : index
    %1 = vector.load %arg2[%c0_1, %c0_2] : memref<20x1xf32, #tpu.memory_space<vmem>>, vector<20x1xf32>
    %c0_3 = arith.constant 0 : index
    %c0_4 = arith.constant 0 : index
    %c0_5 = arith.constant 0 : index
    %2 = vector.load %arg4[%c0_3, %c0_4, %c0_5] : memref<3x12x16xf32, #tpu.memory_space<vmem>>, vector<3x12x16xf32>
    %3 = vector.extract_strided_slice %0 {offsets = [0, 0], sizes = [18, 12], strides = [1, 1]} : vector<20x12xf32> to vector<18x12xf32>
    %4 = vector.extract_strided_slice %2 {offsets = [0, 0, 0], sizes = [1, 12, 16], strides = [1, 1, 1]} : vector<3x12x16xf32> to vector<1x12x16xf32>
    %5 = vector.shape_cast %4 : vector<1x12x16xf32> to vector<12x16xf32>
    %cst = arith.constant dense<0.000000e+00> : vector<18x16xf32>
    %6 = tpu.matmul %3, %5, %cst {dimension_numbers = #tpu.dot_dimension_numbers<[1], [0], [0], [1], [0, 0, 1, 1], [], []>} : vector<18x12xf32>, vector<12x16xf32>, vector<18x16xf32> -> vector<18x16xf32>
    %7 = vector.extract_strided_slice %0 {offsets = [1, 0], sizes = [18, 12], strides = [1, 1]} : vector<20x12xf32> to vector<18x12xf32>
    %8 = vector.extract_strided_slice %2 {offsets = [1, 0, 0], sizes = [1, 12, 16], strides = [1, 1, 1]} : vector<3x12x16xf32> to vector<1x12x16xf32>
    %9 = vector.shape_cast %8 : vector<1x12x16xf32> to vector<12x16xf32>
    %cst_6 = arith.constant dense<0.000000e+00> : vector<18x16xf32>
    %10 = tpu.matmul %7, %9, %cst_6 {dimension_numbers = #tpu.dot_dimension_numbers<[1], [0], [0], [1], [0, 0, 1, 1], [], []>} : vector<18x12xf32>, vector<12x16xf32>, vector<18x16xf32> -> vector<18x16xf32>
    %11 = arith.addf %6, %10 : vector<18x16xf32>
    %12 = vector.extract_strided_slice %0 {offsets = [2, 0], sizes = [18, 12], strides = [1, 1]} : vector<20x12xf32> to vector<18x12xf32>
    %13 = vector.extract_strided_slice %2 {offsets = [2, 0, 0], sizes = [1, 12, 16], strides = [1, 1, 1]} : vector<3x12x16xf32> to vector<1x12x16xf32>
    %14 = vector.shape_cast %13 : vector<1x12x16xf32> to vector<12x16xf32>
    %cst_7 = arith.constant dense<0.000000e+00> : vector<18x16xf32>
    %15 = tpu.matmul %12, %14, %cst_7 {dimension_numbers = #tpu.dot_dimension_numbers<[1], [0], [0], [1], [0, 0, 1, 1], [], []>} : vector<18x12xf32>, vector<12x16xf32>, vector<18x16xf32> -> vector<18x16xf32>
    %16 = arith.addf %11, %15 : vector<18x16xf32>
    %c0_8 = arith.constant 0 : index
    %c0_9 = arith.constant 0 : index
    %17 = vector.load %arg5[%c0_8, %c0_9] : memref<1x16xf32, #tpu.memory_space<vmem>>, vector<1x16xf32>
    %18 = vector.broadcast %17 : vector<1x16xf32> to vector<18x16xf32>
    %19 = arith.addf %16, %18 : vector<18x16xf32>
    %cst_10 = arith.constant 0.000000e+00 : f32
    %20 = vector.broadcast %cst_10 : f32 to vector<18x16xf32>
    %21 = arith.cmpf ogt, %19, %20 : vector<18x16xf32>
    %cst_11 = arith.constant 2.000000e-01 : f32
    %22 = vector.broadcast %cst_11 : f32 to vector<18x16xf32>
    %23 = arith.mulf %22, %19 : vector<18x16xf32>
    %24 = arith.select %21, %19, %23 : vector<18x16xi1>, vector<18x16xf32>
    %c0_12 = arith.constant 0 : index
    %c0_13 = arith.constant 0 : index
    %c0_14 = arith.constant 0 : index
    %25 = vector.load %arg6[%c0_12, %c0_13, %c0_14] : memref<5x16x32xf32, #tpu.memory_space<vmem>>, vector<5x16x32xf32>
    %26 = vector.extract_strided_slice %24 {offsets = [0, 0], sizes = [14, 16], strides = [1, 1]} : vector<18x16xf32> to vector<14x16xf32>
    %27 = vector.extract_strided_slice %25 {offsets = [0, 0, 0], sizes = [1, 16, 32], strides = [1, 1, 1]} : vector<5x16x32xf32> to vector<1x16x32xf32>
    %28 = vector.shape_cast %27 : vector<1x16x32xf32> to vector<16x32xf32>
    %cst_15 = arith.constant dense<0.000000e+00> : vector<14x32xf32>
    %29 = tpu.matmul %26, %28, %cst_15 {dimension_numbers = #tpu.dot_dimension_numbers<[1], [0], [0], [1], [0, 0, 1, 1], [], []>} : vector<14x16xf32>, vector<16x32xf32>, vector<14x32xf32> -> vector<14x32xf32>
    %30 = vector.extract_strided_slice %24 {offsets = [1, 0], sizes = [14, 16], strides = [1, 1]} : vector<18x16xf32> to vector<14x16xf32>
    %31 = vector.extract_strided_slice %25 {offsets = [1, 0, 0], sizes = [1, 16, 32], strides = [1, 1, 1]} : vector<5x16x32xf32> to vector<1x16x32xf32>
    %32 = vector.shape_cast %31 : vector<1x16x32xf32> to vector<16x32xf32>
    %cst_16 = arith.constant dense<0.000000e+00> : vector<14x32xf32>
    %33 = tpu.matmul %30, %32, %cst_16 {dimension_numbers = #tpu.dot_dimension_numbers<[1], [0], [0], [1], [0, 0, 1, 1], [], []>} : vector<14x16xf32>, vector<16x32xf32>, vector<14x32xf32> -> vector<14x32xf32>
    %34 = arith.addf %29, %33 : vector<14x32xf32>
    %35 = vector.extract_strided_slice %24 {offsets = [2, 0], sizes = [14, 16], strides = [1, 1]} : vector<18x16xf32> to vector<14x16xf32>
    %36 = vector.extract_strided_slice %25 {offsets = [2, 0, 0], sizes = [1, 16, 32], strides = [1, 1, 1]} : vector<5x16x32xf32> to vector<1x16x32xf32>
    %37 = vector.shape_cast %36 : vector<1x16x32xf32> to vector<16x32xf32>
    %cst_17 = arith.constant dense<0.000000e+00> : vector<14x32xf32>
    %38 = tpu.matmul %35, %37, %cst_17 {dimension_numbers = #tpu.dot_dimension_numbers<[1], [0], [0], [1], [0, 0, 1, 1], [], []>} : vector<14x16xf32>, vector<16x32xf32>, vector<14x32xf32> -> vector<14x32xf32>
    %39 = arith.addf %34, %38 : vector<14x32xf32>
    %40 = vector.extract_strided_slice %24 {offsets = [3, 0], sizes = [14, 16], strides = [1, 1]} : vector<18x16xf32> to vector<14x16xf32>
    %41 = vector.extract_strided_slice %25 {offsets = [3, 0, 0], sizes = [1, 16, 32], strides = [1, 1, 1]} : vector<5x16x32xf32> to vector<1x16x32xf32>
    %42 = vector.shape_cast %41 : vector<1x16x32xf32> to vector<16x32xf32>
    %cst_18 = arith.constant dense<0.000000e+00> : vector<14x32xf32>
    %43 = tpu.matmul %40, %42, %cst_18 {dimension_numbers = #tpu.dot_dimension_numbers<[1], [0], [0], [1], [0, 0, 1, 1], [], []>} : vector<14x16xf32>, vector<16x32xf32>, vector<14x32xf32> -> vector<14x32xf32>
    %44 = arith.addf %39, %43 : vector<14x32xf32>
    %45 = vector.extract_strided_slice %24 {offsets = [4, 0], sizes = [14, 16], strides = [1, 1]} : vector<18x16xf32> to vector<14x16xf32>
    %46 = vector.extract_strided_slice %25 {offsets = [4, 0, 0], sizes = [1, 16, 32], strides = [1, 1, 1]} : vector<5x16x32xf32> to vector<1x16x32xf32>
    %47 = vector.shape_cast %46 : vector<1x16x32xf32> to vector<16x32xf32>
    %cst_19 = arith.constant dense<0.000000e+00> : vector<14x32xf32>
    %48 = tpu.matmul %45, %47, %cst_19 {dimension_numbers = #tpu.dot_dimension_numbers<[1], [0], [0], [1], [0, 0, 1, 1], [], []>} : vector<14x16xf32>, vector<16x32xf32>, vector<14x32xf32> -> vector<14x32xf32>
    %49 = arith.addf %44, %48 : vector<14x32xf32>
    %50 = vector.extract_strided_slice %1 {offsets = [0, 0], sizes = [14, 1], strides = [1, 1]} : vector<20x1xf32> to vector<14x1xf32>
    %cst_20 = arith.constant 4.000000e+00 : f32
    %51 = vector.broadcast %cst_20 : f32 to vector<14x1xf32>
    %52 = arith.cmpf olt, %50, %51 : vector<14x1xf32>
    %cst_21 = arith.constant 0.000000e+00 : f32
    %53 = vector.shape_cast %52 : vector<14x1xi1> to vector<14x1xi1>
    %54 = vector.broadcast %53 : vector<14x1xi1> to vector<14x32xi1>
    %55 = vector.broadcast %cst_21 : f32 to vector<14x32xf32>
    %56 = arith.select %54, %49, %55 : vector<14x32xi1>, vector<14x32xf32>
    %cst_22 = arith.constant dense<0.000000e+00> : vector<32xf32>
    %57 = vector.multi_reduction <add>, %56, %cst_22 [0] : vector<14x32xf32> to vector<32xf32>
    %58 = vector.shape_cast %57 : vector<32xf32> to vector<1x32xf32>
    %cst_23 = arith.constant 1.250000e-01 : f32
    %59 = vector.broadcast %cst_23 : f32 to vector<1x32xf32>
    %60 = arith.mulf %58, %59 : vector<1x32xf32>
    %61 = arith.mulf %56, %56 : vector<14x32xf32>
    %cst_24 = arith.constant dense<0.000000e+00> : vector<32xf32>
    %62 = vector.multi_reduction <add>, %61, %cst_24 [0] : vector<14x32xf32> to vector<32xf32>
    %63 = vector.shape_cast %62 : vector<32xf32> to vector<1x32xf32>
    %cst_25 = arith.constant 1.250000e-01 : f32
    %64 = vector.broadcast %cst_25 : f32 to vector<1x32xf32>
    %65 = arith.mulf %63, %64 : vector<1x32xf32>
    %66 = arith.mulf %60, %60 : vector<1x32xf32>
    %67 = arith.subf %65, %66 : vector<1x32xf32>
    %cst_26 = arith.constant 0.000000e+00 : f32
    %68 = vector.broadcast %cst_26 : f32 to vector<1x32xf32>
    %69 = arith.maximumf %67, %68 : vector<1x32xf32>
    %cst_27 = arith.constant 9.99999974E-6 : f32
    %70 = vector.broadcast %cst_27 : f32 to vector<1x32xf32>
    %71 = arith.addf %69, %70 : vector<1x32xf32>
    %72 = math.rsqrt %71 : vector<1x32xf32>
    %c0_28 = arith.constant 0 : index
    %c0_29 = arith.constant 0 : index
    %73 = vector.load %arg7[%c0_28, %c0_29] : memref<1x32xf32, #tpu.memory_space<vmem>>, vector<1x32xf32>
    %74 = arith.mulf %72, %73 : vector<1x32xf32>
    %c0_30 = arith.constant 0 : index
    %c0_31 = arith.constant 0 : index
    %75 = vector.load %arg8[%c0_30, %c0_31] : memref<1x32xf32, #tpu.memory_space<vmem>>, vector<1x32xf32>
    %76 = arith.mulf %60, %74 : vector<1x32xf32>
    %77 = arith.subf %75, %76 : vector<1x32xf32>
    %78 = vector.broadcast %74 : vector<1x32xf32> to vector<14x32xf32>
    %79 = arith.mulf %49, %78 : vector<14x32xf32>
    %80 = vector.broadcast %77 : vector<1x32xf32> to vector<14x32xf32>
    %81 = arith.addf %79, %80 : vector<14x32xf32>
    %cst_32 = arith.constant 0.000000e+00 : f32
    %82 = vector.broadcast %cst_32 : f32 to vector<14x32xf32>
    %83 = arith.cmpf ogt, %81, %82 : vector<14x32xf32>
    %cst_33 = arith.constant 2.000000e-01 : f32
    %84 = vector.broadcast %cst_33 : f32 to vector<14x32xf32>
    %85 = arith.mulf %84, %81 : vector<14x32xf32>
    %86 = arith.select %83, %81, %85 : vector<14x32xi1>, vector<14x32xf32>
    %c0_34 = arith.constant 0 : index
    %c0_35 = arith.constant 0 : index
    %c0_36 = arith.constant 0 : index
    %87 = vector.load %arg9[%c0_34, %c0_35, %c0_36] : memref<3x32x64xf32, #tpu.memory_space<vmem>>, vector<3x32x64xf32>
    %88 = vector.extract_strided_slice %86 {offsets = [0, 0], sizes = [12, 32], strides = [1, 1]} : vector<14x32xf32> to vector<12x32xf32>
    %89 = vector.extract_strided_slice %87 {offsets = [0, 0, 0], sizes = [1, 32, 64], strides = [1, 1, 1]} : vector<3x32x64xf32> to vector<1x32x64xf32>
    %90 = vector.shape_cast %89 : vector<1x32x64xf32> to vector<32x64xf32>
    %cst_37 = arith.constant dense<0.000000e+00> : vector<12x64xf32>
    %91 = tpu.matmul %88, %90, %cst_37 {dimension_numbers = #tpu.dot_dimension_numbers<[1], [0], [0], [1], [0, 0, 1, 1], [], []>} : vector<12x32xf32>, vector<32x64xf32>, vector<12x64xf32> -> vector<12x64xf32>
    %92 = vector.extract_strided_slice %86 {offsets = [1, 0], sizes = [12, 32], strides = [1, 1]} : vector<14x32xf32> to vector<12x32xf32>
    %93 = vector.extract_strided_slice %87 {offsets = [1, 0, 0], sizes = [1, 32, 64], strides = [1, 1, 1]} : vector<3x32x64xf32> to vector<1x32x64xf32>
    %94 = vector.shape_cast %93 : vector<1x32x64xf32> to vector<32x64xf32>
    %cst_38 = arith.constant dense<0.000000e+00> : vector<12x64xf32>
    %95 = tpu.matmul %92, %94, %cst_38 {dimension_numbers = #tpu.dot_dimension_numbers<[1], [0], [0], [1], [0, 0, 1, 1], [], []>} : vector<12x32xf32>, vector<32x64xf32>, vector<12x64xf32> -> vector<12x64xf32>
    %96 = arith.addf %91, %95 : vector<12x64xf32>
    %97 = vector.extract_strided_slice %86 {offsets = [2, 0], sizes = [12, 32], strides = [1, 1]} : vector<14x32xf32> to vector<12x32xf32>
    %98 = vector.extract_strided_slice %87 {offsets = [2, 0, 0], sizes = [1, 32, 64], strides = [1, 1, 1]} : vector<3x32x64xf32> to vector<1x32x64xf32>
    %99 = vector.shape_cast %98 : vector<1x32x64xf32> to vector<32x64xf32>
    %cst_39 = arith.constant dense<0.000000e+00> : vector<12x64xf32>
    %100 = tpu.matmul %97, %99, %cst_39 {dimension_numbers = #tpu.dot_dimension_numbers<[1], [0], [0], [1], [0, 0, 1, 1], [], []>} : vector<12x32xf32>, vector<32x64xf32>, vector<12x64xf32> -> vector<12x64xf32>
    %101 = arith.addf %96, %100 : vector<12x64xf32>
    %102 = vector.extract_strided_slice %1 {offsets = [0, 0], sizes = [12, 1], strides = [1, 1]} : vector<20x1xf32> to vector<12x1xf32>
    %cst_40 = arith.constant 2.000000e+00 : f32
    %103 = vector.broadcast %cst_40 : f32 to vector<12x1xf32>
    %104 = arith.cmpf olt, %102, %103 : vector<12x1xf32>
    %cst_41 = arith.constant 0.000000e+00 : f32
    %105 = vector.shape_cast %104 : vector<12x1xi1> to vector<12x1xi1>
    %106 = vector.broadcast %105 : vector<12x1xi1> to vector<12x64xi1>
    %107 = vector.broadcast %cst_41 : f32 to vector<12x64xf32>
    %108 = arith.select %106, %101, %107 : vector<12x64xi1>, vector<12x64xf32>
    %cst_42 = arith.constant dense<0.000000e+00> : vector<64xf32>
    %109 = vector.multi_reduction <add>, %108, %cst_42 [0] : vector<12x64xf32> to vector<64xf32>
    %110 = vector.shape_cast %109 : vector<64xf32> to vector<1x64xf32>
    %cst_43 = arith.constant 2.500000e-01 : f32
    %111 = vector.broadcast %cst_43 : f32 to vector<1x64xf32>
    %112 = arith.mulf %110, %111 : vector<1x64xf32>
    %113 = arith.mulf %108, %108 : vector<12x64xf32>
    %cst_44 = arith.constant dense<0.000000e+00> : vector<64xf32>
    %114 = vector.multi_reduction <add>, %113, %cst_44 [0] : vector<12x64xf32> to vector<64xf32>
    %115 = vector.shape_cast %114 : vector<64xf32> to vector<1x64xf32>
    %cst_45 = arith.constant 2.500000e-01 : f32
    %116 = vector.broadcast %cst_45 : f32 to vector<1x64xf32>
    %117 = arith.mulf %115, %116 : vector<1x64xf32>
    %118 = arith.mulf %112, %112 : vector<1x64xf32>
    %119 = arith.subf %117, %118 : vector<1x64xf32>
    %cst_46 = arith.constant 0.000000e+00 : f32
    %120 = vector.broadcast %cst_46 : f32 to vector<1x64xf32>
    %121 = arith.maximumf %119, %120 : vector<1x64xf32>
    %cst_47 = arith.constant 9.99999974E-6 : f32
    %122 = vector.broadcast %cst_47 : f32 to vector<1x64xf32>
    %123 = arith.addf %121, %122 : vector<1x64xf32>
    %124 = math.rsqrt %123 : vector<1x64xf32>
    %c0_48 = arith.constant 0 : index
    %c0_49 = arith.constant 0 : index
    %125 = vector.load %arg10[%c0_48, %c0_49] : memref<1x64xf32, #tpu.memory_space<vmem>>, vector<1x64xf32>
    %126 = arith.mulf %124, %125 : vector<1x64xf32>
    %c0_50 = arith.constant 0 : index
    %c0_51 = arith.constant 0 : index
    %127 = vector.load %arg11[%c0_50, %c0_51] : memref<1x64xf32, #tpu.memory_space<vmem>>, vector<1x64xf32>
    %128 = arith.mulf %112, %126 : vector<1x64xf32>
    %129 = arith.subf %127, %128 : vector<1x64xf32>
    %130 = vector.broadcast %126 : vector<1x64xf32> to vector<12x64xf32>
    %131 = arith.mulf %101, %130 : vector<12x64xf32>
    %132 = vector.broadcast %129 : vector<1x64xf32> to vector<12x64xf32>
    %133 = arith.addf %131, %132 : vector<12x64xf32>
    %cst_52 = arith.constant 0.000000e+00 : f32
    %134 = vector.broadcast %cst_52 : f32 to vector<12x64xf32>
    %135 = arith.cmpf ogt, %133, %134 : vector<12x64xf32>
    %cst_53 = arith.constant 2.000000e-01 : f32
    %136 = vector.broadcast %cst_53 : f32 to vector<12x64xf32>
    %137 = arith.mulf %136, %133 : vector<12x64xf32>
    %138 = arith.select %135, %133, %137 : vector<12x64xi1>, vector<12x64xf32>
    %c0_54 = arith.constant 0 : index
    %c0_55 = arith.constant 0 : index
    %c0_56 = arith.constant 0 : index
    %139 = vector.load %arg12[%c0_54, %c0_55, %c0_56] : memref<2x64x128xf32, #tpu.memory_space<vmem>>, vector<2x64x128xf32>
    %140 = vector.extract_strided_slice %138 {offsets = [0, 0], sizes = [11, 64], strides = [1, 1]} : vector<12x64xf32> to vector<11x64xf32>
    %141 = vector.extract_strided_slice %139 {offsets = [0, 0, 0], sizes = [1, 64, 128], strides = [1, 1, 1]} : vector<2x64x128xf32> to vector<1x64x128xf32>
    %142 = vector.shape_cast %141 : vector<1x64x128xf32> to vector<64x128xf32>
    %cst_57 = arith.constant dense<0.000000e+00> : vector<11x128xf32>
    %143 = tpu.matmul %140, %142, %cst_57 {dimension_numbers = #tpu.dot_dimension_numbers<[1], [0], [0], [1], [0, 0, 1, 1], [], []>} : vector<11x64xf32>, vector<64x128xf32>, vector<11x128xf32> -> vector<11x128xf32>
    %144 = vector.extract_strided_slice %138 {offsets = [1, 0], sizes = [11, 64], strides = [1, 1]} : vector<12x64xf32> to vector<11x64xf32>
    %145 = vector.extract_strided_slice %139 {offsets = [1, 0, 0], sizes = [1, 64, 128], strides = [1, 1, 1]} : vector<2x64x128xf32> to vector<1x64x128xf32>
    %146 = vector.shape_cast %145 : vector<1x64x128xf32> to vector<64x128xf32>
    %cst_58 = arith.constant dense<0.000000e+00> : vector<11x128xf32>
    %147 = tpu.matmul %144, %146, %cst_58 {dimension_numbers = #tpu.dot_dimension_numbers<[1], [0], [0], [1], [0, 0, 1, 1], [], []>} : vector<11x64xf32>, vector<64x128xf32>, vector<11x128xf32> -> vector<11x128xf32>
    %148 = arith.addf %143, %147 : vector<11x128xf32>
    %149 = vector.extract_strided_slice %1 {offsets = [0, 0], sizes = [11, 1], strides = [1, 1]} : vector<20x1xf32> to vector<11x1xf32>
    %cst_59 = arith.constant 1.000000e+00 : f32
    %150 = vector.broadcast %cst_59 : f32 to vector<11x1xf32>
    %151 = arith.cmpf olt, %149, %150 : vector<11x1xf32>
    %cst_60 = arith.constant 0.000000e+00 : f32
    %152 = vector.shape_cast %151 : vector<11x1xi1> to vector<11x1xi1>
    %153 = vector.broadcast %152 : vector<11x1xi1> to vector<11x128xi1>
    %154 = vector.broadcast %cst_60 : f32 to vector<11x128xf32>
    %155 = arith.select %153, %148, %154 : vector<11x128xi1>, vector<11x128xf32>
    %cst_61 = arith.constant dense<0.000000e+00> : vector<128xf32>
    %156 = vector.multi_reduction <add>, %155, %cst_61 [0] : vector<11x128xf32> to vector<128xf32>
    %157 = vector.shape_cast %156 : vector<128xf32> to vector<1x128xf32>
    %cst_62 = arith.constant 5.000000e-01 : f32
    %158 = vector.broadcast %cst_62 : f32 to vector<1x128xf32>
    %159 = arith.mulf %157, %158 : vector<1x128xf32>
    %160 = arith.mulf %155, %155 : vector<11x128xf32>
    %cst_63 = arith.constant dense<0.000000e+00> : vector<128xf32>
    %161 = vector.multi_reduction <add>, %160, %cst_63 [0] : vector<11x128xf32> to vector<128xf32>
    %162 = vector.shape_cast %161 : vector<128xf32> to vector<1x128xf32>
    %cst_64 = arith.constant 5.000000e-01 : f32
    %163 = vector.broadcast %cst_64 : f32 to vector<1x128xf32>
    %164 = arith.mulf %162, %163 : vector<1x128xf32>
    %165 = arith.mulf %159, %159 : vector<1x128xf32>
    %166 = arith.subf %164, %165 : vector<1x128xf32>
    %cst_65 = arith.constant 0.000000e+00 : f32
    %167 = vector.broadcast %cst_65 : f32 to vector<1x128xf32>
    %168 = arith.maximumf %166, %167 : vector<1x128xf32>
    %cst_66 = arith.constant 9.99999974E-6 : f32
    %169 = vector.broadcast %cst_66 : f32 to vector<1x128xf32>
    %170 = arith.addf %168, %169 : vector<1x128xf32>
    %171 = math.rsqrt %170 : vector<1x128xf32>
    %c0_67 = arith.constant 0 : index
    %c0_68 = arith.constant 0 : index
    %172 = vector.load %arg13[%c0_67, %c0_68] : memref<1x128xf32, #tpu.memory_space<vmem>>, vector<1x128xf32>
    %173 = arith.mulf %171, %172 : vector<1x128xf32>
    %c0_69 = arith.constant 0 : index
    %c0_70 = arith.constant 0 : index
    %174 = vector.load %arg14[%c0_69, %c0_70] : memref<1x128xf32, #tpu.memory_space<vmem>>, vector<1x128xf32>
    %175 = arith.mulf %159, %173 : vector<1x128xf32>
    %176 = arith.subf %174, %175 : vector<1x128xf32>
    %177 = vector.broadcast %173 : vector<1x128xf32> to vector<11x128xf32>
    %178 = arith.mulf %148, %177 : vector<11x128xf32>
    %179 = vector.broadcast %176 : vector<1x128xf32> to vector<11x128xf32>
    %180 = arith.addf %178, %179 : vector<11x128xf32>
    %cst_71 = arith.constant 0.000000e+00 : f32
    %181 = vector.broadcast %cst_71 : f32 to vector<11x128xf32>
    %182 = arith.cmpf ogt, %180, %181 : vector<11x128xf32>
    %cst_72 = arith.constant 2.000000e-01 : f32
    %183 = vector.broadcast %cst_72 : f32 to vector<11x128xf32>
    %184 = arith.mulf %183, %180 : vector<11x128xf32>
    %185 = arith.select %182, %180, %184 : vector<11x128xi1>, vector<11x128xf32>
    %c0_73 = arith.constant 0 : index
    %c0_74 = arith.constant 0 : index
    %186 = vector.load %arg1[%c0_73, %c0_74] : memref<92x12xf32, #tpu.memory_space<vmem>>, vector<92x12xf32>
    %c0_75 = arith.constant 0 : index
    %c0_76 = arith.constant 0 : index
    %187 = vector.load %arg3[%c0_75, %c0_76] : memref<92x1xf32, #tpu.memory_space<vmem>>, vector<92x1xf32>
    %c0_77 = arith.constant 0 : index
    %c0_78 = arith.constant 0 : index
    %c0_79 = arith.constant 0 : index
    %188 = vector.load %arg15[%c0_77, %c0_78, %c0_79] : memref<15x12x16xf32, #tpu.memory_space<vmem>>, vector<15x12x16xf32>
    %189 = vector.extract_strided_slice %186 {offsets = [0, 0], sizes = [78, 12], strides = [1, 1]} : vector<92x12xf32> to vector<78x12xf32>
    %190 = vector.extract_strided_slice %188 {offsets = [0, 0, 0], sizes = [1, 12, 16], strides = [1, 1, 1]} : vector<15x12x16xf32> to vector<1x12x16xf32>
    %191 = vector.shape_cast %190 : vector<1x12x16xf32> to vector<12x16xf32>
    %cst_80 = arith.constant dense<0.000000e+00> : vector<78x16xf32>
    %192 = tpu.matmul %189, %191, %cst_80 {dimension_numbers = #tpu.dot_dimension_numbers<[1], [0], [0], [1], [0, 0, 1, 1], [], []>} : vector<78x12xf32>, vector<12x16xf32>, vector<78x16xf32> -> vector<78x16xf32>
    %193 = vector.extract_strided_slice %186 {offsets = [1, 0], sizes = [78, 12], strides = [1, 1]} : vector<92x12xf32> to vector<78x12xf32>
    %194 = vector.extract_strided_slice %188 {offsets = [1, 0, 0], sizes = [1, 12, 16], strides = [1, 1, 1]} : vector<15x12x16xf32> to vector<1x12x16xf32>
    %195 = vector.shape_cast %194 : vector<1x12x16xf32> to vector<12x16xf32>
    %cst_81 = arith.constant dense<0.000000e+00> : vector<78x16xf32>
    %196 = tpu.matmul %193, %195, %cst_81 {dimension_numbers = #tpu.dot_dimension_numbers<[1], [0], [0], [1], [0, 0, 1, 1], [], []>} : vector<78x12xf32>, vector<12x16xf32>, vector<78x16xf32> -> vector<78x16xf32>
    %197 = arith.addf %192, %196 : vector<78x16xf32>
    %198 = vector.extract_strided_slice %186 {offsets = [2, 0], sizes = [78, 12], strides = [1, 1]} : vector<92x12xf32> to vector<78x12xf32>
    %199 = vector.extract_strided_slice %188 {offsets = [2, 0, 0], sizes = [1, 12, 16], strides = [1, 1, 1]} : vector<15x12x16xf32> to vector<1x12x16xf32>
    %200 = vector.shape_cast %199 : vector<1x12x16xf32> to vector<12x16xf32>
    %cst_82 = arith.constant dense<0.000000e+00> : vector<78x16xf32>
    %201 = tpu.matmul %198, %200, %cst_82 {dimension_numbers = #tpu.dot_dimension_numbers<[1], [0], [0], [1], [0, 0, 1, 1], [], []>} : vector<78x12xf32>, vector<12x16xf32>, vector<78x16xf32> -> vector<78x16xf32>
    %202 = arith.addf %197, %201 : vector<78x16xf32>
    %203 = vector.extract_strided_slice %186 {offsets = [3, 0], sizes = [78, 12], strides = [1, 1]} : vector<92x12xf32> to vector<78x12xf32>
    %204 = vector.extract_strided_slice %188 {offsets = [3, 0, 0], sizes = [1, 12, 16], strides = [1, 1, 1]} : vector<15x12x16xf32> to vector<1x12x16xf32>
    %205 = vector.shape_cast %204 : vector<1x12x16xf32> to vector<12x16xf32>
    %cst_83 = arith.constant dense<0.000000e+00> : vector<78x16xf32>
    %206 = tpu.matmul %203, %205, %cst_83 {dimension_numbers = #tpu.dot_dimension_numbers<[1], [0], [0], [1], [0, 0, 1, 1], [], []>} : vector<78x12xf32>, vector<12x16xf32>, vector<78x16xf32> -> vector<78x16xf32>
    %207 = arith.addf %202, %206 : vector<78x16xf32>
    %208 = vector.extract_strided_slice %186 {offsets = [4, 0], sizes = [78, 12], strides = [1, 1]} : vector<92x12xf32> to vector<78x12xf32>
    %209 = vector.extract_strided_slice %188 {offsets = [4, 0, 0], sizes = [1, 12, 16], strides = [1, 1, 1]} : vector<15x12x16xf32> to vector<1x12x16xf32>
    %210 = vector.shape_cast %209 : vector<1x12x16xf32> to vector<12x16xf32>
    %cst_84 = arith.constant dense<0.000000e+00> : vector<78x16xf32>
    %211 = tpu.matmul %208, %210, %cst_84 {dimension_numbers = #tpu.dot_dimension_numbers<[1], [0], [0], [1], [0, 0, 1, 1], [], []>} : vector<78x12xf32>, vector<12x16xf32>, vector<78x16xf32> -> vector<78x16xf32>
    %212 = arith.addf %207, %211 : vector<78x16xf32>
    %213 = vector.extract_strided_slice %186 {offsets = [5, 0], sizes = [78, 12], strides = [1, 1]} : vector<92x12xf32> to vector<78x12xf32>
    %214 = vector.extract_strided_slice %188 {offsets = [5, 0, 0], sizes = [1, 12, 16], strides = [1, 1, 1]} : vector<15x12x16xf32> to vector<1x12x16xf32>
    %215 = vector.shape_cast %214 : vector<1x12x16xf32> to vector<12x16xf32>
    %cst_85 = arith.constant dense<0.000000e+00> : vector<78x16xf32>
    %216 = tpu.matmul %213, %215, %cst_85 {dimension_numbers = #tpu.dot_dimension_numbers<[1], [0], [0], [1], [0, 0, 1, 1], [], []>} : vector<78x12xf32>, vector<12x16xf32>, vector<78x16xf32> -> vector<78x16xf32>
    %217 = arith.addf %212, %216 : vector<78x16xf32>
    %218 = vector.extract_strided_slice %186 {offsets = [6, 0], sizes = [78, 12], strides = [1, 1]} : vector<92x12xf32> to vector<78x12xf32>
    %219 = vector.extract_strided_slice %188 {offsets = [6, 0, 0], sizes = [1, 12, 16], strides = [1, 1, 1]} : vector<15x12x16xf32> to vector<1x12x16xf32>
    %220 = vector.shape_cast %219 : vector<1x12x16xf32> to vector<12x16xf32>
    %cst_86 = arith.constant dense<0.000000e+00> : vector<78x16xf32>
    %221 = tpu.matmul %218, %220, %cst_86 {dimension_numbers = #tpu.dot_dimension_numbers<[1], [0], [0], [1], [0, 0, 1, 1], [], []>} : vector<78x12xf32>, vector<12x16xf32>, vector<78x16xf32> -> vector<78x16xf32>
    %222 = arith.addf %217, %221 : vector<78x16xf32>
    %223 = vector.extract_strided_slice %186 {offsets = [7, 0], sizes = [78, 12], strides = [1, 1]} : vector<92x12xf32> to vector<78x12xf32>
    %224 = vector.extract_strided_slice %188 {offsets = [7, 0, 0], sizes = [1, 12, 16], strides = [1, 1, 1]} : vector<15x12x16xf32> to vector<1x12x16xf32>
    %225 = vector.shape_cast %224 : vector<1x12x16xf32> to vector<12x16xf32>
    %cst_87 = arith.constant dense<0.000000e+00> : vector<78x16xf32>
    %226 = tpu.matmul %223, %225, %cst_87 {dimension_numbers = #tpu.dot_dimension_numbers<[1], [0], [0], [1], [0, 0, 1, 1], [], []>} : vector<78x12xf32>, vector<12x16xf32>, vector<78x16xf32> -> vector<78x16xf32>
    %227 = arith.addf %222, %226 : vector<78x16xf32>
    %228 = vector.extract_strided_slice %186 {offsets = [8, 0], sizes = [78, 12], strides = [1, 1]} : vector<92x12xf32> to vector<78x12xf32>
    %229 = vector.extract_strided_slice %188 {offsets = [8, 0, 0], sizes = [1, 12, 16], strides = [1, 1, 1]} : vector<15x12x16xf32> to vector<1x12x16xf32>
    %230 = vector.shape_cast %229 : vector<1x12x16xf32> to vector<12x16xf32>
    %cst_88 = arith.constant dense<0.000000e+00> : vector<78x16xf32>
    %231 = tpu.matmul %228, %230, %cst_88 {dimension_numbers = #tpu.dot_dimension_numbers<[1], [0], [0], [1], [0, 0, 1, 1], [], []>} : vector<78x12xf32>, vector<12x16xf32>, vector<78x16xf32> -> vector<78x16xf32>
    %232 = arith.addf %227, %231 : vector<78x16xf32>
    %233 = vector.extract_strided_slice %186 {offsets = [9, 0], sizes = [78, 12], strides = [1, 1]} : vector<92x12xf32> to vector<78x12xf32>
    %234 = vector.extract_strided_slice %188 {offsets = [9, 0, 0], sizes = [1, 12, 16], strides = [1, 1, 1]} : vector<15x12x16xf32> to vector<1x12x16xf32>
    %235 = vector.shape_cast %234 : vector<1x12x16xf32> to vector<12x16xf32>
    %cst_89 = arith.constant dense<0.000000e+00> : vector<78x16xf32>
    %236 = tpu.matmul %233, %235, %cst_89 {dimension_numbers = #tpu.dot_dimension_numbers<[1], [0], [0], [1], [0, 0, 1, 1], [], []>} : vector<78x12xf32>, vector<12x16xf32>, vector<78x16xf32> -> vector<78x16xf32>
    %237 = arith.addf %232, %236 : vector<78x16xf32>
    %238 = vector.extract_strided_slice %186 {offsets = [10, 0], sizes = [78, 12], strides = [1, 1]} : vector<92x12xf32> to vector<78x12xf32>
    %239 = vector.extract_strided_slice %188 {offsets = [10, 0, 0], sizes = [1, 12, 16], strides = [1, 1, 1]} : vector<15x12x16xf32> to vector<1x12x16xf32>
    %240 = vector.shape_cast %239 : vector<1x12x16xf32> to vector<12x16xf32>
    %cst_90 = arith.constant dense<0.000000e+00> : vector<78x16xf32>
    %241 = tpu.matmul %238, %240, %cst_90 {dimension_numbers = #tpu.dot_dimension_numbers<[1], [0], [0], [1], [0, 0, 1, 1], [], []>} : vector<78x12xf32>, vector<12x16xf32>, vector<78x16xf32> -> vector<78x16xf32>
    %242 = arith.addf %237, %241 : vector<78x16xf32>
    %243 = vector.extract_strided_slice %186 {offsets = [11, 0], sizes = [78, 12], strides = [1, 1]} : vector<92x12xf32> to vector<78x12xf32>
    %244 = vector.extract_strided_slice %188 {offsets = [11, 0, 0], sizes = [1, 12, 16], strides = [1, 1, 1]} : vector<15x12x16xf32> to vector<1x12x16xf32>
    %245 = vector.shape_cast %244 : vector<1x12x16xf32> to vector<12x16xf32>
    %cst_91 = arith.constant dense<0.000000e+00> : vector<78x16xf32>
    %246 = tpu.matmul %243, %245, %cst_91 {dimension_numbers = #tpu.dot_dimension_numbers<[1], [0], [0], [1], [0, 0, 1, 1], [], []>} : vector<78x12xf32>, vector<12x16xf32>, vector<78x16xf32> -> vector<78x16xf32>
    %247 = arith.addf %242, %246 : vector<78x16xf32>
    %248 = vector.extract_strided_slice %186 {offsets = [12, 0], sizes = [78, 12], strides = [1, 1]} : vector<92x12xf32> to vector<78x12xf32>
    %249 = vector.extract_strided_slice %188 {offsets = [12, 0, 0], sizes = [1, 12, 16], strides = [1, 1, 1]} : vector<15x12x16xf32> to vector<1x12x16xf32>
    %250 = vector.shape_cast %249 : vector<1x12x16xf32> to vector<12x16xf32>
    %cst_92 = arith.constant dense<0.000000e+00> : vector<78x16xf32>
    %251 = tpu.matmul %248, %250, %cst_92 {dimension_numbers = #tpu.dot_dimension_numbers<[1], [0], [0], [1], [0, 0, 1, 1], [], []>} : vector<78x12xf32>, vector<12x16xf32>, vector<78x16xf32> -> vector<78x16xf32>
    %252 = arith.addf %247, %251 : vector<78x16xf32>
    %253 = vector.extract_strided_slice %186 {offsets = [13, 0], sizes = [78, 12], strides = [1, 1]} : vector<92x12xf32> to vector<78x12xf32>
    %254 = vector.extract_strided_slice %188 {offsets = [13, 0, 0], sizes = [1, 12, 16], strides = [1, 1, 1]} : vector<15x12x16xf32> to vector<1x12x16xf32>
    %255 = vector.shape_cast %254 : vector<1x12x16xf32> to vector<12x16xf32>
    %cst_93 = arith.constant dense<0.000000e+00> : vector<78x16xf32>
    %256 = tpu.matmul %253, %255, %cst_93 {dimension_numbers = #tpu.dot_dimension_numbers<[1], [0], [0], [1], [0, 0, 1, 1], [], []>} : vector<78x12xf32>, vector<12x16xf32>, vector<78x16xf32> -> vector<78x16xf32>
    %257 = arith.addf %252, %256 : vector<78x16xf32>
    %258 = vector.extract_strided_slice %186 {offsets = [14, 0], sizes = [78, 12], strides = [1, 1]} : vector<92x12xf32> to vector<78x12xf32>
    %259 = vector.extract_strided_slice %188 {offsets = [14, 0, 0], sizes = [1, 12, 16], strides = [1, 1, 1]} : vector<15x12x16xf32> to vector<1x12x16xf32>
    %260 = vector.shape_cast %259 : vector<1x12x16xf32> to vector<12x16xf32>
    %cst_94 = arith.constant dense<0.000000e+00> : vector<78x16xf32>
    %261 = tpu.matmul %258, %260, %cst_94 {dimension_numbers = #tpu.dot_dimension_numbers<[1], [0], [0], [1], [0, 0, 1, 1], [], []>} : vector<78x12xf32>, vector<12x16xf32>, vector<78x16xf32> -> vector<78x16xf32>
    %262 = arith.addf %257, %261 : vector<78x16xf32>
    %c0_95 = arith.constant 0 : index
    %c0_96 = arith.constant 0 : index
    %263 = vector.load %arg16[%c0_95, %c0_96] : memref<1x16xf32, #tpu.memory_space<vmem>>, vector<1x16xf32>
    %264 = vector.broadcast %263 : vector<1x16xf32> to vector<78x16xf32>
    %265 = arith.addf %262, %264 : vector<78x16xf32>
    %cst_97 = arith.constant 0.000000e+00 : f32
    %266 = vector.broadcast %cst_97 : f32 to vector<78x16xf32>
    %267 = arith.cmpf ogt, %265, %266 : vector<78x16xf32>
    %cst_98 = arith.constant 2.000000e-01 : f32
    %268 = vector.broadcast %cst_98 : f32 to vector<78x16xf32>
    %269 = arith.mulf %268, %265 : vector<78x16xf32>
    %270 = arith.select %267, %265, %269 : vector<78x16xi1>, vector<78x16xf32>
    %c0_99 = arith.constant 0 : index
    %c0_100 = arith.constant 0 : index
    %c0_101 = arith.constant 0 : index
    %271 = vector.load %arg17[%c0_99, %c0_100, %c0_101] : memref<9x16x32xf32, #tpu.memory_space<vmem>>, vector<9x16x32xf32>
    %272 = vector.extract_strided_slice %270 {offsets = [0, 0], sizes = [62, 16], strides = [1, 1]} : vector<78x16xf32> to vector<62x16xf32>
    %273 = vector.extract_strided_slice %271 {offsets = [0, 0, 0], sizes = [1, 16, 32], strides = [1, 1, 1]} : vector<9x16x32xf32> to vector<1x16x32xf32>
    %274 = vector.shape_cast %273 : vector<1x16x32xf32> to vector<16x32xf32>
    %cst_102 = arith.constant dense<0.000000e+00> : vector<62x32xf32>
    %275 = tpu.matmul %272, %274, %cst_102 {dimension_numbers = #tpu.dot_dimension_numbers<[1], [0], [0], [1], [0, 0, 1, 1], [], []>} : vector<62x16xf32>, vector<16x32xf32>, vector<62x32xf32> -> vector<62x32xf32>
    %276 = vector.extract_strided_slice %270 {offsets = [2, 0], sizes = [62, 16], strides = [1, 1]} : vector<78x16xf32> to vector<62x16xf32>
    %277 = vector.extract_strided_slice %271 {offsets = [1, 0, 0], sizes = [1, 16, 32], strides = [1, 1, 1]} : vector<9x16x32xf32> to vector<1x16x32xf32>
    %278 = vector.shape_cast %277 : vector<1x16x32xf32> to vector<16x32xf32>
    %cst_103 = arith.constant dense<0.000000e+00> : vector<62x32xf32>
    %279 = tpu.matmul %276, %278, %cst_103 {dimension_numbers = #tpu.dot_dimension_numbers<[1], [0], [0], [1], [0, 0, 1, 1], [], []>} : vector<62x16xf32>, vector<16x32xf32>, vector<62x32xf32> -> vector<62x32xf32>
    %280 = arith.addf %275, %279 : vector<62x32xf32>
    %281 = vector.extract_strided_slice %270 {offsets = [4, 0], sizes = [62, 16], strides = [1, 1]} : vector<78x16xf32> to vector<62x16xf32>
    %282 = vector.extract_strided_slice %271 {offsets = [2, 0, 0], sizes = [1, 16, 32], strides = [1, 1, 1]} : vector<9x16x32xf32> to vector<1x16x32xf32>
    %283 = vector.shape_cast %282 : vector<1x16x32xf32> to vector<16x32xf32>
    %cst_104 = arith.constant dense<0.000000e+00> : vector<62x32xf32>
    %284 = tpu.matmul %281, %283, %cst_104 {dimension_numbers = #tpu.dot_dimension_numbers<[1], [0], [0], [1], [0, 0, 1, 1], [], []>} : vector<62x16xf32>, vector<16x32xf32>, vector<62x32xf32> -> vector<62x32xf32>
    %285 = arith.addf %280, %284 : vector<62x32xf32>
    %286 = vector.extract_strided_slice %270 {offsets = [6, 0], sizes = [62, 16], strides = [1, 1]} : vector<78x16xf32> to vector<62x16xf32>
    %287 = vector.extract_strided_slice %271 {offsets = [3, 0, 0], sizes = [1, 16, 32], strides = [1, 1, 1]} : vector<9x16x32xf32> to vector<1x16x32xf32>
    %288 = vector.shape_cast %287 : vector<1x16x32xf32> to vector<16x32xf32>
    %cst_105 = arith.constant dense<0.000000e+00> : vector<62x32xf32>
    %289 = tpu.matmul %286, %288, %cst_105 {dimension_numbers = #tpu.dot_dimension_numbers<[1], [0], [0], [1], [0, 0, 1, 1], [], []>} : vector<62x16xf32>, vector<16x32xf32>, vector<62x32xf32> -> vector<62x32xf32>
    %290 = arith.addf %285, %289 : vector<62x32xf32>
    %291 = vector.extract_strided_slice %270 {offsets = [8, 0], sizes = [62, 16], strides = [1, 1]} : vector<78x16xf32> to vector<62x16xf32>
    %292 = vector.extract_strided_slice %271 {offsets = [4, 0, 0], sizes = [1, 16, 32], strides = [1, 1, 1]} : vector<9x16x32xf32> to vector<1x16x32xf32>
    %293 = vector.shape_cast %292 : vector<1x16x32xf32> to vector<16x32xf32>
    %cst_106 = arith.constant dense<0.000000e+00> : vector<62x32xf32>
    %294 = tpu.matmul %291, %293, %cst_106 {dimension_numbers = #tpu.dot_dimension_numbers<[1], [0], [0], [1], [0, 0, 1, 1], [], []>} : vector<62x16xf32>, vector<16x32xf32>, vector<62x32xf32> -> vector<62x32xf32>
    %295 = arith.addf %290, %294 : vector<62x32xf32>
    %296 = vector.extract_strided_slice %270 {offsets = [10, 0], sizes = [62, 16], strides = [1, 1]} : vector<78x16xf32> to vector<62x16xf32>
    %297 = vector.extract_strided_slice %271 {offsets = [5, 0, 0], sizes = [1, 16, 32], strides = [1, 1, 1]} : vector<9x16x32xf32> to vector<1x16x32xf32>
    %298 = vector.shape_cast %297 : vector<1x16x32xf32> to vector<16x32xf32>
    %cst_107 = arith.constant dense<0.000000e+00> : vector<62x32xf32>
    %299 = tpu.matmul %296, %298, %cst_107 {dimension_numbers = #tpu.dot_dimension_numbers<[1], [0], [0], [1], [0, 0, 1, 1], [], []>} : vector<62x16xf32>, vector<16x32xf32>, vector<62x32xf32> -> vector<62x32xf32>
    %300 = arith.addf %295, %299 : vector<62x32xf32>
    %301 = vector.extract_strided_slice %270 {offsets = [12, 0], sizes = [62, 16], strides = [1, 1]} : vector<78x16xf32> to vector<62x16xf32>
    %302 = vector.extract_strided_slice %271 {offsets = [6, 0, 0], sizes = [1, 16, 32], strides = [1, 1, 1]} : vector<9x16x32xf32> to vector<1x16x32xf32>
    %303 = vector.shape_cast %302 : vector<1x16x32xf32> to vector<16x32xf32>
    %cst_108 = arith.constant dense<0.000000e+00> : vector<62x32xf32>
    %304 = tpu.matmul %301, %303, %cst_108 {dimension_numbers = #tpu.dot_dimension_numbers<[1], [0], [0], [1], [0, 0, 1, 1], [], []>} : vector<62x16xf32>, vector<16x32xf32>, vector<62x32xf32> -> vector<62x32xf32>
    %305 = arith.addf %300, %304 : vector<62x32xf32>
    %306 = vector.extract_strided_slice %270 {offsets = [14, 0], sizes = [62, 16], strides = [1, 1]} : vector<78x16xf32> to vector<62x16xf32>
    %307 = vector.extract_strided_slice %271 {offsets = [7, 0, 0], sizes = [1, 16, 32], strides = [1, 1, 1]} : vector<9x16x32xf32> to vector<1x16x32xf32>
    %308 = vector.shape_cast %307 : vector<1x16x32xf32> to vector<16x32xf32>
    %cst_109 = arith.constant dense<0.000000e+00> : vector<62x32xf32>
    %309 = tpu.matmul %306, %308, %cst_109 {dimension_numbers = #tpu.dot_dimension_numbers<[1], [0], [0], [1], [0, 0, 1, 1], [], []>} : vector<62x16xf32>, vector<16x32xf32>, vector<62x32xf32> -> vector<62x32xf32>
    %310 = arith.addf %305, %309 : vector<62x32xf32>
    %311 = vector.extract_strided_slice %270 {offsets = [16, 0], sizes = [62, 16], strides = [1, 1]} : vector<78x16xf32> to vector<62x16xf32>
    %312 = vector.extract_strided_slice %271 {offsets = [8, 0, 0], sizes = [1, 16, 32], strides = [1, 1, 1]} : vector<9x16x32xf32> to vector<1x16x32xf32>
    %313 = vector.shape_cast %312 : vector<1x16x32xf32> to vector<16x32xf32>
    %cst_110 = arith.constant dense<0.000000e+00> : vector<62x32xf32>
    %314 = tpu.matmul %311, %313, %cst_110 {dimension_numbers = #tpu.dot_dimension_numbers<[1], [0], [0], [1], [0, 0, 1, 1], [], []>} : vector<62x16xf32>, vector<16x32xf32>, vector<62x32xf32> -> vector<62x32xf32>
    %315 = arith.addf %310, %314 : vector<62x32xf32>
    %316 = vector.extract_strided_slice %187 {offsets = [0, 0], sizes = [62, 1], strides = [1, 1]} : vector<92x1xf32> to vector<62x1xf32>
    %cst_111 = arith.constant 1.600000e+01 : f32
    %317 = vector.broadcast %cst_111 : f32 to vector<62x1xf32>
    %318 = arith.cmpf olt, %316, %317 : vector<62x1xf32>
    %cst_112 = arith.constant 0.000000e+00 : f32
    %319 = vector.shape_cast %318 : vector<62x1xi1> to vector<62x1xi1>
    %320 = vector.broadcast %319 : vector<62x1xi1> to vector<62x32xi1>
    %321 = vector.broadcast %cst_112 : f32 to vector<62x32xf32>
    %322 = arith.select %320, %315, %321 : vector<62x32xi1>, vector<62x32xf32>
    %cst_113 = arith.constant dense<0.000000e+00> : vector<32xf32>
    %323 = vector.multi_reduction <add>, %322, %cst_113 [0] : vector<62x32xf32> to vector<32xf32>
    %324 = vector.shape_cast %323 : vector<32xf32> to vector<1x32xf32>
    %cst_114 = arith.constant 3.125000e-02 : f32
    %325 = vector.broadcast %cst_114 : f32 to vector<1x32xf32>
    %326 = arith.mulf %324, %325 : vector<1x32xf32>
    %327 = arith.mulf %322, %322 : vector<62x32xf32>
    %cst_115 = arith.constant dense<0.000000e+00> : vector<32xf32>
    %328 = vector.multi_reduction <add>, %327, %cst_115 [0] : vector<62x32xf32> to vector<32xf32>
    %329 = vector.shape_cast %328 : vector<32xf32> to vector<1x32xf32>
    %cst_116 = arith.constant 3.125000e-02 : f32
    %330 = vector.broadcast %cst_116 : f32 to vector<1x32xf32>
    %331 = arith.mulf %329, %330 : vector<1x32xf32>
    %332 = arith.mulf %326, %326 : vector<1x32xf32>
    %333 = arith.subf %331, %332 : vector<1x32xf32>
    %cst_117 = arith.constant 0.000000e+00 : f32
    %334 = vector.broadcast %cst_117 : f32 to vector<1x32xf32>
    %335 = arith.maximumf %333, %334 : vector<1x32xf32>
    %cst_118 = arith.constant 9.99999974E-6 : f32
    %336 = vector.broadcast %cst_118 : f32 to vector<1x32xf32>
    %337 = arith.addf %335, %336 : vector<1x32xf32>
    %338 = math.rsqrt %337 : vector<1x32xf32>
    %c0_119 = arith.constant 0 : index
    %c0_120 = arith.constant 0 : index
    %339 = vector.load %arg18[%c0_119, %c0_120] : memref<1x32xf32, #tpu.memory_space<vmem>>, vector<1x32xf32>
    %340 = arith.mulf %338, %339 : vector<1x32xf32>
    %c0_121 = arith.constant 0 : index
    %c0_122 = arith.constant 0 : index
    %341 = vector.load %arg19[%c0_121, %c0_122] : memref<1x32xf32, #tpu.memory_space<vmem>>, vector<1x32xf32>
    %342 = arith.mulf %326, %340 : vector<1x32xf32>
    %343 = arith.subf %341, %342 : vector<1x32xf32>
    %344 = vector.broadcast %340 : vector<1x32xf32> to vector<62x32xf32>
    %345 = arith.mulf %315, %344 : vector<62x32xf32>
    %346 = vector.broadcast %343 : vector<1x32xf32> to vector<62x32xf32>
    %347 = arith.addf %345, %346 : vector<62x32xf32>
    %cst_123 = arith.constant 0.000000e+00 : f32
    %348 = vector.broadcast %cst_123 : f32 to vector<62x32xf32>
    %349 = arith.cmpf ogt, %347, %348 : vector<62x32xf32>
    %cst_124 = arith.constant 2.000000e-01 : f32
    %350 = vector.broadcast %cst_124 : f32 to vector<62x32xf32>
    %351 = arith.mulf %350, %347 : vector<62x32xf32>
    %352 = arith.select %349, %347, %351 : vector<62x32xi1>, vector<62x32xf32>
    %c0_125 = arith.constant 0 : index
    %c0_126 = arith.constant 0 : index
    %c0_127 = arith.constant 0 : index
    %353 = vector.load %arg20[%c0_125, %c0_126, %c0_127] : memref<5x32x64xf32, #tpu.memory_space<vmem>>, vector<5x32x64xf32>
    %354 = vector.extract_strided_slice %352 {offsets = [0, 0], sizes = [54, 32], strides = [1, 1]} : vector<62x32xf32> to vector<54x32xf32>
    %355 = vector.extract_strided_slice %353 {offsets = [0, 0, 0], sizes = [1, 32, 64], strides = [1, 1, 1]} : vector<5x32x64xf32> to vector<1x32x64xf32>
    %356 = vector.shape_cast %355 : vector<1x32x64xf32> to vector<32x64xf32>
    %cst_128 = arith.constant dense<0.000000e+00> : vector<54x64xf32>
    %357 = tpu.matmul %354, %356, %cst_128 {dimension_numbers = #tpu.dot_dimension_numbers<[1], [0], [0], [1], [0, 0, 1, 1], [], []>} : vector<54x32xf32>, vector<32x64xf32>, vector<54x64xf32> -> vector<54x64xf32>
    %358 = vector.extract_strided_slice %352 {offsets = [2, 0], sizes = [54, 32], strides = [1, 1]} : vector<62x32xf32> to vector<54x32xf32>
    %359 = vector.extract_strided_slice %353 {offsets = [1, 0, 0], sizes = [1, 32, 64], strides = [1, 1, 1]} : vector<5x32x64xf32> to vector<1x32x64xf32>
    %360 = vector.shape_cast %359 : vector<1x32x64xf32> to vector<32x64xf32>
    %cst_129 = arith.constant dense<0.000000e+00> : vector<54x64xf32>
    %361 = tpu.matmul %358, %360, %cst_129 {dimension_numbers = #tpu.dot_dimension_numbers<[1], [0], [0], [1], [0, 0, 1, 1], [], []>} : vector<54x32xf32>, vector<32x64xf32>, vector<54x64xf32> -> vector<54x64xf32>
    %362 = arith.addf %357, %361 : vector<54x64xf32>
    %363 = vector.extract_strided_slice %352 {offsets = [4, 0], sizes = [54, 32], strides = [1, 1]} : vector<62x32xf32> to vector<54x32xf32>
    %364 = vector.extract_strided_slice %353 {offsets = [2, 0, 0], sizes = [1, 32, 64], strides = [1, 1, 1]} : vector<5x32x64xf32> to vector<1x32x64xf32>
    %365 = vector.shape_cast %364 : vector<1x32x64xf32> to vector<32x64xf32>
    %cst_130 = arith.constant dense<0.000000e+00> : vector<54x64xf32>
    %366 = tpu.matmul %363, %365, %cst_130 {dimension_numbers = #tpu.dot_dimension_numbers<[1], [0], [0], [1], [0, 0, 1, 1], [], []>} : vector<54x32xf32>, vector<32x64xf32>, vector<54x64xf32> -> vector<54x64xf32>
    %367 = arith.addf %362, %366 : vector<54x64xf32>
    %368 = vector.extract_strided_slice %352 {offsets = [6, 0], sizes = [54, 32], strides = [1, 1]} : vector<62x32xf32> to vector<54x32xf32>
    %369 = vector.extract_strided_slice %353 {offsets = [3, 0, 0], sizes = [1, 32, 64], strides = [1, 1, 1]} : vector<5x32x64xf32> to vector<1x32x64xf32>
    %370 = vector.shape_cast %369 : vector<1x32x64xf32> to vector<32x64xf32>
    %cst_131 = arith.constant dense<0.000000e+00> : vector<54x64xf32>
    %371 = tpu.matmul %368, %370, %cst_131 {dimension_numbers = #tpu.dot_dimension_numbers<[1], [0], [0], [1], [0, 0, 1, 1], [], []>} : vector<54x32xf32>, vector<32x64xf32>, vector<54x64xf32> -> vector<54x64xf32>
    %372 = arith.addf %367, %371 : vector<54x64xf32>
    %373 = vector.extract_strided_slice %352 {offsets = [8, 0], sizes = [54, 32], strides = [1, 1]} : vector<62x32xf32> to vector<54x32xf32>
    %374 = vector.extract_strided_slice %353 {offsets = [4, 0, 0], sizes = [1, 32, 64], strides = [1, 1, 1]} : vector<5x32x64xf32> to vector<1x32x64xf32>
    %375 = vector.shape_cast %374 : vector<1x32x64xf32> to vector<32x64xf32>
    %cst_132 = arith.constant dense<0.000000e+00> : vector<54x64xf32>
    %376 = tpu.matmul %373, %375, %cst_132 {dimension_numbers = #tpu.dot_dimension_numbers<[1], [0], [0], [1], [0, 0, 1, 1], [], []>} : vector<54x32xf32>, vector<32x64xf32>, vector<54x64xf32> -> vector<54x64xf32>
    %377 = arith.addf %372, %376 : vector<54x64xf32>
    %378 = vector.extract_strided_slice %187 {offsets = [0, 0], sizes = [54, 1], strides = [1, 1]} : vector<92x1xf32> to vector<54x1xf32>
    %cst_133 = arith.constant 8.000000e+00 : f32
    %379 = vector.broadcast %cst_133 : f32 to vector<54x1xf32>
    %380 = arith.cmpf olt, %378, %379 : vector<54x1xf32>
    %cst_134 = arith.constant 0.000000e+00 : f32
    %381 = vector.shape_cast %380 : vector<54x1xi1> to vector<54x1xi1>
    %382 = vector.broadcast %381 : vector<54x1xi1> to vector<54x64xi1>
    %383 = vector.broadcast %cst_134 : f32 to vector<54x64xf32>
    %384 = arith.select %382, %377, %383 : vector<54x64xi1>, vector<54x64xf32>
    %cst_135 = arith.constant dense<0.000000e+00> : vector<64xf32>
    %385 = vector.multi_reduction <add>, %384, %cst_135 [0] : vector<54x64xf32> to vector<64xf32>
    %386 = vector.shape_cast %385 : vector<64xf32> to vector<1x64xf32>
    %cst_136 = arith.constant 6.250000e-02 : f32
    %387 = vector.broadcast %cst_136 : f32 to vector<1x64xf32>
    %388 = arith.mulf %386, %387 : vector<1x64xf32>
    %389 = arith.mulf %384, %384 : vector<54x64xf32>
    %cst_137 = arith.constant dense<0.000000e+00> : vector<64xf32>
    %390 = vector.multi_reduction <add>, %389, %cst_137 [0] : vector<54x64xf32> to vector<64xf32>
    %391 = vector.shape_cast %390 : vector<64xf32> to vector<1x64xf32>
    %cst_138 = arith.constant 6.250000e-02 : f32
    %392 = vector.broadcast %cst_138 : f32 to vector<1x64xf32>
    %393 = arith.mulf %391, %392 : vector<1x64xf32>
    %394 = arith.mulf %388, %388 : vector<1x64xf32>
    %395 = arith.subf %393, %394 : vector<1x64xf32>
    %cst_139 = arith.constant 0.000000e+00 : f32
    %396 = vector.broadcast %cst_139 : f32 to vector<1x64xf32>
    %397 = arith.maximumf %395, %396 : vector<1x64xf32>
    %cst_140 = arith.constant 9.99999974E-6 : f32
    %398 = vector.broadcast %cst_140 : f32 to vector<1x64xf32>
    %399 = arith.addf %397, %398 : vector<1x64xf32>
    %400 = math.rsqrt %399 : vector<1x64xf32>
    %c0_141 = arith.constant 0 : index
    %c0_142 = arith.constant 0 : index
    %401 = vector.load %arg21[%c0_141, %c0_142] : memref<1x64xf32, #tpu.memory_space<vmem>>, vector<1x64xf32>
    %402 = arith.mulf %400, %401 : vector<1x64xf32>
    %c0_143 = arith.constant 0 : index
    %c0_144 = arith.constant 0 : index
    %403 = vector.load %arg22[%c0_143, %c0_144] : memref<1x64xf32, #tpu.memory_space<vmem>>, vector<1x64xf32>
    %404 = arith.mulf %388, %402 : vector<1x64xf32>
    %405 = arith.subf %403, %404 : vector<1x64xf32>
    %406 = vector.broadcast %402 : vector<1x64xf32> to vector<54x64xf32>
    %407 = arith.mulf %377, %406 : vector<54x64xf32>
    %408 = vector.broadcast %405 : vector<1x64xf32> to vector<54x64xf32>
    %409 = arith.addf %407, %408 : vector<54x64xf32>
    %cst_145 = arith.constant 0.000000e+00 : f32
    %410 = vector.broadcast %cst_145 : f32 to vector<54x64xf32>
    %411 = arith.cmpf ogt, %409, %410 : vector<54x64xf32>
    %cst_146 = arith.constant 2.000000e-01 : f32
    %412 = vector.broadcast %cst_146 : f32 to vector<54x64xf32>
    %413 = arith.mulf %412, %409 : vector<54x64xf32>
    %414 = arith.select %411, %409, %413 : vector<54x64xi1>, vector<54x64xf32>
    %c0_147 = arith.constant 0 : index
    %c0_148 = arith.constant 0 : index
    %c0_149 = arith.constant 0 : index
    %415 = vector.load %arg23[%c0_147, %c0_148, %c0_149] : memref<3x64x128xf32, #tpu.memory_space<vmem>>, vector<3x64x128xf32>
    %416 = vector.extract_strided_slice %414 {offsets = [0, 0], sizes = [50, 64], strides = [1, 1]} : vector<54x64xf32> to vector<50x64xf32>
    %417 = vector.extract_strided_slice %415 {offsets = [0, 0, 0], sizes = [1, 64, 128], strides = [1, 1, 1]} : vector<3x64x128xf32> to vector<1x64x128xf32>
    %418 = vector.shape_cast %417 : vector<1x64x128xf32> to vector<64x128xf32>
    %cst_150 = arith.constant dense<0.000000e+00> : vector<50x128xf32>
    %419 = tpu.matmul %416, %418, %cst_150 {dimension_numbers = #tpu.dot_dimension_numbers<[1], [0], [0], [1], [0, 0, 1, 1], [], []>} : vector<50x64xf32>, vector<64x128xf32>, vector<50x128xf32> -> vector<50x128xf32>
    %420 = vector.extract_strided_slice %414 {offsets = [2, 0], sizes = [50, 64], strides = [1, 1]} : vector<54x64xf32> to vector<50x64xf32>
    %421 = vector.extract_strided_slice %415 {offsets = [1, 0, 0], sizes = [1, 64, 128], strides = [1, 1, 1]} : vector<3x64x128xf32> to vector<1x64x128xf32>
    %422 = vector.shape_cast %421 : vector<1x64x128xf32> to vector<64x128xf32>
    %cst_151 = arith.constant dense<0.000000e+00> : vector<50x128xf32>
    %423 = tpu.matmul %420, %422, %cst_151 {dimension_numbers = #tpu.dot_dimension_numbers<[1], [0], [0], [1], [0, 0, 1, 1], [], []>} : vector<50x64xf32>, vector<64x128xf32>, vector<50x128xf32> -> vector<50x128xf32>
    %424 = arith.addf %419, %423 : vector<50x128xf32>
    %425 = vector.extract_strided_slice %414 {offsets = [4, 0], sizes = [50, 64], strides = [1, 1]} : vector<54x64xf32> to vector<50x64xf32>
    %426 = vector.extract_strided_slice %415 {offsets = [2, 0, 0], sizes = [1, 64, 128], strides = [1, 1, 1]} : vector<3x64x128xf32> to vector<1x64x128xf32>
    %427 = vector.shape_cast %426 : vector<1x64x128xf32> to vector<64x128xf32>
    %cst_152 = arith.constant dense<0.000000e+00> : vector<50x128xf32>
    %428 = tpu.matmul %425, %427, %cst_152 {dimension_numbers = #tpu.dot_dimension_numbers<[1], [0], [0], [1], [0, 0, 1, 1], [], []>} : vector<50x64xf32>, vector<64x128xf32>, vector<50x128xf32> -> vector<50x128xf32>
    %429 = arith.addf %424, %428 : vector<50x128xf32>
    %430 = vector.extract_strided_slice %187 {offsets = [0, 0], sizes = [50, 1], strides = [1, 1]} : vector<92x1xf32> to vector<50x1xf32>
    %cst_153 = arith.constant 4.000000e+00 : f32
    %431 = vector.broadcast %cst_153 : f32 to vector<50x1xf32>
    %432 = arith.cmpf olt, %430, %431 : vector<50x1xf32>
    %cst_154 = arith.constant 0.000000e+00 : f32
    %433 = vector.shape_cast %432 : vector<50x1xi1> to vector<50x1xi1>
    %434 = vector.broadcast %433 : vector<50x1xi1> to vector<50x128xi1>
    %435 = vector.broadcast %cst_154 : f32 to vector<50x128xf32>
    %436 = arith.select %434, %429, %435 : vector<50x128xi1>, vector<50x128xf32>
    %cst_155 = arith.constant dense<0.000000e+00> : vector<128xf32>
    %437 = vector.multi_reduction <add>, %436, %cst_155 [0] : vector<50x128xf32> to vector<128xf32>
    %438 = vector.shape_cast %437 : vector<128xf32> to vector<1x128xf32>
    %cst_156 = arith.constant 1.250000e-01 : f32
    %439 = vector.broadcast %cst_156 : f32 to vector<1x128xf32>
    %440 = arith.mulf %438, %439 : vector<1x128xf32>
    %441 = arith.mulf %436, %436 : vector<50x128xf32>
    %cst_157 = arith.constant dense<0.000000e+00> : vector<128xf32>
    %442 = vector.multi_reduction <add>, %441, %cst_157 [0] : vector<50x128xf32> to vector<128xf32>
    %443 = vector.shape_cast %442 : vector<128xf32> to vector<1x128xf32>
    %cst_158 = arith.constant 1.250000e-01 : f32
    %444 = vector.broadcast %cst_158 : f32 to vector<1x128xf32>
    %445 = arith.mulf %443, %444 : vector<1x128xf32>
    %446 = arith.mulf %440, %440 : vector<1x128xf32>
    %447 = arith.subf %445, %446 : vector<1x128xf32>
    %cst_159 = arith.constant 0.000000e+00 : f32
    %448 = vector.broadcast %cst_159 : f32 to vector<1x128xf32>
    %449 = arith.maximumf %447, %448 : vector<1x128xf32>
    %cst_160 = arith.constant 9.99999974E-6 : f32
    %450 = vector.broadcast %cst_160 : f32 to vector<1x128xf32>
    %451 = arith.addf %449, %450 : vector<1x128xf32>
    %452 = math.rsqrt %451 : vector<1x128xf32>
    %c0_161 = arith.constant 0 : index
    %c0_162 = arith.constant 0 : index
    %453 = vector.load %arg24[%c0_161, %c0_162] : memref<1x128xf32, #tpu.memory_space<vmem>>, vector<1x128xf32>
    %454 = arith.mulf %452, %453 : vector<1x128xf32>
    %c0_163 = arith.constant 0 : index
    %c0_164 = arith.constant 0 : index
    %455 = vector.load %arg25[%c0_163, %c0_164] : memref<1x128xf32, #tpu.memory_space<vmem>>, vector<1x128xf32>
    %456 = arith.mulf %440, %454 : vector<1x128xf32>
    %457 = arith.subf %455, %456 : vector<1x128xf32>
    %458 = vector.broadcast %454 : vector<1x128xf32> to vector<50x128xf32>
    %459 = arith.mulf %429, %458 : vector<50x128xf32>
    %460 = vector.broadcast %457 : vector<1x128xf32> to vector<50x128xf32>
    %461 = arith.addf %459, %460 : vector<50x128xf32>
    %cst_165 = arith.constant 0.000000e+00 : f32
    %462 = vector.broadcast %cst_165 : f32 to vector<50x128xf32>
    %463 = arith.cmpf ogt, %461, %462 : vector<50x128xf32>
    %cst_166 = arith.constant 2.000000e-01 : f32
    %464 = vector.broadcast %cst_166 : f32 to vector<50x128xf32>
    %465 = arith.mulf %464, %461 : vector<50x128xf32>
    %466 = arith.select %463, %461, %465 : vector<50x128xi1>, vector<50x128xf32>
    %c0_167 = arith.constant 0 : index
    %c0_168 = arith.constant 0 : index
    %c0_169 = arith.constant 0 : index
    %467 = vector.load %arg26[%c0_167, %c0_168, %c0_169] : memref<4x128x128xf32, #tpu.memory_space<vmem>>, vector<4x128x128xf32>
    %468 = vector.extract_strided_slice %466 {offsets = [0, 0], sizes = [47, 128], strides = [1, 1]} : vector<50x128xf32> to vector<47x128xf32>
    %469 = vector.extract_strided_slice %467 {offsets = [0, 0, 0], sizes = [1, 128, 128], strides = [1, 1, 1]} : vector<4x128x128xf32> to vector<1x128x128xf32>
    %470 = vector.shape_cast %469 : vector<1x128x128xf32> to vector<128x128xf32>
    %cst_170 = arith.constant dense<0.000000e+00> : vector<47x128xf32>
    %471 = tpu.matmul %468, %470, %cst_170 {dimension_numbers = #tpu.dot_dimension_numbers<[1], [0], [0], [1], [0, 0, 1, 1], [], []>} : vector<47x128xf32>, vector<128x128xf32>, vector<47x128xf32> -> vector<47x128xf32>
    %472 = vector.extract_strided_slice %466 {offsets = [1, 0], sizes = [47, 128], strides = [1, 1]} : vector<50x128xf32> to vector<47x128xf32>
    %473 = vector.extract_strided_slice %467 {offsets = [1, 0, 0], sizes = [1, 128, 128], strides = [1, 1, 1]} : vector<4x128x128xf32> to vector<1x128x128xf32>
    %474 = vector.shape_cast %473 : vector<1x128x128xf32> to vector<128x128xf32>
    %cst_171 = arith.constant dense<0.000000e+00> : vector<47x128xf32>
    %475 = tpu.matmul %472, %474, %cst_171 {dimension_numbers = #tpu.dot_dimension_numbers<[1], [0], [0], [1], [0, 0, 1, 1], [], []>} : vector<47x128xf32>, vector<128x128xf32>, vector<47x128xf32> -> vector<47x128xf32>
    %476 = arith.addf %471, %475 : vector<47x128xf32>
    %477 = vector.extract_strided_slice %466 {offsets = [2, 0], sizes = [47, 128], strides = [1, 1]} : vector<50x128xf32> to vector<47x128xf32>
    %478 = vector.extract_strided_slice %467 {offsets = [2, 0, 0], sizes = [1, 128, 128], strides = [1, 1, 1]} : vector<4x128x128xf32> to vector<1x128x128xf32>
    %479 = vector.shape_cast %478 : vector<1x128x128xf32> to vector<128x128xf32>
    %cst_172 = arith.constant dense<0.000000e+00> : vector<47x128xf32>
    %480 = tpu.matmul %477, %479, %cst_172 {dimension_numbers = #tpu.dot_dimension_numbers<[1], [0], [0], [1], [0, 0, 1, 1], [], []>} : vector<47x128xf32>, vector<128x128xf32>, vector<47x128xf32> -> vector<47x128xf32>
    %481 = arith.addf %476, %480 : vector<47x128xf32>
    %482 = vector.extract_strided_slice %466 {offsets = [3, 0], sizes = [47, 128], strides = [1, 1]} : vector<50x128xf32> to vector<47x128xf32>
    %483 = vector.extract_strided_slice %467 {offsets = [3, 0, 0], sizes = [1, 128, 128], strides = [1, 1, 1]} : vector<4x128x128xf32> to vector<1x128x128xf32>
    %484 = vector.shape_cast %483 : vector<1x128x128xf32> to vector<128x128xf32>
    %cst_173 = arith.constant dense<0.000000e+00> : vector<47x128xf32>
    %485 = tpu.matmul %482, %484, %cst_173 {dimension_numbers = #tpu.dot_dimension_numbers<[1], [0], [0], [1], [0, 0, 1, 1], [], []>} : vector<47x128xf32>, vector<128x128xf32>, vector<47x128xf32> -> vector<47x128xf32>
    %486 = arith.addf %481, %485 : vector<47x128xf32>
    %487 = vector.extract_strided_slice %187 {offsets = [0, 0], sizes = [47, 1], strides = [1, 1]} : vector<92x1xf32> to vector<47x1xf32>
    %cst_174 = arith.constant 1.000000e+00 : f32
    %488 = vector.broadcast %cst_174 : f32 to vector<47x1xf32>
    %489 = arith.cmpf olt, %487, %488 : vector<47x1xf32>
    %cst_175 = arith.constant 0.000000e+00 : f32
    %490 = vector.shape_cast %489 : vector<47x1xi1> to vector<47x1xi1>
    %491 = vector.broadcast %490 : vector<47x1xi1> to vector<47x128xi1>
    %492 = vector.broadcast %cst_175 : f32 to vector<47x128xf32>
    %493 = arith.select %491, %486, %492 : vector<47x128xi1>, vector<47x128xf32>
    %cst_176 = arith.constant dense<0.000000e+00> : vector<128xf32>
    %494 = vector.multi_reduction <add>, %493, %cst_176 [0] : vector<47x128xf32> to vector<128xf32>
    %495 = vector.shape_cast %494 : vector<128xf32> to vector<1x128xf32>
    %cst_177 = arith.constant 5.000000e-01 : f32
    %496 = vector.broadcast %cst_177 : f32 to vector<1x128xf32>
    %497 = arith.mulf %495, %496 : vector<1x128xf32>
    %498 = arith.mulf %493, %493 : vector<47x128xf32>
    %cst_178 = arith.constant dense<0.000000e+00> : vector<128xf32>
    %499 = vector.multi_reduction <add>, %498, %cst_178 [0] : vector<47x128xf32> to vector<128xf32>
    %500 = vector.shape_cast %499 : vector<128xf32> to vector<1x128xf32>
    %cst_179 = arith.constant 5.000000e-01 : f32
    %501 = vector.broadcast %cst_179 : f32 to vector<1x128xf32>
    %502 = arith.mulf %500, %501 : vector<1x128xf32>
    %503 = arith.mulf %497, %497 : vector<1x128xf32>
    %504 = arith.subf %502, %503 : vector<1x128xf32>
    %cst_180 = arith.constant 0.000000e+00 : f32
    %505 = vector.broadcast %cst_180 : f32 to vector<1x128xf32>
    %506 = arith.maximumf %504, %505 : vector<1x128xf32>
    %cst_181 = arith.constant 9.99999974E-6 : f32
    %507 = vector.broadcast %cst_181 : f32 to vector<1x128xf32>
    %508 = arith.addf %506, %507 : vector<1x128xf32>
    %509 = math.rsqrt %508 : vector<1x128xf32>
    %c0_182 = arith.constant 0 : index
    %c0_183 = arith.constant 0 : index
    %510 = vector.load %arg27[%c0_182, %c0_183] : memref<1x128xf32, #tpu.memory_space<vmem>>, vector<1x128xf32>
    %511 = arith.mulf %509, %510 : vector<1x128xf32>
    %c0_184 = arith.constant 0 : index
    %c0_185 = arith.constant 0 : index
    %512 = vector.load %arg28[%c0_184, %c0_185] : memref<1x128xf32, #tpu.memory_space<vmem>>, vector<1x128xf32>
    %513 = arith.mulf %497, %511 : vector<1x128xf32>
    %514 = arith.subf %512, %513 : vector<1x128xf32>
    %515 = vector.broadcast %511 : vector<1x128xf32> to vector<47x128xf32>
    %516 = arith.mulf %486, %515 : vector<47x128xf32>
    %517 = vector.broadcast %514 : vector<1x128xf32> to vector<47x128xf32>
    %518 = arith.addf %516, %517 : vector<47x128xf32>
    %cst_186 = arith.constant 0.000000e+00 : f32
    %519 = vector.broadcast %cst_186 : f32 to vector<47x128xf32>
    %520 = arith.cmpf ogt, %518, %519 : vector<47x128xf32>
    %cst_187 = arith.constant 2.000000e-01 : f32
    %521 = vector.broadcast %cst_187 : f32 to vector<47x128xf32>
    %522 = arith.mulf %521, %518 : vector<47x128xf32>
    %523 = arith.select %520, %518, %522 : vector<47x128xi1>, vector<47x128xf32>
    %c0_188 = arith.constant 0 : index
    %c0_189 = arith.constant 0 : index
    %524 = vector.load %arg29[%c0_188, %c0_189] : memref<2x11xf32, #tpu.memory_space<vmem>>, vector<2x11xf32>
    %cst_190 = arith.constant dense<0.000000e+00> : vector<2x128xf32>
    %525 = tpu.matmul %524, %185, %cst_190 {dimension_numbers = #tpu.dot_dimension_numbers<[1], [0], [0], [1], [0, 0, 1, 1], [], []>} : vector<2x11xf32>, vector<11x128xf32>, vector<2x128xf32> -> vector<2x128xf32>
    %c0_191 = arith.constant 0 : index
    %c0_192 = arith.constant 0 : index
    %526 = vector.load %arg30[%c0_191, %c0_192] : memref<2x47xf32, #tpu.memory_space<vmem>>, vector<2x47xf32>
    %cst_193 = arith.constant dense<0.000000e+00> : vector<2x128xf32>
    %527 = tpu.matmul %526, %523, %cst_193 {dimension_numbers = #tpu.dot_dimension_numbers<[1], [0], [0], [1], [0, 0, 1, 1], [], []>} : vector<2x47xf32>, vector<47x128xf32>, vector<2x128xf32> -> vector<2x128xf32>
    %c0_194 = arith.constant 0 : index
    %c0_195 = arith.constant 0 : index
    %528 = vector.load %arg31[%c0_194, %c0_195] : memref<128x128xf32, #tpu.memory_space<vmem>>, vector<128x128xf32>
    %cst_196 = arith.constant dense<0.000000e+00> : vector<2x128xf32>
    %529 = tpu.matmul %525, %528, %cst_196 {dimension_numbers = #tpu.dot_dimension_numbers<[1], [0], [0], [1], [0, 0, 1, 1], [], []>} : vector<2x128xf32>, vector<128x128xf32>, vector<2x128xf32> -> vector<2x128xf32>
    %c0_197 = arith.constant 0 : index
    %c0_198 = arith.constant 0 : index
    %530 = vector.load %arg32[%c0_197, %c0_198] : memref<128x128xf32, #tpu.memory_space<vmem>>, vector<128x128xf32>
    %cst_199 = arith.constant dense<0.000000e+00> : vector<2x128xf32>
    %531 = tpu.matmul %527, %530, %cst_199 {dimension_numbers = #tpu.dot_dimension_numbers<[1], [0], [0], [1], [0, 0, 1, 1], [], []>} : vector<2x128xf32>, vector<128x128xf32>, vector<2x128xf32> -> vector<2x128xf32>
    %532 = arith.addf %529, %531 : vector<2x128xf32>
    %c0_200 = arith.constant 0 : index
    %c0_201 = arith.constant 0 : index
    %533 = vector.load %arg33[%c0_200, %c0_201] : memref<1x128xf32, #tpu.memory_space<vmem>>, vector<1x128xf32>
    %534 = vector.broadcast %533 : vector<1x128xf32> to vector<2x128xf32>
    %535 = arith.addf %532, %534 : vector<2x128xf32>
    %cst_202 = arith.constant 0.000000e+00 : f32
    %536 = vector.broadcast %cst_202 : f32 to vector<2x128xf32>
    %537 = arith.maximumf %535, %536 : vector<2x128xf32>
    %c0_203 = arith.constant 0 : index
    %c0_204 = arith.constant 0 : index
    %538 = vector.load %arg34[%c0_203, %c0_204] : memref<128x128xf32, #tpu.memory_space<vmem>>, vector<128x128xf32>
    %cst_205 = arith.constant dense<0.000000e+00> : vector<2x128xf32>
    %539 = tpu.matmul %537, %538, %cst_205 {dimension_numbers = #tpu.dot_dimension_numbers<[1], [0], [0], [1], [0, 0, 1, 1], [], []>} : vector<2x128xf32>, vector<128x128xf32>, vector<2x128xf32> -> vector<2x128xf32>
    %c0_206 = arith.constant 0 : index
    %c0_207 = arith.constant 0 : index
    %540 = vector.load %arg35[%c0_206, %c0_207] : memref<1x128xf32, #tpu.memory_space<vmem>>, vector<1x128xf32>
    %541 = vector.broadcast %540 : vector<1x128xf32> to vector<2x128xf32>
    %542 = arith.addf %539, %541 : vector<2x128xf32>
    %cst_208 = arith.constant 0.000000e+00 : f32
    %543 = vector.broadcast %cst_208 : f32 to vector<2x128xf32>
    %544 = arith.subf %543, %542 : vector<2x128xf32>
    %545 = math.exp %544 : vector<2x128xf32>
    %cst_209 = arith.constant 1.000000e+00 : f32
    %546 = vector.broadcast %cst_209 : f32 to vector<2x128xf32>
    %547 = arith.addf %546, %545 : vector<2x128xf32>
    %548 = tpu.reciprocal %547 {approx = true} : vector<2x128xf32> -> vector<2x128xf32>
    %c0_210 = arith.constant 0 : index
    %c0_211 = arith.constant 0 : index
    %549 = vector.load %arg36[%c0_210, %c0_211] : memref<2x128xf32, #tpu.memory_space<vmem>>, vector<2x128xf32>
    tpu.vector_store %arg36[%c0_210, %c0_211], %548 {strides = array<i32>} : memref<2x128xf32, #tpu.memory_space<vmem>>, vector<2x128xf32>,
    return
  }
}

</mosaic_0001>

<bundles_post_ra>
// kernel: squeeze.3
= control target key start
LH: loop header
LB: loop body
LE: loop exit
PB: predicated region body
PF: predicated region fallthrough
CT: control target
= control target key end

     0   :  { %vm62_vm0 = vcmask 1047556   ;;  %vm64_vm1 = vcmask 375808   ;;  %vm79_vm2 = vcmask 753008   ;;  %s171_s0 = inlined_call_operand.vmem [shape: f32[2,1,46,12], index: 0, kind: input, shape index: {}]   ;;  %s172_s1 = inlined_call_operand.vmem [shape: f32[92,12], index: 1, kind: output, shape index: {}]  }
   0x1   :  { %v102_v0 = vld [vmem:[%s171_s0 + $0xe] sm:$0x3]  ;;  %v103_v1 = vld [vmem:[%s171_s0 + $0xc] sm:$0x3]  ;;  %v104_v2 = vld [vmem:[%s171_s0 + $0xa] sm:$0x3] }
   0x2   :  { %28 = vst [vmem:[#allocation0 + $0x38] sm:$0x3] %v102_v0  ;;  %33 = vst [vmem:[#allocation0 + $0x30] sm:$0x3] %v103_v1  ;;  %v105_v3 = vld [vmem:[%s171_s0 + $0x8] sm:$0x3] }
   0x3   :  { %38 = vst [vmem:[#allocation0 + $0x28] sm:$0x3] %v104_v2  ;;  %v106_v4 = vld [vmem:[%s171_s0 + $0x6] sm:$0x3]  ;;  %v107_v5 = vld [vmem:[%s171_s0 + $0x4] sm:$0x3] }
   0x4   :  { %43 = vst [vmem:[#allocation0 + $0x20] sm:$0x3] %v105_v3  ;;  %48 = vst [vmem:[#allocation0 + $0x18] sm:$0x3] %v106_v4  ;;  %v108_v6 = vld [vmem:[%s171_s0 + $0x2] sm:$0x3] }
   0x5   :  { %53 = vst [vmem:[#allocation0 + $0x10] sm:$0x3] %v107_v5  ;;  %v58_v7 = vld [vmem:[%s171_s0] sm:$0x3]  ;;  %57 = vst [vmem:[#allocation0 + $0x8] sm:$0x3] %v108_v6 }
   0x6   :  { %59 = vst [vmem:[#allocation0] sm:$0x3] %v58_v7  ;;  %v98_v8 = vld [vmem:[%s171_s0 + $0x16] sm:$0x3]  ;;  %v99_v9 = vld [vmem:[%s171_s0 + $0x14] sm:$0x3] }
   0x7   :  { %v100_v10 = vld [vmem:[%s171_s0 + $0x12] sm:$0x3]  ;;  %8 = vst [vmem:[#allocation0 + $0x58] sm:$0x3] %v98_v8  ;;  %13 = vst [vmem:[#allocation0 + $0x50] sm:$0x3] %v99_v9 }
   0x8   :  { %18 = vst [vmem:[#allocation0 + $0x48] sm:$0x3] %v100_v10  ;;  %v101_v11 = vld [vmem:[%s171_s0 + $0x10] sm:$0x3]  ;;  %s112_s0 = smov 46  }
   0x9   :  { %23 = vst [vmem:[#allocation0 + $0x40] sm:$0x3] %v101_v11 }
   0xb   :  { %v74_v12 = vld [vmem:[#allocation0 + $0x1] ss:$8 sm:$0xf0]   ;;  %v61_v13 = vld [vmem:[#allocation0] ss:$8 sm:$0xf0]  }
   0xd   :  { %v60_v14 = vld [vmem:[#allocation0] ss:$8 sm:$0xf]   ;;  %v72_v15 = vld [vmem:[#allocation0 + $0x1] ss:$8 sm:$0xf]  }
   0xe   :  { %v76_v16 = vsel %vm62_vm0, %v74_v12, %v72_v15  ;;  %v63_v17 = vsel %vm62_vm0, %v61_v13, %v60_v14 }
   0xf   :  { %77 = vrot.lane.b32.xlu0 %v76_v16, %s112_s0  ;;  %65 = vst.msk [vmem:[%s172_s1] sm:$0xff] %vm64_vm1, %v63_v17  }
  0x10   :  { %v67_v18 = vld [vmem:[#allocation0 + $0x40] ss:$8 sm:$0xf]   ;;  %v82_v19 = vld [vmem:[#allocation0 + $0x41] ss:$8 sm:$0xf]  }
  0x11   :  { %109 = vst.msk [vmem:[%s172_s1 + $0x8] sm:$0xf] %vm64_vm1, %v67_v18  }
  0x13   :  { %83 = vrot.lane.b32.xlu0 %v82_v19, %s112_s0 }
  0x81   :  { %v78_v20 = vpop.permute.xlu0 %77  }
  0x82   :  { %80 = vst.msk [vmem:[%s172_s1] sm:$0xff] %vm79_vm2, %v78_v20  }
  0x85   :  { %v84_v21 = vpop.permute.xlu0 %83  }
  0x86   :  { %110 = vst.msk [vmem:[%s172_s1 + $0x8] sm:$0xf] %vm79_vm2, %v84_v21  }

// kernel: _lambda_.1
= control target key start
LH: loop header
LB: loop body
LE: loop exit
PB: predicated region body
PF: predicated region fallthrough
CT: control target
= control target key end

     0   :  { %s11026_s6 = smov 1   ;;  %s11027_s10 = smov 2   ;;  %s13245_s0 = inlined_call_operand.smem [shape: u32[37], index: -1, kind: input, shape index: {}] }
   0x1   :  { %s11088_s5 = sld [smem:[%s13245_s0]]   ;;  %s11028_s14 = smov 3  }
   0x2   :  { %s11093_s9 = sld [smem:[%s13245_s0 + %s11026_s6]]   ;;  %s11029_s18 = smov 4  }
   0x3   :  { %s11098_s13 = sld [smem:[%s13245_s0 + %s11027_s10]]   ;;  %s11030_s22 = smov 5  }
   0x4   :  { %s11103_s17 = sld [smem:[%s13245_s0 + %s11028_s14]]   ;;  %s11031_s26 = smov 6  }
   0x5   :  { %s11108_s21 = sld [smem:[%s13245_s0 + %s11029_s18]]   ;;  %s11032_s30 = smov 7  }
   0x6   :  { %s11113_s25 = sld [smem:[%s13245_s0 + %s11030_s22]]   ;;  %s11033_s4 = smov 8  }
   0x7   :  { %s11118_s29 = sld [smem:[%s13245_s0 + %s11031_s26]]   ;;  %s11034_s10 = smov 9  }
   0x8   :  { %13281 = sst [smem:[#allocation25_spill]] %s11093_s9  ;;  %s11035_s15 = smov 10  }
   0x9   :  { %s11123_s3 = sld [smem:[%s13245_s0 + %s11032_s30]]   ;;  %s11036_s20 = smov 11  }
   0xa   :  { %s11128_s8 = sld [smem:[%s13245_s0 + %s11033_s4]]   ;;  %s11037_s26 = smov 12  }
   0xb   :  { %s11133_s14 = sld [smem:[%s13245_s0 + %s11034_s10]]   ;;  %s11038_s1 = smov 13  }
   0xc   :  { %s11138_s19 = sld [smem:[%s13245_s0 + %s11035_s15]]   ;;  %s11039_s7 = smov 14  }
   0xd   :  { %s11143_s24 = sld [smem:[%s13245_s0 + %s11036_s20]]   ;;  %s11040_s15 = smov 15  }
   0xe   :  { %s11148_s30 = sld [smem:[%s13245_s0 + %s11037_s26]]   ;;  %s11041_s22 = smov 16  }
   0xf   :  { %13282 = sst [smem:[#allocation26_spill]] %s11123_s3  ;;  %s11042_s28 = smov 17  }
  0x10   :  { %13283 = sst [smem:[#allocation27_spill]] %s11128_s8 }
  0x11   :  { %s11153_s6 = sld [smem:[%s13245_s0 + %s11038_s1]]  }
  0x12   :  { %13284 = sst [smem:[#allocation28_spill]] %s11138_s19 }
  0x13   :  { %13285 = sst [smem:[#allocation29_spill]] %s11143_s24 }
  0x14   :  { %s11158_s12 = sld [smem:[%s13245_s0 + %s11039_s7]]   ;;  %s11043_s7 = smov 18  }
  0x15   :  { %s11163_s20 = sld [smem:[%s13245_s0 + %s11040_s15]]   ;;  %s11044_s15 = smov 19  }
  0x16   :  { %s11168_s27 = sld [smem:[%s13245_s0 + %s11041_s22]]   ;;  %s11045_s22 = smov 20  }
  0x17   :  { %13286 = sst [smem:[#allocation30_spill]] %s11153_s6 }
  0x18   :  { %s11173_s4 = sld [smem:[%s13245_s0 + %s11042_s28]]   ;;  %s11046_s28 = smov 21  }
  0x19   :  { %s11183_s6 = sld [smem:[%s13245_s0 + %s11044_s15]]   ;;  %s11048_s15 = smov 23  }
  0x1a   :  { %13287 = sst [smem:[#allocation31_spill]] %s11158_s12 }
  0x1b   :  { %s11178_s12 = sld [smem:[%s13245_s0 + %s11043_s7]]   ;;  %s11047_s7 = smov 22  }
  0x1c   :  { %13288 = sst [smem:[#allocation32_spill]] %s11168_s27 }
  0x1d   :  { %s11188_s27 = sld [smem:[%s13245_s0 + %s11045_s22]]   ;;  %s11049_s22 = smov 24  }
  0x1e   :  { %s11193_s24 = sld [smem:[%s13245_s0 + %s11046_s28]]   ;;  %s11050_s28 = smov 25  }
  0x1f   :  { %13290 = sst [smem:[#allocation34_spill]] %s11183_s6 }
  0x20   :  { %s11203_s6 = sld [smem:[%s13245_s0 + %s11048_s15]]   ;;  %s11052_s15 = smov 27  }
  0x21   :  { %13289 = sst [smem:[#allocation33_spill]] %s11178_s12 }
  0x22   :  { %s11198_s12 = sld [smem:[%s13245_s0 + %s11047_s7]]   ;;  %s11051_s7 = smov 26  }
  0x23   :  { %s11208_s19 = sld [smem:[%s13245_s0 + %s11049_s22]]   ;;  %s11053_s22 = smov 28  }
  0x24   :  { %13291 = sst [smem:[#allocation35_spill]] %s11193_s24 }
  0x25   :  { %s11213_s24 = sld [smem:[%s13245_s0 + %s11050_s28]]   ;;  %s11054_s28 = smov 29  }
  0x26   :  { %s11223_s9 = sld [smem:[%s13245_s0 + %s11052_s15]]   ;;  %s11056_s15 = smov 31  }
  0x28   :  { %13292 = sst [smem:[#allocation36_spill]] %s11198_s12 }
  0x29   :  { %13293 = sst [smem:[#allocation37_spill]] %s11208_s19 }
  0x2a   :  { %s11218_s12 = sld [smem:[%s13245_s0 + %s11051_s7]]   ;;  %s11055_s7 = smov 30  }
  0x2b   :  { %13294 = sst [smem:[#allocation38_spill]] %s11213_s24 }
  0x2c   :  { %13296 = sst [smem:[#allocation40_spill]] %s11223_s9 }
  0x2d   :  { %s11228_s19 = sld [smem:[%s13245_s0 + %s11053_s22]]   ;;  %s11057_s22 = smov 32  }
  0x2e   :  { %s11233_s24 = sld [smem:[%s13245_s0 + %s11054_s28]]   ;;  %s11058_s28 = smov 33  }
  0x2f   :  { %s11243_s9 = sld [smem:[%s13245_s0 + %s11056_s15]]   ;;  %s11060_s15 = smov 35  }
  0x30   :  { %13295 = sst [smem:[#allocation39_spill]] %s11218_s12 }
  0x31   :  { %s11238_s12 = sld [smem:[%s13245_s0 + %s11055_s7]]   ;;  %s11059_s7 = smov 34  }
  0x32   :  { %s11263_s8 = sld [smem:[%s13245_s0 + %s11060_s15]]  }
  0x33   :  { %13297 = sst [smem:[#allocation41_spill]] %s11228_s19 }
  0x34   :  { %13298 = sst [smem:[#allocation42_spill]] %s11233_s24 }
  0x35   :  { %s11248_s19 = sld [smem:[%s13245_s0 + %s11057_s22]]   ;;  %s11061_s22 = smov 36  }
  0x36   :  { %s11253_s24 = sld [smem:[%s13245_s0 + %s11058_s28]]  }
  0x37   :  { %13299 = sst [smem:[#allocation43_spill]] %s11238_s12 }
  0x38   :  { %s11258_s12 = sld [smem:[%s13245_s0 + %s11059_s7]]  }
  0x39   :  { %s11268_s3 = sld [smem:[%s13245_s0 + %s11061_s22]]  }
  0x3a   :  { %78 = vsyncpa [#allocation3], 0 }
  0x3b   :  { %79 = vsyncpa [#allocation5], 0 }
  0x3c   :  { %80 = vsyncpa [#allocation8], 0 }
  0x3d   :  { %81 = vsyncpa [#allocation11], 0 }
  0x3e   :  { %82 = vsyncpa [#allocation14], 0 }
  0x3f   :  { %83 = vsyncpa [#allocation17], 0  ;;  %s11062_s28 = smov [#allocation4]   ;;  %s11063_s2 = smov [#allocation7]  }
  0x40   :  { %s111_s1 = sshll.u32 %s11062_s28, 4  ;;  %s143_s7 = sshll.u32 %s11063_s2, 4  ;;  %s112_s1 = int_to_ptr.vmem [resolvable:$true] %s111_s1  ;;  %s11270_s7 = int_to_ptr.vmem [resolvable:$true] %s143_s7 }
  0x41   :  { %s10772_s10 = scalar_lea.hbm %s11118_s29, 1280 }
  0x42   :  { %p10773_p0 = scmp.ne.s32.totalorder %s11118_s29, %s10772_s10  ;;  %p10776_p1 = scmp.lt.u32.totalorder %s10772_s10, %s11118_s29 }
  0x44   :  { %p10778_p2 = pnand %p10776_p1, %p10773_p0 }
  0x46   :  { %10781 = shalt.err (!%p10778_p2)
}
  0x47   :  { %s10782_s0 = scalar_lea.vmem %s112_s1, 1280  ;;  %p10787_p4 = scmp.lt.s32.totalorder %s112_s1, %s112_s1 }
  0x48   :  { %p10783_p3 = scmp.ne.s32.totalorder %s112_s1, %s10782_s0  ;;  %p10788_p5 = scmp.lt.s32.totalorder %s10782_s0, %s10782_s0 }
  0x4a   :  { %p10789_p6 = por %p10788_p5, %p10787_p4 }
  0x4c   :  { %p10790_p7 = pnand %p10789_p6, %p10783_p3 }
  0x4e   :  { %10793 = shalt.err (!%p10790_p7)
}
  0x4f   :  { %s11064_s11 = smov 128   ;;  %s11065_s15 = smov 8  }
  0x50   :  { %117 = dma.hbm_to_vmem [thread:$0]  %s11118_s29, 1280, %s112_s1, [#allocation5], %s11064_s11, %s11064_s11, %s11065_s15  }
  0x51   :  { %s10794_s16 = scalar_lea.hbm %s11148_s30, 2048 }
  0x52   :  { %p10795_p8 = scmp.ne.s32.totalorder %s11148_s30, %s10794_s16  ;;  %p10798_p9 = scmp.lt.u32.totalorder %s10794_s16, %s11148_s30 }
  0x54   :  { %p10800_p10 = pnand %p10798_p9, %p10795_p8 }
  0x56   :  { %10803 = shalt.err (!%p10800_p10)
}
  0x57   :  { %s10804_s18 = scalar_lea.vmem %s11270_s7, 2048  ;;  %p10809_p12 = scmp.lt.s32.totalorder %s11270_s7, %s11270_s7 }
  0x58   :  { %p10805_p11 = scmp.ne.s32.totalorder %s11270_s7, %s10804_s18  ;;  %p10810_p13 = scmp.lt.s32.totalorder %s10804_s18, %s10804_s18 }
  0x5a   :  { %p10811_p0 = por %p10810_p13, %p10809_p12 }
  0x5c   :  { %p10812_p1 = pnand %p10811_p0, %p10805_p11 }
  0x5e   :  { %10815 = shalt.err (!%p10812_p1)
}
  0x5f   :  { %149 = dma.hbm_to_vmem [thread:$0]  %s11148_s30, 2048, %s11270_s7, [#allocation8], %s11064_s11, %s11064_s11, %s11065_s15  }
  0x60   :  { %s11066_s29 = smov [#allocation10]   ;;  %s11067_s23 = smov [#allocation13]  }
  0x61   :  { %s173_s22 = sshll.u32 %s11066_s29, 4  ;;  %s205_s26 = sshll.u32 %s11067_s23, 4  ;;  %s174_s22 = int_to_ptr.vmem [resolvable:$true] %s173_s22  ;;  %s11291_s26 = int_to_ptr.vmem [resolvable:$true] %s205_s26 }
  0x62   :  { %s10816_s28 = scalar_lea.hbm %s11173_s4, 2304 }
  0x63   :  { %p10817_p2 = scmp.ne.s32.totalorder %s11173_s4, %s10816_s28  ;;  %p10820_p3 = scmp.lt.u32.totalorder %s10816_s28, %s11173_s4 }
  0x65   :  { %p10822_p4 = pnand %p10820_p3, %p10817_p2 }
  0x67   :  { %10825 = shalt.err (!%p10822_p4)
}
  0x68   :  { %s10826_s1 = scalar_lea.vmem %s174_s22, 2304  ;;  %p10831_p6 = scmp.lt.s32.totalorder %s174_s22, %s174_s22 }
  0x69   :  { %p10827_p5 = scmp.ne.s32.totalorder %s174_s22, %s10826_s1  ;;  %p10832_p7 = scmp.lt.s32.totalorder %s10826_s1, %s10826_s1 }
  0x6b   :  { %p10833_p8 = por %p10832_p7, %p10831_p6 }
  0x6d   :  { %p10834_p9 = pnand %p10833_p8, %p10827_p5 }
  0x6f   :  { %10837 = shalt.err (!%p10834_p9)
}
  0x70   :  { %179 = dma.hbm_to_vmem [thread:$0]  %s11173_s4, 2304, %s174_s22, [#allocation11], %s11064_s11, %s11064_s11, %s11065_s15  }
  0x71   :  { %s10838_s30 = scalar_lea.hbm %s11203_s6, 3072 }
  0x72   :  { %p10839_p10 = scmp.ne.s32.totalorder %s11203_s6, %s10838_s30  ;;  %p10842_p11 = scmp.lt.u32.totalorder %s10838_s30, %s11203_s6 }
  0x74   :  { %p10844_p12 = pnand %p10842_p11, %p10839_p10 }
  0x76   :  { %10847 = shalt.err (!%p10844_p12)
}
  0x77   :  { %s10848_s2 = scalar_lea.vmem %s11291_s26, 3072  ;;  %p10853_p0 = scmp.lt.s32.totalorder %s11291_s26, %s11291_s26 }
  0x78   :  { %p10849_p13 = scmp.ne.s32.totalorder %s11291_s26, %s10848_s2  ;;  %p10854_p1 = scmp.lt.s32.totalorder %s10848_s2, %s10848_s2 }
  0x7a   :  { %p10855_p2 = por %p10854_p1, %p10853_p0 }
  0x7c   :  { %p10856_p3 = pnand %p10855_p2, %p10849_p13 }
  0x7e   :  { %10859 = shalt.err (!%p10856_p3)
}
  0x7f   :  { %211 = dma.hbm_to_vmem [thread:$0]  %s11203_s6, 3072, %s11291_s26, [#allocation14], %s11064_s11, %s11064_s11, %s11065_s15  }
  0x80   :  { %s11068_s4 = smov [#allocation16]   ;;  %s11069_s10 = smov [#allocation2]  }
  0x81   :  { %s243_s7 = sshll.u32 %s11068_s4, 4  ;;  %s97_s0 = sshll.u32 %s11069_s10, 4  ;;  %s244_s7 = int_to_ptr.vmem [resolvable:$true] %s243_s7  ;;  %s11312_s0 = int_to_ptr.vmem [resolvable:$true] %s97_s0 }
  0x82   :  { %s10860_s16 = scalar_lea.hbm %s11248_s19, 2048 }
  0x83   :  { %p10861_p4 = scmp.ne.s32.totalorder %s11248_s19, %s10860_s16  ;;  %p10864_p5 = scmp.lt.u32.totalorder %s10860_s16, %s11248_s19 }
  0x85   :  { %p10866_p6 = pnand %p10864_p5, %p10861_p4 }
  0x87   :  { %10869 = shalt.err (!%p10866_p6)
}
  0x88   :  { %s10870_s18 = scalar_lea.vmem %s244_s7, 2048  ;;  %p10875_p8 = scmp.lt.s32.totalorder %s244_s7, %s244_s7 }
  0x89   :  { %p10871_p7 = scmp.ne.s32.totalorder %s244_s7, %s10870_s18  ;;  %p10876_p9 = scmp.lt.s32.totalorder %s10870_s18, %s10870_s18 }
  0x8b   :  { %p10877_p10 = por %p10876_p9, %p10875_p8 }
  0x8d   :  { %p10878_p11 = pnand %p10877_p10, %p10871_p7 }
  0x8f   :  { %10881 = shalt.err (!%p10878_p11)
}
  0x90   :  { %249 = dma.hbm_to_vmem [thread:$0]  %s11248_s19, 2048, %s244_s7, [#allocation17], %s11064_s11, %s11064_s11, %s11065_s15  }
  0x91   :  { %s10882_s6 = scalar_lea.hbm %s11108_s21, 768 }
  0x92   :  { %p10883_p12 = scmp.ne.s32.totalorder %s11108_s21, %s10882_s6  ;;  %p10886_p13 = scmp.lt.u32.totalorder %s10882_s6, %s11108_s21 }
  0x94   :  { %p10888_p0 = pnand %p10886_p13, %p10883_p12 }
  0x96   :  { %10891 = shalt.err (!%p10888_p0)
}
  0x97   :  { %s10892_s29 = scalar_lea.vmem %s11312_s0, 768  ;;  %p10897_p2 = scmp.lt.s32.totalorder %s11312_s0, %s11312_s0 }
  0x98   :  { %p10893_p1 = scmp.ne.s32.totalorder %s11312_s0, %s10892_s29  ;;  %p10898_p3 = scmp.lt.s32.totalorder %s10892_s29, %s10892_s29 }
  0x9a   :  { %p10899_p4 = por %p10898_p3, %p10897_p2 }
  0x9c   :  { %p10900_p5 = pnand %p10899_p4, %p10893_p1 }
  0x9e   :  { %10903 = shalt.err (!%p10900_p5)
}
  0x9f   :  { %103 = dma.hbm_to_vmem [thread:$0]  %s11108_s21, 768, %s11312_s0, [#allocation3], %s11064_s11, %s11064_s11, %s11065_s15  }
  0xa0   :  { %s11070_s19 = smov [#allocation6]   ;;  %s11071_s23 = smov [#allocation9]  }
  0xa1   :  { %s127_s22 = sshll.u32 %s11070_s19, 4  ;;  %s159_s26 = sshll.u32 %s11071_s23, 4  ;;  %s128_s22 = int_to_ptr.vmem [resolvable:$true] %s127_s22  ;;  %s11333_s26 = int_to_ptr.vmem [resolvable:$true] %s159_s26 }
  0xa2   :  { %s10904_s28 = scalar_lea.hbm %s11133_s14, 1536 }
  0xa3   :  { %p10905_p6 = scmp.ne.s32.totalorder %s11133_s14, %s10904_s28  ;;  %p10908_p7 = scmp.lt.u32.totalorder %s10904_s28, %s11133_s14 }
  0xa5   :  { %p10910_p8 = pnand %p10908_p7, %p10905_p6 }
  0xa7   :  { %10913 = shalt.err (!%p10910_p8)
}
  0xa8   :  { %s10914_s1 = scalar_lea.vmem %s128_s22, 1536  ;;  %p10919_p10 = scmp.lt.s32.totalorder %s128_s22, %s128_s22 }
  0xa9   :  { %p10915_p9 = scmp.ne.s32.totalorder %s128_s22, %s10914_s1  ;;  %p10920_p11 = scmp.lt.s32.totalorder %s10914_s1, %s10914_s1 }
  0xab   :  { %p10921_p12 = por %p10920_p11, %p10919_p10 }
  0xad   :  { %p10922_p13 = pnand %p10921_p12, %p10915_p9 }
  0xaf   :  { %10925 = shalt.err (!%p10922_p13)
}
  0xb0   :  { %133 = dma.hbm_to_vmem [thread:$0]  %s11133_s14, 1536, %s128_s22, [#allocation5], %s11064_s11, %s11064_s11, %s11065_s15  }
  0xb1   :  { %s10926_s21 = scalar_lea.hbm %s11163_s20, 3840 }
  0xb2   :  { %p10927_p0 = scmp.ne.s32.totalorder %s11163_s20, %s10926_s21  ;;  %p10930_p1 = scmp.lt.u32.totalorder %s10926_s21, %s11163_s20 }
  0xb4   :  { %p10932_p2 = pnand %p10930_p1, %p10927_p0 }
  0xb6   :  { %10935 = shalt.err (!%p10932_p2)
}
  0xb7   :  { %s10936_s30 = scalar_lea.vmem %s11333_s26, 3840  ;;  %p10941_p4 = scmp.lt.s32.totalorder %s11333_s26, %s11333_s26 }
  0xb8   :  { %p10937_p3 = scmp.ne.s32.totalorder %s11333_s26, %s10936_s30  ;;  %p10942_p5 = scmp.lt.s32.totalorder %s10936_s30, %s10936_s30 }
  0xba   :  { %p10943_p6 = por %p10942_p5, %p10941_p4 }
  0xbc   :  { %p10944_p7 = pnand %p10943_p6, %p10937_p3 }
  0xbe   :  { %10947 = shalt.err (!%p10944_p7)
}
  0xbf   :  { %165 = dma.hbm_to_vmem [thread:$0]  %s11163_s20, 3840, %s11333_s26, [#allocation8], %s11064_s11, %s11064_s11, %s11065_s15  }
  0xc0   :  { %s11072_s14 = smov [#allocation12]   ;;  %s11073_s4 = smov [#allocation15]  }
  0xc1   :  { %s189_s2 = sshll.u32 %s11072_s14, 4  ;;  %s231_s7 = sshll.u32 %s11073_s4, 4  ;;  %s190_s2 = int_to_ptr.vmem [resolvable:$true] %s189_s2  ;;  %s11354_s7 = int_to_ptr.vmem [resolvable:$true] %s231_s7 }
  0xc2   :  { %s10948_s10 = scalar_lea.hbm %s11188_s27, 2560 }
  0xc3   :  { %p10949_p8 = scmp.ne.s32.totalorder %s11188_s27, %s10948_s10  ;;  %p10952_p9 = scmp.lt.u32.totalorder %s10948_s10, %s11188_s27 }
  0xc5   :  { %p10954_p10 = pnand %p10952_p9, %p10949_p8 }
  0xc7   :  { %10957 = shalt.err (!%p10954_p10)
}
  0xc8   :  { %s10958_s0 = scalar_lea.vmem %s190_s2, 2560  ;;  %p10963_p12 = scmp.lt.s32.totalorder %s190_s2, %s190_s2 }
  0xc9   :  { %p10959_p11 = scmp.ne.s32.totalorder %s190_s2, %s10958_s0  ;;  %p10964_p13 = scmp.lt.s32.totalorder %s10958_s0, %s10958_s0 }
  0xcb   :  { %p10965_p0 = por %p10964_p13, %p10963_p12 }
  0xcd   :  { %p10966_p1 = pnand %p10965_p0, %p10959_p11 }
  0xcf   :  { %10969 = shalt.err (!%p10966_p1)
}
  0xd0   :  { %195 = dma.hbm_to_vmem [thread:$0]  %s11188_s27, 2560, %s190_s2, [#allocation11], %s11064_s11, %s11064_s11, %s11065_s15  }
  0xd1   :  { %s10970_s20 = scalar_lea.hbm %s11243_s9, 2048 }
  0xd2   :  { %p10971_p2 = scmp.ne.s32.totalorder %s11243_s9, %s10970_s20  ;;  %p10974_p3 = scmp.lt.u32.totalorder %s10970_s20, %s11243_s9 }
  0xd4   :  { %p10976_p4 = pnand %p10974_p3, %p10971_p2 }
  0xd6   :  { %10979 = shalt.err (!%p10976_p4)
}
  0xd7   :  { %s10980_s16 = scalar_lea.vmem %s11354_s7, 2048  ;;  %p10985_p6 = scmp.lt.s32.totalorder %s11354_s7, %s11354_s7 }
  0xd8   :  { %p10981_p5 = scmp.ne.s32.totalorder %s11354_s7, %s10980_s16  ;;  %p10986_p7 = scmp.lt.s32.totalorder %s10980_s16, %s10980_s16 }
  0xda   :  { %p10987_p8 = por %p10986_p7, %p10985_p6 }
  0xdc   :  { %p10988_p9 = pnand %p10987_p8, %p10981_p5 }
  0xde   :  { %10991 = shalt.err (!%p10988_p9)
}
  0xdf   :  { %237 = dma.hbm_to_vmem [thread:$0]  %s11243_s9, 2048, %s11354_s7, [#allocation14], %s11064_s11, %s11064_s11, %s11065_s15  }
  0xe0   :  { %s11074_s27 = smov [#allocation18]   ;;  %s10992_s6 = scalar_lea.hbm %s11258_s12, 2048 }
  0xe1   :  { %s257_s18 = sshll.u32 %s11074_s27, 4  ;;  %p10993_p10 = scmp.ne.s32.totalorder %s11258_s12, %s10992_s6  ;;  %s258_s18 = int_to_ptr.vmem [resolvable:$true] %s257_s18 }
  0xe2   :  { %p10996_p11 = scmp.lt.u32.totalorder %s10992_s6, %s11258_s12 }
  0xe4   :  { %p10998_p12 = pnand %p10996_p11, %p10993_p10 }
  0xe6   :  { %11001 = shalt.err (!%p10998_p12)
}
  0xe7   :  { %s11002_s29 = scalar_lea.vmem %s258_s18, 2048  ;;  %p11007_p0 = scmp.lt.s32.totalorder %s258_s18, %s258_s18 }
  0xe8   :  { %p11003_p13 = scmp.ne.s32.totalorder %s258_s18, %s11002_s29  ;;  %p11008_p1 = scmp.lt.s32.totalorder %s11002_s29, %s11002_s29 }
  0xea   :  { %p11009_p2 = por %p11008_p1, %p11007_p0 }
  0xec   :  { %p11010_p3 = pnand %p11009_p2, %p11003_p13 }
  0xee   :  { %11013 = shalt.err (!%p11010_p3)
}
  0xef   :  { %263 = dma.hbm_to_vmem [thread:$0]  %s11258_s12, 2048, %s258_s18, [#allocation17], %s11064_s11, %s11064_s11, %s11065_s15  }
  0xf0   :  { %11014 = dma.done.wait [#allocation3], 768  }
  0xf1   :  { %11015 = vsyncadd [#allocation3], 4294966528 }
  0xf2   :  { %11016 = dma.done.wait [#allocation5], 2816  }
  0xf3   :  { %11017 = vsyncadd [#allocation5], 4294964480 }
  0xf4   :  { %11018 = dma.done.wait [#allocation8], 5888  }
  0xf5   :  { %11019 = vsyncadd [#allocation8], 4294961408 }
  0xf6   :  { %11020 = dma.done.wait [#allocation11], 4864  }
  0xf7   :  { %11021 = vsyncadd [#allocation11], 4294962432 }
  0xf8   :  { %11022 = dma.done.wait [#allocation14], 5120  }
  0xf9   :  { %11023 = vsyncadd [#allocation14], 4294962176 }
  0xfa   :  { %11024 = dma.done.wait [#allocation17], 4096  }
  0xfb   :  { %11025 = vsyncadd [#allocation17], 4294963200  ;;  %v13250_v0 = vmov 0.0|0.0   ;;  %vm11076_vm0 = vmmov 0   ;;  %v13248_v1 = vmov 0.0   ;;  %vm326_vm1 = vcmask 1043456  }
  0xfc   :  { %9876 = vmatprep.subr.bf16.mxu1 %v13250_v0  ;;  %9884 = vmatprep.subr.bf16.mxu0 %v13250_v0  ;;  %vm13277_vm2 = vmmov 1   ;;  %vm313_vm4 = vcmask 1046528   ;;  %v306_v3 = vld [vmem:[#allocation2 + $0x10] sm:$0xff]  ;;  %v307_v4 = vld [vmem:[#allocation2 + $0x18] sm:$0xf]  ;;  %v299_v5 = vld [vmem:[%s11088_s5] sm:$0xff] }
  0xfd   :  { %8759 = vmatprep.mubr.msk.f32.mxu1 %vm11076_vm0, %v13248_v1  ;;  %8785 = vmatprep.mubr.msk.f32.mxu0 %vm11076_vm0, %v13248_v1  ;;  %vm11390_vm3 = vmpackc.low %vm326_vm1, %vm13277_vm2  ;;  %vm319_vm5 = vcmask 97280   ;;  %vm499_vm6 = vcmask 1045504   ;;  %v9877_v6 = vpack.c.bf16 %v307_v4, %v306_v3  ;;  %v300_v7 = vld [vmem:[%s11088_s5 + $0x8] sm:$0xff]  ;;  %v314_v8 = vrot.slane %v299_v5, 1  ;;  %v304_v9 = vld [vmem:[#allocation2] sm:$0xff]  ;;  %s13303_s9 = sld [smem:[#allocation27_spill]] }
  0xfe   :  { %v305_v10 = vld [vmem:[#allocation2 + $0x8] sm:$0xf]  ;;  %v500_v11 = vrot.slane %v299_v5, 2  ;;  %v315_v12 = vrot.slane %v300_v7, 1  ;;  %v301_v13 = vld [vmem:[%s11088_s5 + $0x10] sm:$0xf] }
  0xff   :  { %v308_v14 = vld [vmem:[#allocation2 + $0x20] sm:$0xff]  ;;  %v309_v15 = vld [vmem:[#allocation2 + $0x28] sm:$0xf]  ;;  %9879 = vmatpush3.bf16.msk.msra.mxu1 %vm11390_vm3, %v9877_v6  ;;  %v9881_v16 = vpack.c.bf16 %v305_v10, %v304_v9  ;;  %v317_v17 = vrot.slane %v301_v13, 1  ;;  %v501_v19 = vrot.slane %v300_v7, 2  ;;  %v503_v22 = vrot.slane %v301_v13, 2 }
 0x100   :  { %v9885_v18 = vpack.c.bf16 %v309_v15, %v308_v14  ;;  %v316_v20 = vsel %vm313_vm4, %v314_v8, %v315_v12  ;;  %9880 = vmatprep.subr.bf16.mxu1 %v13250_v0  ;;  %v618_v25 = vld [vmem:[#allocation4 + $0x10] sm:$0xff]  ;;  %v619_v26 = vld [vmem:[#allocation4 + $0x18] sm:$0xff]  ;;  %v616_v28 = vld [vmem:[#allocation4] sm:$0xff]  ;;  %v13253_v33 = vmov 0   ;;  %s13302_s5 = sld [smem:[#allocation26_spill]]  ;;  %vm1389_vm2 = vcmask 523264  }
 0x101   :  { %v502_v21 = vsel %vm499_vm6, %v500_v11, %v501_v19  ;;  %v318_v23 = vsel %vm313_vm4, %v315_v12, %v317_v17  ;;  %v504_v24 = vsel %vm499_vm6, %v501_v19, %v503_v22  ;;  %v9888_v27 = vpack.c.bf16 %v619_v26, %v618_v25  ;;  %v617_v29 = vld [vmem:[#allocation4 + $0x8] sm:$0xff]  ;;  %v11435_v31 = vld [vmem:[%s11098_s13] sm:$0xff]  ;;  %v11438_v32 = vld [vmem:[%s11098_s13 + $0x8] sm:$0xff]  ;;  %10744 = vset.pattern.permute.xlu0 %v13253_v33  ;;  %s13353_s12 = sld [smem:[#allocation32_spill]]  ;;  %s13360_s11 = sld [smem:[#allocation30_spill]] }
 0x102   :  { %9887 = vmatpush3.bf16.msk.msra.mxu0 %vm11390_vm3, %v9885_v18  ;;  %8760 = vmatmul.mubr.msk.f32.vlgmr.msra.gmra.mrb[0].mxu1 %vm319_vm5, %v316_v20  ;;  %v11431_v30 = vpack.c.bf16 %v617_v29, %v616_v28  ;;  %vm1048_vm7 = vcmp.lt.f32.partialorder %v11435_v31, 4.0  ;;  %vm1049_vm8 = vcmp.lt.f32.partialorder %v11438_v32, 4.0  ;;  %v1699_v35 = vld [vmem:[%s11103_s17] sm:$0xff]  ;;  %v1701_v37 = vld [vmem:[%s11103_s17 + $0x10] sm:$0xff]  ;;  %v11458_v47 = vld [vmem:[%s11103_s17 + $0x8] sm:$0xff]  ;;  %s13361_s15 = sld [smem:[#allocation31_spill]] }
 0x103   :  { %9883 = vmatpush3.bf16.msk.msra.mxu1 %vm11390_vm3, %v9881_v16  ;;  %8762 = vmatprep.mubr.msk.f32.mxu1 %vm11076_vm0, %v13248_v1  ;;  %v1050_v34 = vsel %vm1048_vm7, 1, %v13253_v33  ;;  %v1051_v36 = vsel %vm1049_vm8, 1, %v13253_v33  ;;  %vm5191_vm9 = vcmp.lt.f32.partialorder %v1699_v35, 16.0  ;;  %vm5193_vm10 = vcmp.lt.f32.partialorder %v1701_v37, 16.0  ;;  %v1703_v39 = vld [vmem:[%s11103_s17 + $0x20] sm:$0xff]  ;;  %v1705_v41 = vld [vmem:[%s11103_s17 + $0x30] sm:$0xff] }
 0x104   :  { %9889 = vmatprep.subr.bf16.mxu1 %v9888_v27  ;;  %10745 = vset.pattern.permute.xlu1 %v13253_v33  ;;  %v5199_v38 = vsel %vm5191_vm9, 1, %v13253_v33  ;;  %v5201_v40 = vsel %vm5193_vm10, 1, %v13253_v33  ;;  %vm5195_vm11 = vcmp.lt.f32.partialorder %v1703_v39, 16.0  ;;  %vm5197_vm12 = vcmp.lt.f32.partialorder %v1705_v41, 16.0  ;;  %v11463_v49 = vld [vmem:[%s11103_s17 + $0x18] sm:$0xff]  ;;  %v11468_v51 = vld [vmem:[%s11103_s17 + $0x28] sm:$0xff] }
 0x105   :  { %8786 = vmatmul.mubr.msk.f32.vlgmr.msra.gmra.mrb[0].mxu0 %vm319_vm5, %v502_v21  ;;  %1053 = vperm.xlu0 %10744, %v1050_v34   ;;  %v5203_v42 = vsel %vm5195_vm11, 1, %v13253_v33  ;;  %v5205_v43 = vsel %vm5197_vm12, 1, %v13253_v33  ;;  %vm6009_vm13 = vcmp.lt.f32.partialorder %v1699_v35, 8.0  ;;  %vm6011_vm14 = vcmp.lt.f32.partialorder %v1701_v37, 8.0  ;;  %v7842_v12 = vld [vmem:[%s11113_s25] ss:$0 sm:$0xff] }
 0x106   :  { %8788 = vmatprep.mubr.msk.f32.mxu0 %vm11076_vm0, %v13248_v1  ;;  %8763 = vmatmul.mubr.msk.f32.gmra.mrb[2].mxu1 %vm319_vm5, %v318_v23  ;;  %v6016_v44 = vsel %vm6009_vm13, 1, %v13253_v33  ;;  %v6018_v45 = vsel %vm6011_vm14, 1, %v13253_v33  ;;  %vm6013_vm15 = vcmp.lt.f32.partialorder %v1703_v39, 8.0  ;;  %vm6015_vm7 = vcmp.lt.f32.partialorder %v1705_v41, 8.0  ;;  %v620_v28 = vld [vmem:[#allocation4 + $0x20] sm:$0xff]  ;;  %v621_v29 = vld [vmem:[#allocation4 + $0x28] sm:$0xff] }
 0x107   :  { %8765 = vmatprep.mubr.msk.f32.mxu1 %vm11076_vm0, %v13248_v1  ;;  %v6020_v46 = vsel %vm6013_vm15, 1, %v13253_v33  ;;  %v6022_v48 = vsel %vm6015_vm7, 1, %v13253_v33  ;;  %vm6568_vm8 = vcmp.lt.f32.partialorder %v11458_v47, 4.0  ;;  %vm6570_vm9 = vcmp.lt.f32.partialorder %v11463_v49, 4.0  ;;  %s13305_s25 = sld [smem:[#allocation25_spill]]  ;;  %s13365_s22 = sld [smem:[#allocation34_spill]] }
 0x108   :  { %v6575_v50 = vsel %vm6568_vm8, 1, %v13253_v33  ;;  %v6577_v52 = vsel %vm6570_vm9, 1, %v13253_v33  ;;  %vm6572_vm10 = vcmp.lt.f32.partialorder %v11468_v51, 4.0  ;;  %vm7224_vm11 = vcmp.lt.f32.partialorder %v1699_v35, 1.0  ;;  %v1722_v0 = vld [vmem:[#allocation9 + $0x78] sm:$0xf] }
 0x109   :  { %8789 = vmatmul.mubr.msk.f32.gmra.mrb[2].mxu0 %vm319_vm5, %v504_v24  ;;  %1056 = vperm.xlu0 %10744, %v1051_v36   ;;  %v6579_v53 = vsel %vm6572_vm10, 1, %v13253_v33  ;;  %v7230_v54 = vsel %vm7224_vm11, 1, %v13253_v33  ;;  %vm7226_vm12 = vcmp.lt.f32.partialorder %v1701_v37, 1.0  ;;  %vm1622_vm13 = vcmp.lt.f32.partialorder %v11435_v31, 1.0  ;;  %s13364_s19 = sld [smem:[#allocation33_spill]]  ;;  %s13366_s23 = sld [smem:[#allocation35_spill]] }
 0x10a   :  { %8791 = vmatprep.mubr.msk.f32.mxu0 %vm11076_vm0, %v13248_v1  ;;  %8766 = vmatmul.mubr.msk.f32.gmra.mrb[4].mxu1 %vm319_vm5, %v317_v17  ;;  %v7232_v55 = vsel %vm7226_vm12, 1, %v13253_v33  ;;  %v1624_v56 = vsel %vm1622_vm13, 1, %v13253_v33  ;;  %vm7228_vm14 = vcmp.lt.f32.partialorder %v1703_v39, 1.0  ;;  %vm631_vm8 = vcmask 130048   ;;  %s13367_s26 = sld [smem:[#allocation36_spill]]  ;;  %s13370_s28 = sld [smem:[#allocation39_spill]] }
 0x10b   :  { %8772 = vmatprep.mubr.msk.f32.mxu1 %vm11076_vm0, %v13248_v1  ;;  %v7234_v57 = vsel %vm7228_vm14, 1, %v13253_v33  ;;  %vm875_vm9 = vcmask 1044480   ;;  %vm1064_vm11 = vcmask 259072   ;;  %vm1062_vm13 = vcmask 261120   ;;  %s13374_s1 = sld [smem:[#allocation37_spill]]  ;;  %s13375_s21 = sld [smem:[#allocation38_spill]] }
 0x10c   :  { %s13376_s30 = sld [smem:[#allocation42_spill]]  ;;  %s13380_s14 = sld [smem:[#allocation40_spill]] }
 0x10d   :  { %8792 = vmatmul.mubr.msk.f32.gmra.mrb[4].mxu0 %vm319_vm5, %v503_v22  ;;  %5208 = vperm.xlu0 %10744, %v5199_v38   ;;  %s13381_s2 = sld [smem:[#allocation41_spill]]  ;;  %s13382_s4 = sld [smem:[#allocation43_spill]] }
 0x10e   :  { %8773 = vmatmul.mubr.msk.f32.vlgmr.msra.gmra.mrb[6].mxu1 %vm319_vm5, %v299_v5 }
 0x10f   :  { %8775 = vmatprep.mubr.msk.f32.mxu1 %vm11076_vm0, %v13248_v1  ;;  %9891 = vmatpush3.bf16.msra.mxu1 %v9888_v27 }
 0x110   :  { %9893 = vmatprep.subr.bf16.mxu1 %v11431_v30 }
 0x111   :  { %5214 = vperm.xlu0 %10744, %v5201_v40  }
 0x112   :  { %8776 = vmatmul.mubr.msk.f32.gmra.mrb[8].mxu1 %vm319_vm5, %v300_v7 }
 0x113   :  { %8778 = vmatprep.mubr.msk.f32.mxu1 %vm11076_vm0, %v13248_v1  ;;  %v1721_v1 = vld [vmem:[#allocation9 + $0x70] sm:$0xff] }
 0x115   :  { %5220 = vperm.xlu0 %10744, %v5203_v42  }
 0x116   :  { %8779 = vmatmul.mubr.msk.f32.gmra.mrb[10].mxu1 %vm319_vm5, %v301_v13 }
 0x119   :  { %5226 = vperm.xlu0 %10744, %v5205_v43  }
 0x11d   :  { %6024 = vperm.xlu0 %10744, %v6016_v44   ;;  %v9896_v44 = vpack.c.bf16 %v621_v29, %v620_v28 }
 0x121   :  { %6030 = vperm.xlu0 %10744, %v6018_v45  }
 0x125   :  { %6036 = vperm.xlu0 %10744, %v6020_v46  }
 0x129   :  { %6042 = vperm.xlu0 %10744, %v6022_v48  }
 0x12d   :  { %6585 = vperm.xlu0 %10744, %v6575_v50  }
 0x131   :  { %6591 = vperm.xlu0 %10744, %v6577_v52  }
 0x135   :  { %6597 = vperm.xlu0 %10744, %v6579_v53  }
 0x139   :  { %7237 = vperm.xlu0 %10744, %v7230_v54  }
 0x13d   :  { %7243 = vperm.xlu0 %10744, %v7232_v55  }
 0x141   :  { %1627 = vperm.xlu0 %10744, %v1624_v56  }
 0x145   :  { %7249 = vperm.xlu0 %10744, %v7234_v57   ;;  %v622_v57 = vld [vmem:[#allocation4 + $0x30] sm:$0xff] }
 0x1d5   :  { %v396_v58 = vpop.f32.mrb[0].mxu1 }
 0x1d6   :  { %v8761_v59 = vpop.f32.mrb[1].mxu1 }
 0x1d8   :  { %v580_v60 = vpop.f32.mrb[0].mxu0 }
 0x1d9   :  { %v8787_v61 = vpop.f32.mrb[1].mxu0  ;;  %v401_v62 = vpop.f32.mrb[2].mxu1 }
 0x1da   :  { %v8764_v63 = vpop.f32.mrb[3].mxu1  ;;  %v625_v61 = vld [vmem:[#allocation4 + $0x48] sm:$0xff] }
 0x1db   :  { %v1121_v63 = vld [vmem:[#allocation6 + $0x28] sm:$0xff] }
 0x1dc   :  { %v585_v3 = vpop.f32.mrb[2].mxu0 }
 0x1dd   :  { %v8790_v4 = vpop.f32.mrb[3].mxu0  ;;  %v406_v5 = vpop.f32.mrb[4].mxu1 }
 0x1de   :  { %v8767_v6 = vpop.f32.mrb[5].mxu1  ;;  %v1122_v4 = vld [vmem:[#allocation6 + $0x30] sm:$0xff] }
 0x1e0   :  { %v590_v7 = vpop.f32.mrb[4].mxu0 }
 0x1e1   :  { %v8793_v8 = vpop.f32.mrb[5].mxu0  ;;  %v485_v9 = vpop.f32.mrb[6].mxu1 }
 0x1e2   :  { %v486_v10 = vadd.f32 %v485_v9, %v396_v58  ;;  %v8774_v11 = vpop.f32.mrb[7].mxu1  ;;  %v623_v58 = vld [vmem:[#allocation4 + $0x38] sm:$0xff] }
 0x1e3   :  { %v9900_v59 = vpack.c.bf16 %v623_v58, %v622_v57  ;;  %v1117_v8 = vld [vmem:[#allocation6 + $0x8] sm:$0xff] }
 0x1e4   :  { %v594_v13 = vadd.f32 %v580_v60, %v486_v10  ;;  %v624_v60 = vld [vmem:[#allocation4 + $0x40] sm:$0xff]  ;;  %v1054_v10 = vpop.permute.xlu0 %1053 }
 0x1e5   :  { %v490_v14 = vpop.f32.mrb[8].mxu1  ;;  %vm1058_vm14 = vcmp.eq.s32.totalorder %v1054_v10, 1 }
 0x1e6   :  { %v604_v15 = vadd.f32 %v7842_v12, %v594_v13  ;;  %v491_v16 = vadd.f32 %v490_v14, %v401_v62  ;;  %v8777_v17 = vpop.f32.mrb[9].mxu1  ;;  %v9904_v62 = vpack.c.bf16 %v625_v61, %v624_v60 }
 0x1e8   :  { %vm607_vm15 = vcmp.gt.f32.partialorder %v604_v15, 0.0  ;;  %v610_v18 = vmul.f32 0.2, %v604_v15  ;;  %v595_v19 = vadd.f32 %v585_v3, %v491_v16  ;;  %v1057_v11 = vpop.permute.xlu0 %1056 }
 0x1e9   :  { %v495_v20 = vpop.f32.mrb[10].mxu1  ;;  %vm1059_vm12 = vcmp.eq.s32.totalorder %v1057_v11, 1 }
 0x1ea   :  { %v613_v21 = vsel %vm607_vm15, %v604_v15, %v610_v18  ;;  %v605_v22 = vadd.f32 %v7842_v12, %v595_v19  ;;  %v496_v23 = vadd.f32 %v495_v20, %v406_v5  ;;  %v8780_v24 = vpop.f32.mrb[11].mxu1  ;;  %v1123_v5 = vld [vmem:[#allocation6 + $0x38] sm:$0xff]  ;;  %vm1375_vm15 = vcmp.lt.f32.partialorder %v11435_v31, 2.0 }
 0x1eb   :  { %v628_v27 = vrot.slane %v613_v21, 1  ;;  %v790_v34 = vrot.slane %v613_v21, 2  ;;  %v876_v37 = vrot.slane %v613_v21, 3  ;;  %v962_v38 = vrot.slane %v613_v21, 4 }
 0x1ec   :  { %vm608_vm7 = vcmp.gt.f32.partialorder %v605_v22, 0.0  ;;  %v611_v25 = vmul.f32 0.2, %v605_v22  ;;  %v596_v26 = vadd.f32 %v590_v7, %v496_v23  ;;  %v9912_v6 = vpack.c.bf16 %v1123_v5, %v1122_v4  ;;  %v1116_v7 = vld [vmem:[#allocation6] sm:$0xff] }
 0x1ed   :  { %v11496_v9 = vpack.c.bf16 %v1117_v8, %v1116_v7  ;;  %v1119_v7 = vld [vmem:[#allocation6 + $0x18] sm:$0xff] }
 0x1ee   :  { %v614_v35 = vsel %vm608_vm7, %v605_v22, %v611_v25  ;;  %v606_v36 = vadd.f32 %v7842_v12, %v596_v26  ;;  %vm1376_vm7 = vcmp.lt.f32.partialorder %v11438_v32, 2.0 }
 0x1ef   :  { %v629_v39 = vrot.slane %v614_v35, 1  ;;  %v791_v40 = vrot.slane %v614_v35, 2  ;;  %v877_v41 = vrot.slane %v614_v35, 3  ;;  %v963_v42 = vrot.slane %v614_v35, 4 }
 0x1f0   :  { %vm609_vm10 = vcmp.gt.f32.partialorder %v606_v36, 0.0  ;;  %v612_v43 = vmul.f32 0.2, %v606_v36 }
 0x1f1   :  { %v630_v45 = vsel %vm313_vm4, %v628_v27, %v629_v39  ;;  %v792_v46 = vsel %vm499_vm6, %v790_v34, %v791_v40  ;;  %v878_v48 = vsel %vm875_vm9, %v876_v37, %v877_v41  ;;  %v964_v50 = vsel %vm326_vm1, %v962_v38, %v963_v42 }
 0x1f2   :  { %v615_v52 = vsel %vm609_vm10, %v606_v36, %v612_v43  ;;  %8798 = vmatprep.mubr.msk.f32.mxu1 %vm631_vm8, %v630_v45  ;;  %v1377_v43 = vsel %vm1375_vm15, 1, %v13253_v33  ;;  %vm2717_vm15 = vcmask 1041408  }
 0x1f3   :  { %v879_v53 = vrot.slane %v615_v52, 3  ;;  %v965_v54 = vrot.slane %v615_v52, 4  ;;  %8799 = vmatmul.mubr.msk.f32.vlgmr.msra.gmra.mrb[12].mxu1 %vm631_vm8, %v629_v39  ;;  %1380 = vperm.xlu1 %10745, %v1377_v43   ;;  %v1712_v43 = vld [vmem:[#allocation9 + $0x28] sm:$0xf] }
 0x1f4   :  { %9895 = vmatpush3.bf16.msra.mxu1 %v11431_v30  ;;  %8805 = vmatprep.mubr.msk.f32.mxu1 %vm631_vm8, %v613_v21  ;;  %v1120_v30 = vld [vmem:[#allocation6 + $0x20] sm:$0xff] }
 0x1f5   :  { %9897 = vmatprep.subr.bf16.mxu1 %v9896_v44  ;;  %v880_v55 = vsel %vm875_vm9, %v877_v41, %v879_v53  ;;  %v966_v56 = vsel %vm326_vm1, %v963_v42, %v965_v54  ;;  %v9908_v3 = vpack.c.bf16 %v1121_v63, %v1120_v30  ;;  %v1091_v53 = vld [vmem:[%s13302_s5] sm:$0x1] }
 0x1f7   :  { %9909 = vmatprep.subr.bf16.mxu0 %v9908_v3 }
 0x1f8   :  { %9911 = vmatpush3.bf16.msra.mxu0 %v9908_v3 }
 0x1f9   :  { %9913 = vmatprep.subr.bf16.mxu0 %v9912_v6 }
 0x1fb   :  { %8806 = vmatmul.mubr.msk.f32.vlgmr.msra.gmra.mrb[12].mxu1 %vm631_vm8, %v614_v35 }
 0x1fc   :  { %9899 = vmatpush3.bf16.msra.mxu1 %v9896_v44  ;;  %8812 = vmatprep.mubr.msk.f32.mxu1 %vm631_vm8, %v792_v46  ;;  %v1378_v46 = vsel %vm1376_vm7, 1, %v13253_v33  ;;  %vm5192_vm7 = vcmp.lt.f32.partialorder %v11458_v47, 16.0 }
 0x1fd   :  { %9901 = vmatprep.subr.bf16.mxu1 %v9900_v59  ;;  %9915 = vmatpush3.bf16.msra.mxu0 %v9912_v6  ;;  %v1118_v6 = vld [vmem:[#allocation6 + $0x10] sm:$0xff] }
 0x1fe   :  { %9917 = vmatprep.subr.bf16.mxu0 %v11496_v9  ;;  %1383 = vperm.xlu1 %10745, %v1378_v46  }
 0x203   :  { %8813 = vmatmul.mubr.msk.f32.vlgmr.msra.gmra.mrb[12].mxu1 %vm631_vm8, %v791_v40 }
 0x204   :  { %9903 = vmatpush3.bf16.msra.mxu1 %v9900_v59  ;;  %8819 = vmatprep.mubr.msk.f32.mxu1 %vm631_vm8, %v878_v48 }
 0x205   :  { %9905 = vmatprep.subr.bf16.mxu1 %v9904_v62 }
 0x20b   :  { %8820 = vmatmul.mubr.msk.f32.vlgmr.msra.gmra.mrb[12].mxu1 %vm631_vm8, %v880_v55 }
 0x20c   :  { %9907 = vmatpush3.bf16.msra.mxu1 %v9904_v62  ;;  %8826 = vmatprep.mubr.msk.f32.mxu1 %vm631_vm8, %v964_v50  ;;  %v1096_v50 = vlaneseq }
 0x20e   :  { %v1097_v52 = vshrl.u32 %v1096_v50, 7  ;;  %v11561_v50 = vld [vmem:[%s13305_s25 + $0x30] sm:$0xff] }
 0x210   :  { %v11508_v54 = vsub.s32 0, %v1097_v52 }
 0x212   :  { %13304 = vst [vmem:[#allocation44_spill] sm:$0xff] %v11508_v54 }
 0x213   :  { %8827 = vmatmul.mubr.msk.f32.vlgmr.msra.gmra.mrb[12].mxu1 %vm631_vm8, %v966_v56  ;;  %v1093_v56 = vld [vmem:[%s13303_s9] sm:$0x1] }
 0x2e6   :  { %v8828_v12 = vpop.f32.mrb[12].mxu1 }
 0x2e7   :  { %v1061_v13 = vsel %vm1059_vm12, %v8828_v12, 0.0  ;;  %v1037_v14 = vpop.f32.mrb[13].mxu1 }
 0x2e8   :  { %v1065_v15 = vsel %vm1064_vm11, %v1061_v13, 0.0  ;;  %v1075_v16 = vmul.f32 %v1061_v13, %v1061_v13  ;;  %v1060_v17 = vsel %vm1058_vm14, %v1037_v14, 0.0  ;;  %vm1636_vm14 = vcmask 1042432  }
 0x2e9   :  { %v1063_v18 = vsel %vm1062_vm13, %v1060_v17, 0.0  ;;  %v1074_v19 = vmul.f32 %v1060_v17, %v1060_v17  ;;  %v1125_v17 = vld [vmem:[#allocation6 + $0x48] sm:$0xff] }
 0x2ea   :  { %v1077_v20 = vsel %vm1064_vm11, %v1075_v16, 0.0  ;;  %v1066_v21 = vadd.f32 %v1065_v15, %v1063_v18  ;;  %v1124_v16 = vld [vmem:[#allocation6 + $0x40] sm:$0xff] }
 0x2eb   :  { %v1076_v22 = vsel %vm1062_vm13, %v1074_v19, 0.0  ;;  %v9924_v18 = vpack.c.bf16 %v1125_v17, %v1124_v16  ;;  %v1126_v19 = vld [vmem:[#allocation6 + $0x50] sm:$0xff] }
 0x2ec   :  { %v1067_v23 = vrot.slane %v1066_v21, 4  ;;  %v1078_v24 = vadd.f32 %v1077_v20, %v1076_v22  ;;  %v1127_v20 = vld [vmem:[#allocation6 + $0x58] sm:$0xff]  ;;  %v1709_v22 = vld [vmem:[#allocation9 + $0x10] sm:$0xff] }
 0x2ee   :  { %v1068_v25 = vadd.f32 %v1067_v23, %v1066_v21  ;;  %v1079_v26 = vrot.slane %v1078_v24, 4  ;;  %v9928_v21 = vpack.c.bf16 %v1127_v20, %v1126_v19  ;;  %v1710_v23 = vld [vmem:[#allocation9 + $0x18] sm:$0xf]  ;;  %v2053_v20 = vrot.slane %v11561_v50, 2 }
 0x2f0   :  { %v1069_v27 = vrot.slane %v1068_v25, 2  ;;  %v1080_v28 = vadd.f32 %v1079_v26, %v1078_v24  ;;  %v11520_v24 = vld [vmem:[%s13305_s25] sm:$0xff] }
 0x2f1   :  { %v1747_v26 = vrot.slane %v11520_v24, 1 }
 0x2f2   :  { %v1070_v29 = vadd.f32 %v1069_v27, %v1068_v25  ;;  %v1081_v34 = vrot.slane %v1080_v28, 2  ;;  %v11523_v25 = vld [vmem:[%s13305_s25 + $0x8] sm:$0xff] }
 0x2f3   :  { %v1748_v27 = vrot.slane %v11523_v25, 1 }
 0x2f4   :  { %v1071_v35 = vrot.slane %v1070_v29, 1  ;;  %v1082_v36 = vadd.f32 %v1081_v34, %v1080_v28  ;;  %v11530_v28 = vld [vmem:[%s13305_s25 + $0x10] sm:$0xff]  ;;  %v1708_v34 = vld [vmem:[#allocation9 + $0x8] sm:$0xf] }
 0x2f6   :  { %v1072_v37 = vadd.f32 %v1071_v35, %v1070_v29  ;;  %v1083_v38 = vrot.slane %v1082_v36, 1  ;;  %v1707_v29 = vld [vmem:[#allocation9] sm:$0xff]  ;;  %v11533_v35 = vld [vmem:[%s13305_s25 + $0x18] sm:$0xff] }
 0x2f8   :  { %v1073_v39 = vmul.f32 0.125, %v1072_v37  ;;  %v1084_v40 = vadd.f32 %v1083_v38, %v1082_v36  ;;  %v1750_v36 = vrot.slane %v11530_v28, 1  ;;  %v1749_v37 = vsel %vm313_vm4, %v1747_v26, %v1748_v27 }
 0x2f9   :  { %v9970_v38 = vpack.c.bf16 %v1708_v34, %v1707_v29 }
 0x2fa   :  { %v1085_v41 = vmul.f32 0.125, %v1084_v40  ;;  %v1086_v42 = vmul.f32 %v1073_v39, %v1073_v39  ;;  %v11541_v40 = vld [vmem:[%s13305_s25 + $0x20] sm:$0xff] }
 0x2fb   :  { %v2555_v33 = vrot.slane %v11541_v40, 5 }
 0x2fc   :  { %v1087_v44 = vsub.f32 %v1085_v41, %v1086_v42  ;;  %v11544_v41 = vld [vmem:[%s13305_s25 + $0x28] sm:$0xff]  ;;  %v1711_v42 = vld [vmem:[#allocation9 + $0x20] sm:$0xff] }
 0x2fd   :  { %v9976_v52 = vpack.c.bf16 %v1712_v43, %v1711_v42  ;;  %v2051_v17 = vrot.slane %v11544_v41, 2  ;;  %v2215_v42 = vrot.slane %v11533_v35, 3  ;;  %v1717_v43 = vld [vmem:[#allocation9 + $0x50] sm:$0xff] }
 0x2fe   :  { %v1088_v45 = vmax.f32 %v1087_v44, 0.0  ;;  %v11551_v44 = vsel %vm313_vm4, %v1748_v27, %v1750_v36 }
 0x300   :  { %v1089_v48 = vadd.f32 1e-05, %v1088_v45  ;;  %v1754_v45 = vrot.slane %v11541_v40, 1 }
 0x302   :  { %10746 = vrsqrt.f32 %v1089_v48  ;;  %v1756_v48 = vrot.slane %v11544_v41, 1 }
 0x30c   :  { %v10747_v55 = vpop.eup %10746 }
 0x30d   :  { %v1092_v31 = vmul.f32 %v10747_v55, %v1091_v53  ;;  %v11564_v53 = vld [vmem:[%s13305_s25 + $0x38] sm:$0xff] }
 0x30f   :  { %v1094_v57 = vmul.f32 %v1092_v31, %v1073_v39  ;;  %v1099_v58 = vrot.slane %v1092_v31, %v11508_v54  ;;  %v1752_v39 = vrot.slane %v11533_v35, 1  ;;  %v1758_v31 = vrot.slane %v11561_v50, 1 }
 0x311   :  { %v1095_v59 = vsub.f32 %v1093_v56, %v1094_v57  ;;  %v1100_v60 = vmul.f32 %v1099_v58, %v1037_v14  ;;  %v1101_v61 = vmul.f32 %v8828_v12, %v1099_v58  ;;  %v9920_v14 = vpack.c.bf16 %v1119_v7, %v1118_v6  ;;  %v11581_v58 = vld [vmem:[%s13305_s25 + $0x40] sm:$0xff] }
 0x312   :  { %v11557_v46 = vsel %vm313_vm4, %v1750_v36, %v1752_v39  ;;  %v11573_v55 = vsel %vm313_vm4, %v1752_v39, %v1754_v45  ;;  %v11577_v56 = vsel %vm313_vm4, %v1754_v45, %v1756_v48  ;;  %v1760_v57 = vrot.slane %v11564_v53, 1  ;;  %v1718_v45 = vld [vmem:[#allocation9 + $0x58] sm:$0xf] }
 0x313   :  { %v1106_v32 = vrot.slane %v1095_v59, %v11508_v54  ;;  %v11586_v59 = vld [vmem:[%s13305_s25 + $0x48] sm:$0xff]  ;;  %v2042_v6 = vrot.slane %v11520_v24, 2  ;;  %v2043_v7 = vrot.slane %v11523_v25, 2  ;;  %v2210_v36 = vrot.slane %v11520_v24, 3 }
 0x314   :  { %v11685_v27 = vrot.slane %v11586_v59, 2 }
 0x315   :  { %v1108_v62 = vadd.f32 %v1106_v32, %v1100_v60  ;;  %v1109_v30 = vadd.f32 %v1106_v32, %v1101_v61  ;;  %v11593_v60 = vsel %vm313_vm4, %v1756_v48, %v1758_v31  ;;  %v1762_v61 = vrot.slane %v11581_v58, 1 }
 0x316   :  { %v11597_v32 = vsel %vm313_vm4, %v1758_v31, %v1760_v57 }
 0x317   :  { %vm1110_vm10 = vcmp.gt.f32.partialorder %v1108_v62, 0.0  ;;  %vm1111_vm12 = vcmp.gt.f32.partialorder %v1109_v30, 0.0  ;;  %v1112_v63 = vmul.f32 0.2, %v1108_v62  ;;  %v1113_v3 = vmul.f32 0.2, %v1109_v30 }
 0x319   :  { %v1114_v4 = vsel %vm1110_vm10, %v1108_v62, %v1112_v63  ;;  %v1115_v5 = vsel %vm1111_vm12, %v1109_v30, %v1113_v3  ;;  %v11600_v62 = vrot.slane %v11586_v59, 1  ;;  %v11607_v30 = vsel %vm313_vm4, %v1760_v57, %v1762_v61  ;;  %v1713_v3 = vld [vmem:[#allocation9 + $0x30] sm:$0xff] }
 0x31a   :  { %v1130_v8 = vrot.slane %v1114_v4, 1  ;;  %v1131_v10 = vrot.slane %v1115_v5, 1  ;;  %v1291_v11 = vrot.slane %v1114_v4, 2  ;;  %v1292_v13 = vrot.slane %v1115_v5, 2 }
 0x31b   :  { %v11611_v63 = vsel %vm313_vm4, %v1762_v61, %v11600_v62  ;;  %v2219_v57 = vrot.slane %v11544_v41, 3  ;;  %v9994_v61 = vpack.c.bf16 %v1718_v45, %v1717_v43  ;;  %v2386_v43 = vrot.slane %v11541_v40, 4 }
 0x31c   :  { %v1132_v15 = vsel %vm313_vm4, %v1130_v8, %v1131_v10  ;;  %v1293_v12 = vsel %vm499_vm6, %v1291_v11, %v1292_v13  ;;  %v2045_v8 = vrot.slane %v11530_v28, 2  ;;  %v2047_v11 = vrot.slane %v11533_v35, 2 }
 0x31d   :  { %8837 = vmatprep.mubr.msk.f32.mxu0 %vm1062_vm13, %v1132_v15  ;;  %v1716_v15 = vld [vmem:[#allocation9 + $0x48] sm:$0xf]  ;;  %vm5194_vm10 = vcmp.lt.f32.partialorder %v11463_v49, 16.0  ;;  %vm5196_vm12 = vcmp.lt.f32.partialorder %v11468_v51, 16.0 }
 0x31e   :  { %8838 = vmatmul.mubr.msk.f32.vlgmr.msra.gmra.mrb[6].mxu0 %vm1062_vm13, %v1131_v10  ;;  %v2044_v10 = vsel %vm499_vm6, %v2042_v6, %v2043_v7  ;;  %v11654_v16 = vsel %vm499_vm6, %v2045_v8, %v2047_v11  ;;  %v2223_v6 = vrot.slane %v11564_v53, 3 }
 0x31f   :  { %9919 = vmatpush3.bf16.msra.mxu0 %v11496_v9  ;;  %8848 = vmatprep.mubr.msk.f32.mxu0 %vm1062_vm13, %v1114_v4  ;;  %v9964_v9 = vpack.c.bf16 %v1710_v23, %v1709_v22  ;;  %v1714_v4 = vld [vmem:[#allocation9 + $0x38] sm:$0xf]  ;;  %v2055_v22 = vrot.slane %v11564_v53, 2  ;;  %v11678_v23 = vsel %vm499_vm6, %v2051_v17, %v2053_v20 }
 0x320   :  { %9921 = vmatprep.subr.bf16.mxu0 %v9920_v14 }
 0x321   :  { %v11682_v26 = vsel %vm499_vm6, %v2053_v20, %v2055_v22  ;;  %v2380_v20 = vrot.slane %v11523_v25, 4 }
 0x323   :  { %9923 = vmatpush3.bf16.msra.mxu0 %v9920_v14  ;;  %v11650_v14 = vsel %vm499_vm6, %v2043_v7, %v2045_v8  ;;  %v2225_v8 = vrot.slane %v11581_v58, 3 }
 0x324   :  { %9925 = vmatprep.subr.bf16.mxu0 %v9924_v18 }
 0x326   :  { %8849 = vmatmul.mubr.msk.f32.vlgmr.msra.gmra.mrb[6].mxu0 %vm1062_vm13, %v1115_v5  ;;  %v9982_v5 = vpack.c.bf16 %v1714_v4, %v1713_v3  ;;  %v2221_v4 = vrot.slane %v11561_v50, 3 }
 0x327   :  { %9927 = vmatpush3.bf16.msra.mxu0 %v9924_v18  ;;  %8859 = vmatprep.mubr.msk.f32.mxu0 %vm1062_vm13, %v1293_v12  ;;  %v2049_v12 = vrot.slane %v11541_v40, 2 }
 0x328   :  { %9929 = vmatprep.subr.bf16.mxu0 %v9928_v21  ;;  %v11739_v7 = vsel %vm875_vm9, %v2219_v57, %v2221_v4 }
 0x329   :  { %v11664_v19 = vsel %vm499_vm6, %v2047_v11, %v2049_v12  ;;  %v2227_v11 = vrot.slane %v11586_v59, 3 }
 0x32b   :  { %9931 = vmatpush3.bf16.msra.mxu0 %v9928_v21  ;;  %v11668_v21 = vsel %vm499_vm6, %v2049_v12, %v2051_v17  ;;  %v11758_v17 = vsel %vm875_vm9, %v2225_v8, %v2227_v11 }
 0x32c   :  { %9966 = vmatprep.subr.msk.bf16.mxu0 %vm11390_vm3, %v9964_v9 }
 0x32e   :  { %8860 = vmatmul.mubr.msk.f32.vlgmr.msra.gmra.mrb[6].mxu0 %vm1062_vm13, %v1292_v13  ;;  %v1715_v13 = vld [vmem:[#allocation9 + $0x40] sm:$0xff] }
 0x32f   :  { %9969 = vmatpush3.bf16.msk.msra.mxu0 %vm11390_vm3, %v9964_v9  ;;  %8904 = vmatprep.mubr.msk.f32.mxu0 %vm319_vm5, %v1749_v37  ;;  %v9988_v18 = vpack.c.bf16 %v1716_v15, %v1715_v13  ;;  %v2057_v9 = vrot.slane %v11581_v58, 2  ;;  %v2211_v37 = vrot.slane %v11523_v25, 3  ;;  %v11747_v13 = vld [vmem:[%s13305_s25 + $0x50] sm:$0xff]  ;;  %v11754_v15 = vsel %vm875_vm9, %v2223_v6, %v2225_v8 }
 0x330   :  { %9972 = vmatprep.subr.msk.bf16.mxu0 %vm11390_vm3, %v9970_v38  ;;  %v13252_v12 = vrot.slane %v11747_v13, 3 }
 0x331   :  { %v11692_v29 = vsel %vm499_vm6, %v2055_v22, %v2057_v9  ;;  %v11696_v34 = vsel %vm499_vm6, %v2057_v9, %v11685_v27  ;;  %v2212_v39 = vsel %vm875_vm9, %v2210_v36, %v2211_v37  ;;  %v2382_v9 = vrot.slane %v11530_v28, 4 }
 0x332   :  { %8905 = vmatmul.mubr.msk.f32.vlgmr.msra.gmra.mrb[8].mxu0 %vm319_vm5, %v11551_v44  ;;  %v11769_v22 = vsel %vm875_vm9, %v2227_v11, %v13252_v12  ;;  %v2392_v11 = vrot.slane %v11564_v53, 4 }
 0x333   :  { %9975 = vmatpush3.bf16.msk.msra.mxu0 %vm11390_vm3, %v9970_v38  ;;  %8907 = vmatprep.mubr.msk.f32.mxu0 %vm319_vm5, %v11557_v46  ;;  %v2213_v38 = vrot.slane %v11530_v28, 3 }
 0x334   :  { %9978 = vmatprep.subr.msk.bf16.mxu0 %vm11390_vm3, %v9976_v52 }
 0x335   :  { %v11711_v48 = vsel %vm875_vm9, %v2211_v37, %v2213_v38  ;;  %v11715_v31 = vsel %vm875_vm9, %v2213_v38, %v2215_v42  ;;  %v2384_v37 = vrot.slane %v11533_v35, 4  ;;  %v1719_v38 = vld [vmem:[#allocation9 + $0x60] sm:$0xff] }
 0x336   :  { %8908 = vmatmul.mubr.msk.f32.gmra.mrb[10].mxu0 %vm319_vm5, %v11573_v55 }
 0x337   :  { %8910 = vmatprep.mubr.msk.f32.mxu0 %vm319_vm5, %v11577_v56  ;;  %v11782_v45 = vsel %vm326_vm1, %v2382_v9, %v2384_v37 }
 0x33a   :  { %8911 = vmatmul.mubr.msk.f32.gmra.mrb[12].mxu0 %vm319_vm5, %v11593_v60 }
 0x33b   :  { %8913 = vmatprep.mubr.msk.f32.mxu0 %vm319_vm5, %v11597_v32 }
 0x33e   :  { %8914 = vmatmul.mubr.msk.f32.gmra.mrb[14].mxu0 %vm319_vm5, %v11607_v30 }
 0x33f   :  { %8916 = vmatprep.mubr.msk.f32.mxu0 %vm319_vm5, %v11611_v63 }
 0x342   :  { %8917 = vmatmul.mubr.msk.f32.gmra.mrb[16].mxu0 %vm319_vm5, %v11600_v62 }
 0x343   :  { %8923 = vmatprep.mubr.msk.f32.mxu0 %vm319_vm5, %v11520_v24 }
 0x346   :  { %8924 = vmatmul.mubr.msk.f32.vlgmr.msra.gmra.mrb[8].mxu0 %vm319_vm5, %v11523_v25 }
 0x347   :  { %9981 = vmatpush3.bf16.msk.msra.mxu0 %vm11390_vm3, %v9976_v52  ;;  %8926 = vmatprep.mubr.msk.f32.mxu0 %vm319_vm5, %v11530_v28  ;;  %v2217_v52 = vrot.slane %v11541_v40, 3 }
 0x348   :  { %9984 = vmatprep.subr.msk.bf16.mxu0 %vm11390_vm3, %v9982_v5 }
 0x349   :  { %v11725_v3 = vsel %vm875_vm9, %v2215_v42, %v2217_v52  ;;  %v11778_v42 = vsel %vm326_vm1, %v2380_v20, %v2382_v9  ;;  %v2396_v9 = vrot.slane %v11586_v59, 4 }
 0x34a   :  { %8927 = vmatmul.mubr.msk.f32.gmra.mrb[10].mxu0 %vm319_vm5, %v11533_v35 }
 0x34b   :  { %8929 = vmatprep.mubr.msk.f32.mxu0 %vm319_vm5, %v11541_v40 }
 0x34e   :  { %8930 = vmatmul.mubr.msk.f32.gmra.mrb[12].mxu0 %vm319_vm5, %v11544_v41 }
 0x34f   :  { %8932 = vmatprep.mubr.msk.f32.mxu0 %vm319_vm5, %v11561_v50 }
 0x352   :  { %8933 = vmatmul.mubr.msk.f32.gmra.mrb[14].mxu0 %vm319_vm5, %v11564_v53 }
 0x353   :  { %8935 = vmatprep.mubr.msk.f32.mxu0 %vm319_vm5, %v11581_v58 }
 0x356   :  { %8936 = vmatmul.mubr.msk.f32.gmra.mrb[16].mxu0 %vm319_vm5, %v11586_v59 }
 0x357   :  { %8942 = vmatprep.mubr.msk.f32.mxu0 %vm319_vm5, %v2044_v10  ;;  %v11743_v10 = vsel %vm875_vm9, %v2221_v4, %v2223_v6  ;;  %v11792_v4 = vsel %vm326_vm1, %v2384_v37, %v2386_v43  ;;  %v2390_v6 = vrot.slane %v11561_v50, 4  ;;  %v13255_v37 = vrot.slane %v11747_v13, 4 }
 0x35a   :  { %8943 = vmatmul.mubr.msk.f32.vlgmr.msra.gmra.mrb[8].mxu0 %vm319_vm5, %v11650_v14 }
 0x35b   :  { %9987 = vmatpush3.bf16.msk.msra.mxu0 %vm11390_vm3, %v9982_v5  ;;  %8945 = vmatprep.mubr.msk.f32.mxu0 %vm319_vm5, %v11654_v16  ;;  %v11729_v5 = vsel %vm875_vm9, %v2217_v52, %v2219_v57  ;;  %v2388_v52 = vrot.slane %v11544_v41, 4 }
 0x35c   :  { %9990 = vmatprep.subr.msk.bf16.mxu0 %vm11390_vm3, %v9988_v18 }
 0x35d   :  { %v11796_v8 = vsel %vm326_vm1, %v2386_v43, %v2388_v52  ;;  %v2549_v43 = vrot.slane %v11523_v25, 5 }
 0x35e   :  { %8946 = vmatmul.mubr.msk.f32.gmra.mrb[10].mxu0 %vm319_vm5, %v11664_v19 }
 0x35f   :  { %8948 = vmatprep.mubr.msk.f32.mxu0 %vm319_vm5, %v11668_v21 }
 0x362   :  { %8949 = vmatmul.mubr.msk.f32.gmra.mrb[12].mxu0 %vm319_vm5, %v11678_v23 }
 0x363   :  { %8951 = vmatprep.mubr.msk.f32.mxu0 %vm319_vm5, %v11682_v26 }
 0x366   :  { %8952 = vmatmul.mubr.msk.f32.gmra.mrb[14].mxu0 %vm319_vm5, %v11692_v29 }
 0x367   :  { %8954 = vmatprep.mubr.msk.f32.mxu0 %vm319_vm5, %v11696_v34 }
 0x36a   :  { %8955 = vmatmul.mubr.msk.f32.gmra.mrb[16].mxu0 %vm319_vm5, %v11685_v27 }
 0x36b   :  { %8961 = vmatprep.mubr.msk.f32.mxu0 %vm319_vm5, %v2212_v39  ;;  %v1720_v39 = vld [vmem:[#allocation9 + $0x68] sm:$0xf] }
 0x36c   :  { %v10000_v57 = vpack.c.bf16 %v1720_v39, %v1719_v38  ;;  %v2548_v39 = vrot.slane %v11520_v24, 5 }
 0x36e   :  { %8962 = vmatmul.mubr.msk.f32.vlgmr.msra.gmra.mrb[8].mxu0 %vm319_vm5, %v11711_v48 }
 0x36f   :  { %9993 = vmatpush3.bf16.msk.msra.mxu0 %vm11390_vm3, %v9988_v18  ;;  %8964 = vmatprep.mubr.msk.f32.mxu0 %vm319_vm5, %v11715_v31  ;;  %v2379_v18 = vrot.slane %v11520_v24, 4 }
 0x370   :  { %9996 = vmatprep.subr.msk.bf16.mxu0 %vm11390_vm3, %v9994_v61 }
 0x371   :  { %v2381_v36 = vsel %vm326_vm1, %v2379_v18, %v2380_v20  ;;  %v2394_v18 = vrot.slane %v11581_v58, 4  ;;  %v11810_v20 = vsel %vm326_vm1, %v2390_v6, %v2392_v11 }
 0x372   :  { %8965 = vmatmul.mubr.msk.f32.gmra.mrb[10].mxu0 %vm319_vm5, %v11725_v3  ;;  %13306 = vst [vmem:[#allocation45_spill] sm:$0xff] %v11810_v20 }
 0x373   :  { %8967 = vmatprep.mubr.msk.f32.mxu0 %vm319_vm5, %v11729_v5  ;;  %v11822_v38 = vsel %vm326_vm1, %v2394_v18, %v2396_v9 }
 0x374   :  { %13308 = vst [vmem:[#allocation47_spill] sm:$0xff] %v11822_v38 }
 0x376   :  { %8968 = vmatmul.mubr.msk.f32.gmra.mrb[12].mxu0 %vm319_vm5, %v11739_v7 }
 0x377   :  { %8970 = vmatprep.mubr.msk.f32.mxu0 %vm319_vm5, %v11743_v10 }
 0x37a   :  { %8971 = vmatmul.mubr.msk.f32.gmra.mrb[14].mxu0 %vm319_vm5, %v11754_v15 }
 0x37b   :  { %8973 = vmatprep.mubr.msk.f32.mxu0 %vm319_vm5, %v11758_v17 }
 0x37e   :  { %8974 = vmatmul.mubr.msk.f32.gmra.mrb[16].mxu0 %vm319_vm5, %v11769_v22 }
 0x37f   :  { %8980 = vmatprep.mubr.msk.f32.mxu0 %vm319_vm5, %v2381_v36  ;;  %v11818_v36 = vsel %vm326_vm1, %v2392_v11, %v2394_v18  ;;  %v2550_v11 = vsel %vm1636_vm14, %v2548_v39, %v2549_v43  ;;  %v2553_v18 = vrot.slane %v11533_v35, 5  ;;  %v10006_v39 = vpack.c.bf16 %v1722_v0, %v1721_v1 }
 0x380   :  { %13307 = vst [vmem:[#allocation46_spill] sm:$0xff] %v11818_v36  ;;  %v2563_v1 = vrot.slane %v11581_v58, 5 }
 0x382   :  { %8981 = vmatmul.mubr.msk.f32.vlgmr.msra.gmra.mrb[8].mxu0 %vm319_vm5, %v11778_v42 }
 0x383   :  { %9999 = vmatpush3.bf16.msk.msra.mxu0 %vm11390_vm3, %v9994_v61  ;;  %8983 = vmatprep.mubr.msk.f32.mxu0 %vm319_vm5, %v11782_v45  ;;  %v11806_v61 = vsel %vm326_vm1, %v2388_v52, %v2390_v6  ;;  %v11833_v52 = vsel %vm326_vm1, %v2396_v9, %v13255_v37  ;;  %v2551_v6 = vrot.slane %v11530_v28, 5  ;;  %v2557_v37 = vrot.slane %v11544_v41, 5 }
 0x384   :  { %10002 = vmatprep.subr.msk.bf16.mxu0 %vm11390_vm3, %v10000_v57  ;;  %13309 = vst [vmem:[#allocation48_spill] sm:$0xff] %v11833_v52 }
 0x385   :  { %v11842_v12 = vsel %vm1636_vm14, %v2549_v43, %v2551_v6  ;;  %v11846_v9 = vsel %vm1636_vm14, %v2551_v6, %v2553_v18  ;;  %v11856_v43 = vsel %vm1636_vm14, %v2553_v18, %v2555_v33  ;;  %v11860_v6 = vsel %vm1636_vm14, %v2555_v33, %v2557_v37 }
 0x386   :  { %8984 = vmatmul.mubr.msk.f32.gmra.mrb[10].mxu0 %vm319_vm5, %v11792_v4  ;;  %13310 = vst [vmem:[#allocation49_spill] sm:$0xff] %v11842_v12  ;;  %13311 = vst [vmem:[#allocation50_spill] sm:$0xff] %v11846_v9  ;;  %v2565_v33 = vrot.slane %v11586_v59, 5 }
 0x387   :  { %8986 = vmatprep.mubr.msk.f32.mxu0 %vm319_vm5, %v11796_v8  ;;  %13312 = vst [vmem:[#allocation51_spill] sm:$0xff] %v11856_v43  ;;  %13313 = vst [vmem:[#allocation52_spill] sm:$0xff] %v11860_v6 }
 0x38a   :  { %8987 = vmatmul.mubr.msk.f32.gmra.mrb[12].mxu0 %vm319_vm5, %v11806_v61 }
 0x38b   :  { %8989 = vmatprep.mubr.msk.f32.mxu0 %vm319_vm5, %v11810_v20 }
 0x38e   :  { %8990 = vmatmul.mubr.msk.f32.gmra.mrb[14].mxu0 %vm319_vm5, %v11818_v36  ;;  %v1451_v36 = vld [vmem:[#allocation7 + $0x40] sm:$0xff] }
 0x38f   :  { %8992 = vmatprep.mubr.msk.f32.mxu0 %vm319_vm5, %v11822_v38  ;;  %v13339_v2 = vld [vmem:[#allocation52_spill] sm:$0xff] }
 0x392   :  { %8993 = vmatmul.mubr.msk.f32.gmra.mrb[16].mxu0 %vm319_vm5, %v11833_v52  ;;  %v2561_v52 = vrot.slane %v11564_v53, 5 }
 0x393   :  { %8999 = vmatprep.mubr.msk.f32.mxu0 %vm319_vm5, %v2550_v11  ;;  %v2559_v11 = vrot.slane %v11561_v50, 5 }
 0x394   :  { %v11882_v18 = vsel %vm1636_vm14, %v2561_v52, %v2563_v1 }
 0x395   :  { %v11870_v0 = vsel %vm1636_vm14, %v2557_v37, %v2559_v11  ;;  %13316 = vst [vmem:[#allocation55_spill] sm:$0xff] %v11882_v18  ;;  %v11886_v37 = vsel %vm1636_vm14, %v2563_v1, %v2565_v33 }
 0x396   :  { %9000 = vmatmul.mubr.msk.f32.vlgmr.msra.gmra.mrb[8].mxu0 %vm319_vm5, %v11842_v12  ;;  %13314 = vst [vmem:[#allocation53_spill] sm:$0xff] %v11870_v0  ;;  %13317 = vst [vmem:[#allocation56_spill] sm:$0xff] %v11886_v37  ;;  %v13319_v12 = vmov 0  }
 0x397   :  { %10005 = vmatpush3.bf16.msk.msra.mxu0 %vm11390_vm3, %v10000_v57  ;;  %9002 = vmatprep.mubr.msk.f32.mxu0 %vm319_vm5, %v11846_v9  ;;  %v11874_v57 = vsel %vm1636_vm14, %v2559_v11, %v2561_v52  ;;  %v2719_v11 = vrot.slane %v11523_v25, 6  ;;  %v1723_v9 = vld [vmem:[#allocation9 + $0x80] sm:$0xff]  ;;  %v5200_v38 = vsel %vm5192_vm7, 1, %v13319_v12 }
 0x398   :  { %10008 = vmatprep.subr.msk.bf16.mxu0 %vm11390_vm3, %v10006_v39  ;;  %13315 = vst [vmem:[#allocation54_spill] sm:$0xff] %v11874_v57  ;;  %5211 = vperm.xlu1 %10745, %v5200_v38   ;;  %v2727_v38 = vrot.slane %v11544_v41, 6 }
 0x39a   :  { %9003 = vmatmul.mubr.msk.f32.gmra.mrb[10].mxu0 %vm319_vm5, %v11856_v43  ;;  %v2718_v43 = vrot.slane %v11520_v24, 6 }
 0x39b   :  { %9005 = vmatprep.mubr.msk.f32.mxu0 %vm319_vm5, %v11860_v6  ;;  %v13267_v6 = vrot.slane %v11747_v13, 5 }
 0x39c   :  { %v2720_v1 = vsel %vm2717_vm15, %v2718_v43, %v2719_v11  ;;  %v2725_v43 = vrot.slane %v11541_v40, 6 }
 0x39d   :  { %v11897_v52 = vsel %vm1636_vm14, %v2565_v33, %v13267_v6 }
 0x39e   :  { %9006 = vmatmul.mubr.msk.f32.gmra.mrb[12].mxu0 %vm319_vm5, %v11870_v0  ;;  %13318 = vst [vmem:[#allocation57_spill] sm:$0xff] %v11897_v52  ;;  %v2723_v0 = vrot.slane %v11533_v35, 6 }
 0x39f   :  { %9008 = vmatprep.mubr.msk.f32.mxu0 %vm319_vm5, %v11874_v57  ;;  %v2721_v57 = vrot.slane %v11530_v28, 6 }
 0x3a1   :  { %v11908_v6 = vsel %vm2717_vm15, %v2719_v11, %v2721_v57  ;;  %v11913_v20 = vsel %vm2717_vm15, %v2721_v57, %v2723_v0  ;;  %v2729_v57 = vrot.slane %v11561_v50, 6 }
 0x3a2   :  { %9009 = vmatmul.mubr.msk.f32.gmra.mrb[14].mxu0 %vm319_vm5, %v11882_v18  ;;  %v1724_v18 = vld [vmem:[#allocation9 + $0x88] sm:$0xf]  ;;  %13320 = vst [vmem:[#allocation58_spill] sm:$0xff] %v11913_v20 }
 0x3a3   :  { %9011 = vmatprep.mubr.msk.f32.mxu0 %vm319_vm5, %v11886_v37  ;;  %v1452_v37 = vld [vmem:[#allocation7 + $0x48] sm:$0xff]  ;;  %v11916_v54 = vpack.c.bf16 %v1724_v18, %v1723_v9  ;;  %v11926_v9 = vsel %vm2717_vm15, %v2723_v0, %v2725_v43  ;;  %v11931_v18 = vsel %vm2717_vm15, %v2725_v43, %v2727_v38  ;;  %v1455_v0 = vld [vmem:[#allocation7 + $0x60] sm:$0xff]  ;;  %v11944_v43 = vsel %vm2717_vm15, %v2727_v38, %v2729_v57 }
 0x3a4   :  { %v9932_v33 = vpack.c.bf16 %v1452_v37, %v1451_v36  ;;  %v1453_v36 = vld [vmem:[#allocation7 + $0x50] sm:$0xff]  ;;  %v1454_v37 = vld [vmem:[#allocation7 + $0x58] sm:$0xff]  ;;  %13321 = vst [vmem:[#allocation59_spill] sm:$0xff] %v11931_v18 }
 0x3a5   :  { %v9936_v11 = vpack.c.bf16 %v1454_v37, %v1453_v36  ;;  %v1706_v36 = vld [vmem:[%s11103_s17 + $0x38] sm:$0xff]  ;;  %v2733_v37 = vrot.slane %v11581_v58, 6 }
 0x3a6   :  { %9012 = vmatmul.mubr.msk.f32.gmra.mrb[16].mxu0 %vm319_vm5, %v11897_v52  ;;  %9933 = vmatprep.subr.bf16.mxu1 %v9932_v33  ;;  %v5202_v52 = vsel %vm5194_vm10, 1, %v13319_v12  ;;  %vm5198_vm7 = vcmp.lt.f32.partialorder %v1706_v36, 16.0  ;;  %vm6010_vm10 = vcmp.lt.f32.partialorder %v11458_v47, 8.0  ;;  %v13325_v47 = vrot.slane %v11747_v13, 6 }
 0x3a7   :  { %9018 = vmatprep.mubr.msk.f32.mxu0 %vm319_vm5, %v2720_v1  ;;  %5217 = vperm.xlu1 %10745, %v5202_v52   ;;  %v2731_v52 = vrot.slane %v11564_v53, 6  ;;  %v1456_v1 = vld [vmem:[#allocation7 + $0x68] sm:$0xff] }
 0x3a8   :  { %9935 = vmatpush3.bf16.msra.mxu1 %v9932_v33  ;;  %v9940_v33 = vpack.c.bf16 %v1456_v1, %v1455_v0  ;;  %v1457_v0 = vld [vmem:[#allocation7 + $0x70] sm:$0xff]  ;;  %v1458_v1 = vld [vmem:[#allocation7 + $0x78] sm:$0xff] }
 0x3a9   :  { %9937 = vmatprep.subr.bf16.mxu1 %v9936_v11  ;;  %v9944_v38 = vpack.c.bf16 %v1458_v1, %v1457_v0  ;;  %v11957_v36 = vsel %vm2717_vm15, %v2731_v52, %v2733_v37  ;;  %v6017_v0 = vsel %vm6010_vm10, 1, %v13319_v12  ;;  %v1443_v1 = vld [vmem:[#allocation7] sm:$0xff]  ;;  %vm6014_vm10 = vcmp.lt.f32.partialorder %v11468_v51, 8.0 }
 0x3aa   :  { %9019 = vmatmul.mubr.msk.f32.vlgmr.msra.gmra.mrb[8].mxu0 %vm319_vm5, %v11908_v6  ;;  %13323 = vst [vmem:[#allocation61_spill] sm:$0xff] %v11957_v36  ;;  %v2899_v51 = vrot.slane %v11561_v50, 7 }
 0x3ab   :  { %10011 = vmatpush3.bf16.msk.msra.mxu0 %vm11390_vm3, %v10006_v39  ;;  %9021 = vmatprep.mubr.msk.f32.mxu0 %vm319_vm5, %v11913_v20  ;;  %v5204_v39 = vsel %vm5196_vm12, 1, %v13319_v12  ;;  %v11948_v20 = vsel %vm2717_vm15, %v2729_v57, %v2731_v52  ;;  %vm2887_vm12 = vcmask 1040384   ;;  %v1444_v52 = vld [vmem:[#allocation7 + $0x8] sm:$0xff] }
 0x3ac   :  { %10014 = vmatprep.subr.msk.bf16.mxu0 %vm11390_vm3, %v11916_v54  ;;  %5223 = vperm.xlu1 %10745, %v5204_v39   ;;  %13322 = vst [vmem:[#allocation60_spill] sm:$0xff] %v11948_v20  ;;  %v5206_v39 = vsel %vm5198_vm7, 1, %v13319_v12  ;;  %v11969_v57 = vpack.c.bf16 %v1444_v52, %v1443_v1  ;;  %vm6012_vm7 = vcmp.lt.f32.partialorder %v11463_v49, 8.0  ;;  %v1725_v52 = vld [vmem:[#allocation9 + $0x90] sm:$0xff]  ;;  %v2895_v49 = vrot.slane %v11541_v40, 7 }
 0x3ad   :  { %9939 = vmatpush3.bf16.msra.mxu1 %v9936_v11  ;;  %v2735_v11 = vrot.slane %v11586_v59, 6  ;;  %v6019_v1 = vsel %vm6012_vm7, 1, %v13319_v12 }
 0x3ae   :  { %9022 = vmatmul.mubr.msk.f32.gmra.mrb[10].mxu0 %vm319_vm5, %v11926_v9  ;;  %9941 = vmatprep.subr.bf16.mxu1 %v9940_v33 }
 0x3af   :  { %9024 = vmatprep.mubr.msk.f32.mxu0 %vm319_vm5, %v11931_v18  ;;  %v11962_v18 = vsel %vm2717_vm15, %v2733_v37, %v2735_v11  ;;  %v2891_v37 = vrot.slane %v11530_v28, 7 }
 0x3b0   :  { %5229 = vperm.xlu1 %10745, %v5206_v39   ;;  %13324 = vst [vmem:[#allocation62_spill] sm:$0xff] %v11962_v18  ;;  %v2889_v39 = vrot.slane %v11523_v25, 7 }
 0x3b1   :  { %9943 = vmatpush3.bf16.msra.mxu1 %v9940_v33  ;;  %v2888_v33 = vrot.slane %v11520_v24, 7  ;;  %v11976_v24 = vsel %vm2717_vm15, %v2735_v11, %v13325_v47  ;;  %v2897_v47 = vrot.slane %v11544_v41, 7 }
 0x3b2   :  { %9025 = vmatmul.mubr.msk.f32.gmra.mrb[12].mxu0 %vm319_vm5, %v11944_v43  ;;  %9945 = vmatprep.subr.bf16.mxu1 %v9944_v38  ;;  %v2892_v11 = vsel %vm2887_vm12, %v2889_v39, %v2891_v37 }
 0x3b3   :  { %9027 = vmatprep.mubr.msk.f32.mxu0 %vm319_vm5, %v11948_v20  ;;  %v6021_v20 = vsel %vm6014_vm10, 1, %v13319_v12 }
 0x3b4   :  { %6027 = vperm.xlu1 %10745, %v6017_v0   ;;  %v2893_v0 = vrot.slane %v11533_v35, 7 }
 0x3b5   :  { %9947 = vmatpush3.bf16.msra.mxu1 %v9944_v38  ;;  %v2890_v38 = vsel %vm2887_vm12, %v2888_v33, %v2889_v39 }
 0x3b6   :  { %9028 = vmatmul.mubr.msk.f32.gmra.mrb[14].mxu0 %vm319_vm5, %v11957_v36  ;;  %9949 = vmatprep.subr.bf16.mxu1 %v11969_v57  ;;  %v1726_v36 = vld [vmem:[#allocation9 + $0x98] sm:$0xf]  ;;  %v2894_v33 = vsel %vm2887_vm12, %v2891_v37, %v2893_v0  ;;  %v2896_v39 = vsel %vm2887_vm12, %v2893_v0, %v2895_v49  ;;  %v10764_v37 = vld [vmem:[%s11103_s17] sm:$0xff]  ;;  %v2903_v0 = vrot.slane %v11581_v58, 7 }
 0x3b7   :  { %9030 = vmatprep.mubr.msk.f32.mxu0 %vm319_vm5, %v11962_v18  ;;  %v10018_v18 = vpack.c.bf16 %v1726_v36, %v1725_v52  ;;  %vm6567_vm7 = vcmp.lt.f32.partialorder %v10764_v37, 4.0  ;;  %v2898_v36 = vsel %vm2887_vm12, %v2895_v49, %v2897_v47  ;;  %v10766_v37 = vld [vmem:[%s11103_s17 + $0x20] sm:$0xff] }
 0x3b8   :  { %6033 = vperm.xlu1 %10745, %v6019_v1   ;;  %v10765_v1 = vld [vmem:[%s11103_s17 + $0x10] sm:$0xff] }
 0x3b9   :  { %vm6569_vm10 = vcmp.lt.f32.partialorder %v10765_v1, 4.0  ;;  %v1728_v1 = vld [vmem:[#allocation9 + $0xa8] sm:$0xf] }
 0x3ba   :  { %9031 = vmatmul.mubr.msk.f32.gmra.mrb[16].mxu0 %vm319_vm5, %v11976_v24  ;;  %v6576_v49 = vsel %vm6569_vm10, 1, %v13319_v12 }
 0x3bb   :  { %9037 = vmatprep.mubr.msk.f32.mxu0 %vm319_vm5, %v2890_v38  ;;  %v2901_v38 = vrot.slane %v11564_v53, 7 }
 0x3bc   :  { %6039 = vperm.xlu1 %10745, %v6021_v20   ;;  %v6574_v20 = vsel %vm6567_vm7, 1, %v13319_v12  ;;  %vm6571_vm7 = vcmp.lt.f32.partialorder %v10766_v37, 4.0 }
 0x3bd   :  { %v2902_v52 = vsel %vm2887_vm12, %v2899_v51, %v2901_v38 }
 0x3be   :  { %9038 = vmatmul.mubr.msk.f32.vlgmr.msra.gmra.mrb[8].mxu0 %vm319_vm5, %v2892_v11  ;;  %v2905_v11 = vrot.slane %v11586_v59, 7 }
 0x3bf   :  { %10017 = vmatpush3.bf16.msk.msra.mxu0 %vm11390_vm3, %v11916_v54  ;;  %9040 = vmatprep.mubr.msk.f32.mxu0 %vm319_vm5, %v2894_v33  ;;  %v2900_v54 = vsel %vm2887_vm12, %v2897_v47, %v2899_v51  ;;  %v2904_v33 = vsel %vm2887_vm12, %v2901_v38, %v2903_v0  ;;  %v2907_v47 = vrot.slane %v11747_v13, 7  ;;  %v6578_v51 = vsel %vm6571_vm7, 1, %v13319_v12 }
 0x3c0   :  { %10020 = vmatprep.subr.msk.bf16.mxu0 %vm11390_vm3, %v10018_v18  ;;  %6582 = vperm.xlu1 %10745, %v6574_v20   ;;  %v10767_v20 = vld [vmem:[%s11103_s17 + $0x30] sm:$0xff] }
 0x3c1   :  { %vm6573_vm10 = vcmp.lt.f32.partialorder %v10767_v20, 4.0  ;;  %v1734_v20 = vld [vmem:[#allocation9 + $0xd8] sm:$0xf] }
 0x3c2   :  { %9041 = vmatmul.mubr.msk.f32.gmra.mrb[10].mxu0 %vm319_vm5, %v2896_v39  ;;  %v2906_v39 = vsel %vm2887_vm12, %v2903_v0, %v2905_v11  ;;  %v6580_v38 = vsel %vm6573_vm10, 1, %v13319_v12  ;;  %v10768_v0 = vld [vmem:[%s11103_s17 + $0x8] sm:$0xff] }
 0x3c3   :  { %9043 = vmatprep.mubr.msk.f32.mxu0 %vm319_vm5, %v2898_v36  ;;  %v2908_v36 = vsel %vm2887_vm12, %v2905_v11, %v2907_v47  ;;  %vm7225_vm7 = vcmp.lt.f32.partialorder %v10768_v0, 1.0  ;;  %v10769_v11 = vld [vmem:[%s11098_s13 + $0x8] sm:$0xff]  ;;  %s13326_s13 = sld [smem:[#allocation28_spill]] }
 0x3c4   :  { %6588 = vperm.xlu1 %10745, %v6576_v49   ;;  %v7231_v49 = vsel %vm7225_vm7, 1, %v13319_v12  ;;  %vm1623_vm12 = vcmp.lt.f32.partialorder %v10769_v11, 1.0 }
 0x3c6   :  { %9044 = vmatmul.mubr.msk.f32.gmra.mrb[12].mxu0 %vm319_vm5, %v2900_v54  ;;  %v1727_v54 = vld [vmem:[#allocation9 + $0xa0] sm:$0xff] }
 0x3c7   :  { %9046 = vmatprep.mubr.msk.f32.mxu0 %vm319_vm5, %v2902_v52  ;;  %v10024_v52 = vpack.c.bf16 %v1728_v1, %v1727_v54 }
 0x3c8   :  { %6594 = vperm.xlu1 %10745, %v6578_v51  }
 0x3ca   :  { %9047 = vmatmul.mubr.msk.f32.gmra.mrb[14].mxu0 %vm319_vm5, %v2904_v33 }
 0x3cb   :  { %9049 = vmatprep.mubr.msk.f32.mxu0 %vm319_vm5, %v2906_v39 }
 0x3cc   :  { %6600 = vperm.xlu1 %10745, %v6580_v38  }
 0x3ce   :  { %9050 = vmatmul.mubr.msk.f32.gmra.mrb[16].mxu0 %vm319_vm5, %v2908_v36 }
 0x3cf   :  { %9056 = vmatprep.mubr.msk.f32.mxu0 %vm319_vm5, %v11523_v25  ;;  %v1625_v25 = vsel %vm1623_vm12, 1, %v13319_v12 }
 0x3d0   :  { %7240 = vperm.xlu1 %10745, %v7231_v49  }
 0x3d2   :  { %9057 = vmatmul.mubr.msk.f32.vlgmr.msra.gmra.mrb[8].mxu0 %vm319_vm5, %v11530_v28  ;;  %v10770_v28 = vld [vmem:[%s11103_s17 + $0x18] sm:$0xff] }
 0x3d3   :  { %10023 = vmatpush3.bf16.msk.msra.mxu0 %vm11390_vm3, %v10018_v18  ;;  %9059 = vmatprep.mubr.msk.f32.mxu0 %vm319_vm5, %v11533_v35  ;;  %vm7227_vm10 = vcmp.lt.f32.partialorder %v10770_v28, 1.0  ;;  %v10771_v35 = vld [vmem:[%s11103_s17 + $0x28] sm:$0xff]  ;;  %s13328_s17 = sld [smem:[#allocation29_spill]] }
 0x3d4   :  { %10026 = vmatprep.subr.msk.bf16.mxu0 %vm11390_vm3, %v10024_v52  ;;  %1630 = vperm.xlu1 %10745, %v1625_v25   ;;  %v7233_v18 = vsel %vm7227_vm10, 1, %v13319_v12  ;;  %vm7229_vm7 = vcmp.lt.f32.partialorder %v10771_v35, 1.0 }
 0x3d5   :  { %v7235_v33 = vsel %vm7229_vm7, 1, %v13319_v12  ;;  %vm1391_vm7 = vcmask 519168  }
 0x3d6   :  { %9060 = vmatmul.mubr.msk.f32.gmra.mrb[10].mxu0 %vm319_vm5, %v11541_v40  ;;  %v1729_v40 = vld [vmem:[#allocation9 + $0xb0] sm:$0xff] }
 0x3d7   :  { %9062 = vmatprep.mubr.msk.f32.mxu0 %vm319_vm5, %v11544_v41  ;;  %v1730_v41 = vld [vmem:[#allocation9 + $0xb8] sm:$0xf] }
 0x3d8   :  { %7246 = vperm.xlu1 %10745, %v7233_v18  }
 0x3da   :  { %9063 = vmatmul.mubr.msk.f32.gmra.mrb[12].mxu0 %vm319_vm5, %v11561_v50  ;;  %v10030_v50 = vpack.c.bf16 %v1730_v41, %v1729_v40  ;;  %v1736_v41 = vld [vmem:[#allocation9 + $0xe8] sm:$0xf] }
 0x3db   :  { %9065 = vmatprep.mubr.msk.f32.mxu0 %vm319_vm5, %v11564_v53  ;;  %v1731_v53 = vld [vmem:[#allocation9 + $0xc0] sm:$0xff] }
 0x3dc   :  { %7252 = vperm.xlu1 %10745, %v7235_v33  }
 0x3de   :  { %9066 = vmatmul.mubr.msk.f32.gmra.mrb[14].mxu0 %vm319_vm5, %v11581_v58 }
 0x3df   :  { %9068 = vmatprep.mubr.msk.f32.mxu0 %vm319_vm5, %v11586_v59 }
 0x3e2   :  { %9069 = vmatmul.mubr.msk.f32.gmra.mrb[16].mxu0 %vm319_vm5, %v11747_v13 }
 0x3e3   :  { %9075 = vmatprep.mubr.msk.f32.mxu0 %vm319_vm5, %v11551_v44  ;;  %v3187_v44 = vrot.slane %v11747_v13, 1 }
 0x3e6   :  { %9076 = vmatmul.mubr.msk.f32.vlgmr.msra.gmra.mrb[8].mxu0 %vm319_vm5, %v11557_v46  ;;  %v3188_v46 = vsel %vm313_vm4, %v11600_v62, %v3187_v44 }
 0x3e7   :  { %10029 = vmatpush3.bf16.msk.msra.mxu0 %vm11390_vm3, %v10024_v52  ;;  %9078 = vmatprep.mubr.msk.f32.mxu0 %vm319_vm5, %v11573_v55  ;;  %v1732_v55 = vld [vmem:[#allocation9 + $0xc8] sm:$0xf] }
 0x3e8   :  { %10032 = vmatprep.subr.msk.bf16.mxu0 %vm11390_vm3, %v10030_v50  ;;  %v10036_v58 = vpack.c.bf16 %v1732_v55, %v1731_v53  ;;  %v13330_v53 = vld [vmem:[#allocation45_spill] sm:$0xff] }
 0x3ea   :  { %9079 = vmatmul.mubr.msk.f32.gmra.mrb[10].mxu0 %vm319_vm5, %v11577_v56  ;;  %v1381_v56 = vpop.permute.xlu1 %1380 }
 0x3eb   :  { %9081 = vmatprep.mubr.msk.f32.mxu0 %vm319_vm5, %v11593_v60  ;;  %vm1385_vm10 = vcmp.eq.s32.totalorder %v1381_v56, 1  ;;  %v3321_v60 = vrot.slane %v11747_v13, 2 }
 0x3ee   :  { %9082 = vmatmul.mubr.msk.f32.gmra.mrb[12].mxu0 %vm319_vm5, %v11597_v32  ;;  %v1384_v59 = vpop.permute.xlu1 %1383 }
 0x3ef   :  { %9084 = vmatprep.mubr.msk.f32.mxu0 %vm319_vm5, %v11607_v30  ;;  %vm1386_vm12 = vcmp.eq.s32.totalorder %v1384_v59, 1  ;;  %v13332_v59 = vld [vmem:[#allocation47_spill] sm:$0xff] }
 0x3f2   :  { %9085 = vmatmul.mubr.msk.f32.gmra.mrb[14].mxu0 %vm319_vm5, %v11611_v63 }
 0x3f3   :  { %9087 = vmatprep.mubr.msk.f32.mxu0 %vm319_vm5, %v3188_v46 }
 0x3f6   :  { %9088 = vmatmul.mubr.msk.f32.gmra.mrb[16].mxu0 %vm319_vm5, %v3187_v44  ;;  %v13329_v44 = vld [vmem:[#allocation44_spill] sm:$0xff] }
 0x3f7   :  { %9094 = vmatprep.mubr.msk.f32.mxu0 %vm319_vm5, %v11650_v14 }
 0x3fa   :  { %9095 = vmatmul.mubr.msk.f32.vlgmr.msra.gmra.mrb[8].mxu0 %vm319_vm5, %v11654_v16 }
 0x3fb   :  { %10035 = vmatpush3.bf16.msk.msra.mxu0 %vm11390_vm3, %v10030_v50  ;;  %9097 = vmatprep.mubr.msk.f32.mxu0 %vm319_vm5, %v11664_v19  ;;  %v1420_v50 = vld [vmem:[%s13328_s17] sm:$0x1] }
 0x3fc   :  { %10038 = vmatprep.subr.msk.bf16.mxu0 %vm11390_vm3, %v10036_v58 }
 0x3fe   :  { %9098 = vmatmul.mubr.msk.f32.gmra.mrb[10].mxu0 %vm319_vm5, %v11668_v21 }
 0x3ff   :  { %9100 = vmatprep.mubr.msk.f32.mxu0 %vm319_vm5, %v11678_v23  ;;  %v3322_v23 = vsel %vm499_vm6, %v11685_v27, %v3321_v60 }
 0x401   :  { %v12099_v32 = vpop.f32.mrb[6].mxu0 }
 0x402   :  { %v1388_v62 = vsel %vm1386_vm12, %v12099_v32, 0.0  ;;  %v12102_v30 = vpop.f32.mrb[7].mxu0  ;;  %9101 = vmatmul.mubr.msk.f32.gmra.mrb[12].mxu0 %vm319_vm5, %v11682_v26 }
 0x403   :  { %v1392_v63 = vsel %vm1391_vm7, %v1388_v62, 0.0  ;;  %v1402_v14 = vmul.f32 %v1388_v62, %v1388_v62  ;;  %v1387_v16 = vsel %vm1385_vm10, %v12102_v30, 0.0  ;;  %9103 = vmatprep.mubr.msk.f32.mxu0 %vm319_vm5, %v11692_v29  ;;  %v1733_v29 = vld [vmem:[#allocation9 + $0xd0] sm:$0xff]  ;;  %v13334_v62 = vrot.slane %v11747_v13, 4 }
 0x404   :  { %v1390_v19 = vsel %vm1389_vm2, %v1387_v16, 0.0  ;;  %v1401_v21 = vmul.f32 %v1387_v16, %v1387_v16  ;;  %v10042_v27 = vpack.c.bf16 %v1734_v20, %v1733_v29  ;;  %v1447_v20 = vld [vmem:[#allocation7 + $0x20] sm:$0xff] }
 0x405   :  { %v1404_v12 = vsel %vm1391_vm7, %v1402_v14, 0.0  ;;  %v1393_v47 = vadd.f32 %v1392_v63, %v1390_v19 }
 0x406   :  { %v1403_v39 = vsel %vm1389_vm2, %v1401_v21, 0.0  ;;  %9104 = vmatmul.mubr.msk.f32.gmra.mrb[14].mxu0 %vm319_vm5, %v11696_v34 }
 0x407   :  { %v1394_v26 = vrot.slane %v1393_v47, 4  ;;  %v1405_v37 = vadd.f32 %v1404_v12, %v1403_v39  ;;  %9106 = vmatprep.mubr.msk.f32.mxu0 %vm319_vm5, %v3322_v23  ;;  %v1445_v12 = vld [vmem:[#allocation7 + $0x10] sm:$0xff] }
 0x409   :  { %v1395_v51 = vadd.f32 %v1394_v26, %v1393_v47  ;;  %v1406_v36 = vrot.slane %v1405_v37, 4  ;;  %v1446_v47 = vld [vmem:[#allocation7 + $0x18] sm:$0xff] }
 0x40a   :  { %9107 = vmatmul.mubr.msk.f32.gmra.mrb[16].mxu0 %vm319_vm5, %v3321_v60  ;;  %v13333_v60 = vld [vmem:[#allocation48_spill] sm:$0xff]  ;;  %v9952_v29 = vpack.c.bf16 %v1446_v47, %v1445_v12 }
 0x40b   :  { %v1396_v38 = vrot.slane %v1395_v51, 2  ;;  %v1407_v54 = vadd.f32 %v1406_v36, %v1405_v37  ;;  %9113 = vmatprep.mubr.msk.f32.mxu0 %vm319_vm5, %v11711_v48  ;;  %v13336_v37 = vld [vmem:[#allocation50_spill] sm:$0xff]  ;;  %v13337_v36 = vld [vmem:[#allocation51_spill] sm:$0xff] }
 0x40d   :  { %v1397_v1 = vadd.f32 %v1396_v38, %v1395_v51  ;;  %v1408_v0 = vrot.slane %v1407_v54, 2  ;;  %v1448_v38 = vld [vmem:[#allocation7 + $0x28] sm:$0xff] }
 0x40e   :  { %9114 = vmatmul.mubr.msk.f32.vlgmr.msra.gmra.mrb[8].mxu0 %vm319_vm5, %v11715_v31  ;;  %v12132_v31 = vld [vmem:[%s13305_s25 + $0x58] sm:$0xf] }
 0x40f   :  { %v1398_v34 = vrot.slane %v1397_v1, 1  ;;  %v1409_v52 = vadd.f32 %v1408_v0, %v1407_v54  ;;  %10041 = vmatpush3.bf16.msk.msra.mxu0 %vm11390_vm3, %v10036_v58  ;;  %9116 = vmatprep.mubr.msk.f32.mxu0 %vm319_vm5, %v11725_v3  ;;  %v3456_v35 = vrot.slane %v12132_v31, 3  ;;  %v3588_v55 = vrot.slane %v12132_v31, 4  ;;  %v1449_v0 = vld [vmem:[#allocation7 + $0x30] sm:$0xff] }
 0x410   :  { %10044 = vmatprep.subr.msk.bf16.mxu0 %vm11390_vm3, %v10042_v27  ;;  %v13338_v54 = vmov 0.0|0.0  }
 0x411   :  { %v1399_v49 = vadd.f32 %v1398_v34, %v1397_v1  ;;  %v1410_v48 = vrot.slane %v1409_v52, 1  ;;  %v3589_v63 = vsel %vm326_vm1, %v13334_v62, %v3588_v55  ;;  %v13340_v1 = vld [vmem:[#allocation53_spill] sm:$0xff]  ;;  %v1450_v34 = vld [vmem:[#allocation7 + $0x38] sm:$0xff] }
 0x412   :  { %9117 = vmatmul.mubr.msk.f32.gmra.mrb[10].mxu0 %vm319_vm5, %v11729_v5 }
 0x413   :  { %v1400_v11 = vmul.f32 0.25, %v1399_v49  ;;  %v1411_v25 = vadd.f32 %v1410_v48, %v1409_v52  ;;  %9119 = vmatprep.mubr.msk.f32.mxu0 %vm319_vm5, %v11739_v7  ;;  %v13327_v7 = vrot.slane %v11747_v13, 3  ;;  %v13341_v52 = vld [vmem:[#allocation54_spill] sm:$0xff]  ;;  %v9960_v49 = vpack.c.bf16 %v1450_v34, %v1449_v0  ;;  %v13342_v48 = vld [vmem:[#allocation55_spill] sm:$0xff] }
 0x415   :  { %v1412_v28 = vmul.f32 0.25, %v1411_v25  ;;  %v1413_v18 = vmul.f32 %v1400_v11, %v1400_v11  ;;  %v3457_v40 = vsel %vm875_vm9, %v13327_v7, %v3456_v35  ;;  %v13344_v25 = vld [vmem:[#allocation57_spill] sm:$0xff]  ;;  %v13347_v35 = vld [vmem:[#allocation59_spill] sm:$0xff]  ;;  %v13350_v7 = vld [vmem:[#allocation62_spill] sm:$0xff] }
 0x416   :  { %9120 = vmatmul.mubr.msk.f32.gmra.mrb[12].mxu0 %vm319_vm5, %v11743_v10  ;;  %v1735_v10 = vld [vmem:[#allocation9 + $0xe0] sm:$0xff] }
 0x417   :  { %v1414_v3 = vsub.f32 %v1412_v28, %v1413_v18  ;;  %9122 = vmatprep.mubr.msk.f32.mxu0 %vm319_vm5, %v11754_v15  ;;  %v10048_v15 = vpack.c.bf16 %v1736_v41, %v1735_v10  ;;  %v13345_v28 = vrot.slane %v11747_v13, 5  ;;  %v4033_v10 = vld [vmem:[#allocation10 + $0x10] sm:$0xff]  ;;  %v4034_v41 = vld [vmem:[#allocation10 + $0x18] sm:$0xff] }
 0x419   :  { %v1415_v5 = vmax.f32 %v1414_v3, 0.0  ;;  %v13346_v3 = vld [vmem:[#allocation58_spill] sm:$0xff] }
 0x41a   :  { %9123 = vmatmul.mubr.msk.f32.gmra.mrb[14].mxu0 %vm319_vm5, %v11758_v17  ;;  %v1418_v17 = vld [vmem:[%s13326_s13] sm:$0x1] }
 0x41b   :  { %v1416_v33 = vadd.f32 1e-05, %v1415_v5  ;;  %9125 = vmatprep.mubr.msk.f32.mxu0 %vm319_vm5, %v11769_v22  ;;  %v13348_v5 = vld [vmem:[#allocation60_spill] sm:$0xff] }
 0x41d   :  { %10748 = vrsqrt.f32 %v1416_v33  ;;  %v13349_v33 = vld [vmem:[#allocation61_spill] sm:$0xff] }
 0x41e   :  { %9126 = vmatmul.mubr.msk.f32.gmra.mrb[16].mxu0 %vm319_vm5, %v3457_v40 }
 0x41f   :  { %9132 = vmatprep.mubr.msk.f32.mxu0 %vm319_vm5, %v11778_v42 }
 0x422   :  { %9133 = vmatmul.mubr.msk.f32.vlgmr.msra.gmra.mrb[8].mxu0 %vm319_vm5, %v11782_v45 }
 0x423   :  { %10047 = vmatpush3.bf16.msk.msra.mxu0 %vm11390_vm3, %v10042_v27  ;;  %9135 = vmatprep.mubr.msk.f32.mxu0 %vm319_vm5, %v11792_v4  ;;  %v13331_v4 = vld [vmem:[#allocation46_spill] sm:$0xff]  ;;  %v9956_v27 = vpack.c.bf16 %v1448_v38, %v1447_v20 }
 0x424   :  { %10050 = vmatprep.subr.msk.bf16.mxu0 %vm11390_vm3, %v10048_v15 }
 0x426   :  { %9136 = vmatmul.mubr.msk.f32.gmra.mrb[10].mxu0 %vm319_vm5, %v11796_v8 }
 0x427   :  { %v10749_v22 = vpop.eup %10748  ;;  %9138 = vmatprep.mubr.msk.f32.mxu0 %vm319_vm5, %v11806_v61 }
 0x428   :  { %v1419_v42 = vmul.f32 %v10749_v22, %v1418_v17  ;;  %v4032_v17 = vld [vmem:[#allocation10 + $0x8] sm:$0xff] }
 0x42a   :  { %v1421_v45 = vmul.f32 %v1419_v42, %v1400_v11  ;;  %v1426_v46 = vrot.slane %v1419_v42, %v13329_v44  ;;  %9139 = vmatmul.mubr.msk.f32.gmra.mrb[12].mxu0 %vm319_vm5, %v13330_v53  ;;  %v13343_v11 = vld [vmem:[#allocation56_spill] sm:$0xff] }
 0x42b   :  { %9141 = vmatprep.mubr.msk.f32.mxu0 %vm319_vm5, %v13331_v4 }
 0x42c   :  { %v1422_v56 = vsub.f32 %v1420_v50, %v1421_v45  ;;  %v1427_v8 = vmul.f32 %v1426_v46, %v12102_v30  ;;  %v1428_v58 = vmul.f32 %v12099_v32, %v1426_v46  ;;  %v13335_v32 = vld [vmem:[#allocation49_spill] sm:$0xff] }
 0x42e   :  { %v1433_v61 = vrot.slane %v1422_v56, %v13329_v44  ;;  %9142 = vmatmul.mubr.msk.f32.gmra.mrb[14].mxu0 %vm319_vm5, %v13332_v59 }
 0x42f   :  { %9144 = vmatprep.mubr.msk.f32.mxu0 %vm319_vm5, %v13333_v60 }
 0x430   :  { %v1435_v14 = vadd.f32 %v1433_v61, %v1427_v8  ;;  %v1436_v16 = vadd.f32 %v1433_v61, %v1428_v58 }
 0x432   :  { %vm1437_vm12 = vcmp.gt.f32.partialorder %v1435_v14, 0.0  ;;  %v1439_v19 = vmul.f32 0.2, %v1435_v14  ;;  %v1440_v21 = vmul.f32 0.2, %v1436_v16  ;;  %9145 = vmatmul.mubr.msk.f32.gmra.mrb[16].mxu0 %vm319_vm5, %v3589_v63  ;;  %vm1438_vm10 = vcmp.gt.f32.partialorder %v1436_v16, 0.0 }
 0x433   :  { %9151 = vmatprep.mubr.msk.f32.mxu0 %vm319_vm5, %v13335_v32 }
 0x434   :  { %v1441_v30 = vsel %vm1437_vm12, %v1435_v14, %v1439_v19  ;;  %v1442_v23 = vsel %vm1438_vm10, %v1436_v16, %v1440_v21 }
 0x435   :  { %v1461_v39 = vrot.slane %v1441_v30, 1  ;;  %v1462_v26 = vrot.slane %v1442_v23, 1 }
 0x436   :  { %9152 = vmatmul.mubr.msk.f32.vlgmr.msra.gmra.mrb[8].mxu0 %vm319_vm5, %v13336_v37  ;;  %v12293_v37 = vld [vmem:[%s13353_s12] ss:$0 sm:$0xff] }
 0x437   :  { %10053 = vmatpush3.bf16.msk.msra.mxu0 %vm11390_vm3, %v10048_v15  ;;  %v1463_v51 = vsel %vm313_vm4, %v1461_v39, %v1462_v26  ;;  %9154 = vmatprep.mubr.msk.f32.mxu0 %vm319_vm5, %v13337_v36  ;;  %v10054_v15 = vpack.c.bf16 %v4034_v41, %v4033_v10 }
 0x438   :  { %8878 = vmatprep.mubr.msk.f32.mxu1 %vm1389_vm2, %v1463_v51  ;;  %10120 = vmatprep.subr.bf16.mxu0 %v13338_v54 }
 0x439   :  { %8879 = vmatmul.mubr.msk.f32.vlgmr.msra.gmra.mrb[14].mxu1 %vm1389_vm2, %v1462_v26 }
 0x43a   :  { %9951 = vmatpush3.bf16.msra.mxu1 %v11969_v57  ;;  %8897 = vmatprep.mubr.msk.f32.mxu1 %vm1389_vm2, %v1441_v30  ;;  %v3720_v57 = vrot.slane %v12132_v31, 5 }
 0x43b   :  { %9155 = vmatmul.mubr.msk.f32.gmra.mrb[10].mxu0 %vm319_vm5, %v13339_v2  ;;  %9953 = vmatprep.subr.bf16.mxu1 %v9952_v29 }
 0x43c   :  { %9157 = vmatprep.mubr.msk.f32.mxu0 %vm319_vm5, %v13340_v1  ;;  %v3721_v18 = vsel %vm1636_vm14, %v13345_v28, %v3720_v57 }
 0x43e   :  { %9955 = vmatpush3.bf16.msra.mxu1 %v9952_v29 }
 0x43f   :  { %9158 = vmatmul.mubr.msk.f32.gmra.mrb[12].mxu0 %vm319_vm5, %v13341_v52  ;;  %9957 = vmatprep.subr.bf16.mxu1 %v9956_v27 }
 0x440   :  { %9160 = vmatprep.mubr.msk.f32.mxu0 %vm319_vm5, %v13342_v48 }
 0x442   :  { %9959 = vmatpush3.bf16.msra.mxu1 %v9956_v27 }
 0x443   :  { %9161 = vmatmul.mubr.msk.f32.gmra.mrb[14].mxu0 %vm319_vm5, %v13343_v11  ;;  %9961 = vmatprep.subr.bf16.mxu1 %v9960_v49 }
 0x444   :  { %9163 = vmatprep.mubr.msk.f32.mxu0 %vm319_vm5, %v13344_v25 }
 0x446   :  { %9963 = vmatpush3.bf16.msra.mxu1 %v9960_v49 }
 0x447   :  { %9164 = vmatmul.mubr.msk.f32.gmra.mrb[16].mxu0 %vm319_vm5, %v3721_v18  ;;  %10055 = vmatprep.subr.bf16.mxu1 %v10054_v15 }
 0x448   :  { %9170 = vmatprep.mubr.msk.f32.mxu0 %vm319_vm5, %v11908_v6  ;;  %v3852_v6 = vrot.slane %v12132_v31, 6  ;;  %v4031_v31 = vld [vmem:[#allocation10] sm:$0xff] }
 0x449   :  { %8898 = vmatmul.mubr.msk.f32.vlgmr.msra.gmra.mrb[14].mxu1 %vm1389_vm2, %v1442_v23  ;;  %v12237_v22 = vpack.c.bf16 %v4032_v17, %v4031_v31 }
 0x44a   :  { %10057 = vmatpush3.bf16.msra.mxu1 %v10054_v15 }
 0x44b   :  { %9171 = vmatmul.mubr.msk.f32.vlgmr.msra.gmra.mrb[8].mxu0 %vm319_vm5, %v13346_v3  ;;  %10059 = vmatprep.subr.bf16.mxu1 %v12237_v22 }
 0x44c   :  { %9173 = vmatprep.mubr.msk.f32.mxu0 %vm319_vm5, %v11926_v9  ;;  %v13351_v9 = vrot.slane %v11747_v13, 6  ;;  %v12242_v13 = vpop.permute.xlu1 %5211 }
 0x44e   :  { %v3853_v40 = vsel %vm2717_vm15, %v13351_v9, %v3852_v6 }
 0x44f   :  { %9174 = vmatmul.mubr.msk.f32.gmra.mrb[10].mxu0 %vm319_vm5, %v13347_v35 }
 0x450   :  { %9176 = vmatprep.mubr.msk.f32.mxu0 %vm319_vm5, %v11944_v43  ;;  %v13352_v43 = vmov 0.0   ;;  %v12246_v50 = vpop.permute.xlu1 %5217 }
 0x453   :  { %9177 = vmatmul.mubr.msk.f32.gmra.mrb[12].mxu0 %vm319_vm5, %v13348_v5 }
 0x454   :  { %9179 = vmatprep.mubr.msk.f32.mxu0 %vm319_vm5, %v13349_v33  ;;  %v12250_v46 = vpop.permute.xlu1 %5223 }
 0x457   :  { %9180 = vmatmul.mubr.msk.f32.gmra.mrb[14].mxu0 %vm319_vm5, %v13350_v7 }
 0x458   :  { %9182 = vmatprep.mubr.msk.f32.mxu0 %vm319_vm5, %v11976_v24  ;;  %v12240_v24 = vpop.permute.xlu0 %5208  ;;  %v12254_v4 = vpop.permute.xlu1 %5229 }
 0x45b   :  { %9183 = vmatmul.mubr.msk.f32.gmra.mrb[16].mxu0 %vm319_vm5, %v3853_v40 }
 0x45c   :  { %9490 = vmatprep.mubr.msk.f32.mxu0 %vm11076_vm0, %v13352_v43  ;;  %v12244_v42 = vpop.permute.xlu0 %5214  ;;  %v12258_v56 = vpop.permute.xlu1 %6027 }
 0x460   :  { %v12248_v45 = vpop.permute.xlu0 %5220  ;;  %v12262_v58 = vpop.permute.xlu1 %6033 }
 0x464   :  { %v12252_v53 = vpop.permute.xlu0 %5226  ;;  %v12266_v59 = vpop.permute.xlu1 %6039 }
 0x468   :  { %v12256_v55 = vpop.permute.xlu0 %6024  ;;  %v12270_v62 = vpop.permute.xlu1 %6582 }
 0x46c   :  { %v12260_v8 = vpop.permute.xlu0 %6030  ;;  %v12274_v14 = vpop.permute.xlu1 %6588 }
 0x470   :  { %v12264_v61 = vpop.permute.xlu0 %6036  ;;  %v12278_v19 = vpop.permute.xlu1 %6594 }
 0x471   :  { %13354 = vst [vmem:[#allocation44_spill] sm:$0xff] %v12278_v19  ;;  %v4044_v19 = vld [vmem:[#allocation10 + $0x68] sm:$0xff] }
 0x474   :  { %v12268_v60 = vpop.permute.xlu0 %6042  ;;  %v12282_v32 = vpop.permute.xlu1 %6600 }
 0x475   :  { %13356 = vst [vmem:[#allocation46_spill] sm:$0xff] %v12282_v32 }
 0x478   :  { %v12272_v63 = vpop.permute.xlu0 %6585  ;;  %v12286_v23 = vpop.permute.xlu1 %7240 }
 0x479   :  { %13358 = vst [vmem:[#allocation48_spill] sm:$0xff] %v12286_v23 }
 0x47c   :  { %v12276_v16 = vpop.permute.xlu0 %6591  ;;  %v1631_v47 = vpop.permute.xlu1 %1630 }
 0x47d   :  { %vm1633_vm3 = vcmp.eq.s32.totalorder %v1631_v47, 1 }
 0x480   :  { %v12280_v21 = vpop.permute.xlu0 %6597 }
 0x481   :  { %13355 = vst [vmem:[#allocation45_spill] sm:$0xff] %v12280_v21 }
 0x484   :  { %v12284_v30 = vpop.permute.xlu0 %7237 }
 0x485   :  { %13357 = vst [vmem:[#allocation47_spill] sm:$0xff] %v12284_v30 }
 0x488   :  { %v12288_v12 = vpop.permute.xlu0 %7243 }
 0x489   :  { %13359 = vst [vmem:[#allocation49_spill] sm:$0xff] %v12288_v12 }
 0x48c   :  { %v1628_v39 = vpop.permute.xlu0 %1627 }
 0x48d   :  { %vm1632_vm5 = vcmp.eq.s32.totalorder %v1628_v39, 1 }
 0x51c   :  { %v12290_v26 = vpop.f32.mrb[14].mxu1 }
 0x51d   :  { %v1635_v51 = vsel %vm1633_vm3, %v12290_v26, 0.0  ;;  %v12296_v36 = vpop.f32.mrb[15].mxu1 }
 0x51e   :  { %v1637_v29 = vsel %vm1636_vm14, %v1635_v51, 0.0  ;;  %v1647_v20 = vmul.f32 %v1635_v51, %v1635_v51  ;;  %v1634_v38 = vsel %vm1632_vm5, %v12296_v36, 0.0  ;;  %v9172_v2 = vpop.f32.mrb[8].mxu0 }
 0x51f   :  { %v1638_v27 = vadd.f32 %v1637_v29, %v1634_v38  ;;  %v1646_v1 = vmul.f32 %v1634_v38, %v1634_v38  ;;  %v3992_v0 = vadd.f32 %v9172_v2, %v12293_v37  ;;  %v3925_v34 = vpop.f32.mrb[9].mxu0  ;;  %v4035_v38 = vld [vmem:[#allocation10 + $0x20] sm:$0xff]  ;;  %v4036_v2 = vld [vmem:[#allocation10 + $0x28] sm:$0xff] }
 0x520   :  { %v1648_v52 = vsel %vm1636_vm14, %v1647_v20, 0.0  ;;  %v3991_v49 = vadd.f32 %v12293_v37, %v3925_v34 }
 0x521   :  { %v1639_v48 = vrot.slane %v1638_v27, 4  ;;  %v1649_v57 = vadd.f32 %v1648_v52, %v1646_v1  ;;  %vm4002_vm7 = vcmp.gt.f32.partialorder %v3992_v0, 0.0  ;;  %v4012_v11 = vmul.f32 0.2, %v3992_v0 }
 0x522   :  { %vm4001_vm12 = vcmp.gt.f32.partialorder %v3991_v49, 0.0  ;;  %v4011_v25 = vmul.f32 0.2, %v3991_v49  ;;  %v9175_v28 = vpop.f32.mrb[10].mxu0 }
 0x523   :  { %v1640_v18 = vadd.f32 %v1639_v48, %v1638_v27  ;;  %v1650_v3 = vrot.slane %v1649_v57, 4  ;;  %v12303_v35 = vsel %vm4002_vm7, %v3992_v0, %v4012_v11  ;;  %v3994_v5 = vadd.f32 %v9175_v28, %v12293_v37  ;;  %v3935_v33 = vpop.f32.mrb[11].mxu0 }
 0x524   :  { %v12306_v6 = vsel %vm4001_vm12, %v3991_v49, %v4011_v25  ;;  %v3993_v7 = vadd.f32 %v12293_v37, %v3935_v33  ;;  %v4058_v9 = vrot.slane %v12303_v35, 2  ;;  %v12321_v28 = vpack.c.bf16 %v4036_v2, %v4035_v38 }
 0x525   :  { %v1641_v40 = vrot.slane %v1640_v18, 2  ;;  %v1651_v10 = vadd.f32 %v1650_v3, %v1649_v57  ;;  %vm4004_vm10 = vcmp.gt.f32.partialorder %v3994_v5, 0.0  ;;  %v4014_v41 = vmul.f32 0.2, %v3994_v5 }
 0x526   :  { %vm4003_vm3 = vcmp.gt.f32.partialorder %v3993_v7, 0.0  ;;  %v4013_v15 = vmul.f32 0.2, %v3993_v7  ;;  %v9178_v31 = vpop.f32.mrb[12].mxu0  ;;  %v4057_v17 = vrot.slane %v12306_v6, 2 }
 0x527   :  { %v1642_v47 = vadd.f32 %v1641_v40, %v1640_v18  ;;  %v1652_v39 = vrot.slane %v1651_v10, 2  ;;  %v12311_v51 = vsel %vm4004_vm10, %v3994_v5, %v4014_v41  ;;  %v3996_v29 = vadd.f32 %v9178_v31, %v12293_v37  ;;  %v3945_v20 = vpop.f32.mrb[13].mxu0 }
 0x528   :  { %v12314_v27 = vsel %vm4003_vm3, %v3993_v7, %v4013_v15  ;;  %v3995_v1 = vadd.f32 %v12293_v37, %v3945_v20  ;;  %v4059_v0 = vsel %vm499_vm6, %v4057_v17, %v4058_v9  ;;  %v4062_v34 = vrot.slane %v12311_v51, 2 }
 0x529   :  { %v1643_v52 = vrot.slane %v1642_v47, 1  ;;  %v1653_v49 = vadd.f32 %v1652_v39, %v1651_v10  ;;  %vm4006_vm5 = vcmp.gt.f32.partialorder %v3996_v29, 0.0  ;;  %v4016_v48 = vmul.f32 0.2, %v3996_v29  ;;  %9189 = vmatprep.mubr.msk.f32.mxu1 %vm631_vm8, %v4059_v0 }
 0x52a   :  { %vm4005_vm7 = vcmp.gt.f32.partialorder %v3995_v1, 0.0  ;;  %v4015_v57 = vmul.f32 0.2, %v3995_v1  ;;  %v9181_v11 = vpop.f32.mrb[14].mxu0  ;;  %v4060_v25 = vrot.slane %v12314_v27, 2 }
 0x52b   :  { %v1644_v18 = vadd.f32 %v1643_v52, %v1642_v47  ;;  %v1654_v3 = vrot.slane %v1653_v49, 1  ;;  %v12323_v5 = vsel %vm4006_vm5, %v3996_v29, %v4016_v48  ;;  %v3998_v33 = vadd.f32 %v9181_v11, %v12293_v37  ;;  %v3955_v7 = vpop.f32.mrb[15].mxu0 }
 0x52c   :  { %v12326_v40 = vsel %vm4005_vm7, %v3995_v1, %v4015_v57  ;;  %v3997_v10 = vadd.f32 %v12293_v37, %v3955_v7  ;;  %v12330_v41 = vsel %vm499_vm6, %v4058_v9, %v4060_v25  ;;  %v12333_v15 = vsel %vm499_vm6, %v4060_v25, %v4062_v34 }
 0x52d   :  { %v1645_v31 = vmul.f32 0.5, %v1644_v18  ;;  %v1655_v17 = vadd.f32 %v1654_v3, %v1653_v49  ;;  %vm4008_vm12 = vcmp.gt.f32.partialorder %v3998_v33, 0.0  ;;  %v4018_v47 = vmul.f32 0.2, %v3998_v33  ;;  %9190 = vmatmul.mubr.msk.f32.vlgmr.msra.gmra.mrb[16].mxu1 %vm631_vm8, %v12330_v41 }
 0x52e   :  { %vm4007_vm10 = vcmp.gt.f32.partialorder %v3997_v10, 0.0  ;;  %v4017_v39 = vmul.f32 0.2, %v3997_v10  ;;  %9192 = vmatprep.mubr.msk.f32.mxu1 %vm631_vm8, %v12333_v15  ;;  %10061 = vmatpush3.bf16.msra.mxu1 %v12237_v22  ;;  %v9184_v29 = vpop.f32.mrb[16].mxu0  ;;  %v4064_v9 = vrot.slane %v12326_v40, 2  ;;  %v4066_v20 = vrot.slane %v12323_v5, 2 }
 0x52f   :  { %v1656_v38 = vmul.f32 0.5, %v1655_v17  ;;  %v1657_v2 = vmul.f32 %v1645_v31, %v1645_v31  ;;  %v12342_v1 = vsel %vm4008_vm12, %v3998_v33, %v4018_v47  ;;  %v4000_v0 = vadd.f32 %v9184_v29, %v12293_v37  ;;  %v3965_v52 = vpop.f32.mrb[17].mxu0  ;;  %10063 = vmatprep.subr.bf16.mxu1 %v12321_v28  ;;  %v4038_v29 = vld [vmem:[#allocation10 + $0x38] sm:$0xff] }
 0x530   :  { %v12346_v49 = vsel %vm4007_vm10, %v3997_v10, %v4017_v39  ;;  %v3999_v48 = vadd.f32 %v12293_v37, %v3965_v52  ;;  %v12350_v22 = vsel %vm499_vm6, %v4062_v34, %v4064_v9  ;;  %v12353_v57 = vsel %vm499_vm6, %v4064_v9, %v4066_v20  ;;  %v4037_v39 = vld [vmem:[#allocation10 + $0x30] sm:$0xff] }
 0x531   :  { %v1658_v11 = vsub.f32 %v1656_v38, %v1657_v2  ;;  %9193 = vmatmul.mubr.msk.f32.gmra.mrb[18].mxu1 %vm631_vm8, %v12350_v22  ;;  %v4068_v25 = vrot.slane %v12346_v49, 2  ;;  %v4020_v18 = vmul.f32 0.2, %v4000_v0  ;;  %v12361_v33 = vrot.slane %v12342_v1, 2 }
 0x532   :  { %v4019_v3 = vmul.f32 0.2, %v3999_v48  ;;  %9195 = vmatprep.mubr.msk.f32.mxu1 %vm631_vm8, %v12353_v57  ;;  %vm4010_vm3 = vcmp.gt.f32.partialorder %v4000_v0, 0.0  ;;  %vm4009_vm5 = vcmp.gt.f32.partialorder %v3999_v48, 0.0  ;;  %v4468_v32 = vrot.slane %v12326_v40, 6 }
 0x533   :  { %v1659_v37 = vmax.f32 %v1658_v11, 0.0  ;;  %v12364_v34 = vsel %vm499_vm6, %v4066_v20, %v4068_v25  ;;  %v12368_v7 = vsel %vm499_vm6, %v4068_v25, %v12361_v33  ;;  %v12372_v17 = vsel %vm4010_vm3, %v4000_v0, %v4020_v18  ;;  %v1662_v11 = vld [vmem:[%s13360_s11] sm:$0x1] }
 0x534   :  { %v12374_v47 = vsel %vm4009_vm5, %v3999_v48, %v4019_v3  ;;  %v4842_v9 = vrot.slane %v12372_v17, 4  ;;  %v4959_v20 = vrot.slane %v12372_v17, 6  ;;  %v10066_v0 = vpack.c.bf16 %v4038_v29, %v4037_v39  ;;  %v1664_v3 = vld [vmem:[%s13361_s15] sm:$0x1] }
 0x535   :  { %v1660_v10 = vadd.f32 1e-05, %v1659_v37  ;;  %9196 = vmatmul.mubr.msk.f32.gmra.mrb[20].mxu1 %vm631_vm8, %v12364_v34  ;;  %v13280_v38 = vrot.slane %v12374_v47, 4  ;;  %v13279_v2 = vrot.slane %v12374_v47, 6  ;;  %v4315_v39 = vrot.slane %v12306_v6, 4 }
 0x536   :  { %9198 = vmatprep.mubr.msk.f32.mxu1 %vm631_vm8, %v12368_v7  ;;  %v4472_v21 = vrot.slane %v12346_v49, 6  ;;  %vm5232_vm10 = vcmp.eq.s32.totalorder %v12242_v13, 1  ;;  %vm5234_vm3 = vcmp.eq.s32.totalorder %v12246_v50, 1  ;;  %vm5233_vm5 = vcmp.eq.s32.totalorder %v12244_v42, 1 }
 0x537   :  { %10750 = vrsqrt.f32 %v1660_v10  ;;  %v12391_v52 = vsel %vm326_vm1, %v13280_v38, %v4842_v9  ;;  %v12396_v48 = vsel %vm2717_vm15, %v13279_v2, %v4959_v20 }
 0x539   :  { %9199 = vmatmul.mubr.msk.f32.gmra.mrb[22].mxu1 %vm631_vm8, %v12361_v33 }
 0x53a   :  { %9205 = vmatprep.mubr.msk.f32.mxu1 %vm631_vm8, %v12306_v6 }
 0x53d   :  { %9206 = vmatmul.mubr.msk.f32.vlgmr.msra.gmra.mrb[16].mxu1 %vm631_vm8, %v12303_v35 }
 0x53e   :  { %9208 = vmatprep.mubr.msk.f32.mxu1 %vm631_vm8, %v12314_v27  ;;  %10065 = vmatpush3.bf16.msra.mxu1 %v12321_v28  ;;  %v4316_v28 = vrot.slane %v12303_v35, 4 }
 0x53f   :  { %10067 = vmatprep.subr.bf16.mxu1 %v10066_v0 }
 0x540   :  { %v4317_v2 = vsel %vm326_vm1, %v4315_v39, %v4316_v28 }
 0x541   :  { %v10751_v25 = vpop.eup %10750  ;;  %9209 = vmatmul.mubr.msk.f32.gmra.mrb[18].mxu1 %vm631_vm8, %v12311_v51 }
 0x542   :  { %v1663_v18 = vmul.f32 %v10751_v25, %v1662_v11  ;;  %9211 = vmatprep.mubr.msk.f32.mxu1 %vm631_vm8, %v12326_v40  ;;  %v4318_v11 = vrot.slane %v12314_v27, 4  ;;  %v4039_v25 = vld [vmem:[#allocation10 + $0x40] sm:$0xff] }
 0x544   :  { %v1665_v37 = vmul.f32 %v1663_v18, %v1645_v31  ;;  %v1670_v10 = vrot.slane %v1663_v18, %v13329_v44  ;;  %v4040_v18 = vld [vmem:[#allocation10 + $0x48] sm:$0xff] }
 0x545   :  { %9212 = vmatmul.mubr.msk.f32.gmra.mrb[20].mxu1 %vm631_vm8, %v12323_v5  ;;  %v10070_v38 = vpack.c.bf16 %v4040_v18, %v4039_v25 }
 0x546   :  { %v1666_v29 = vsub.f32 %v1664_v3, %v1665_v37  ;;  %v1671_v9 = vmul.f32 %v1670_v10, %v12296_v36  ;;  %v1672_v20 = vmul.f32 %v12290_v26, %v1670_v10  ;;  %9214 = vmatprep.mubr.msk.f32.mxu1 %vm631_vm8, %v12346_v49  ;;  %v4320_v3 = vrot.slane %v12311_v51, 4 }
 0x547   :  { %v12424_v26 = vsel %vm326_vm1, %v4316_v28, %v4318_v11  ;;  %v4322_v10 = vrot.slane %v12326_v40, 4  ;;  %v4042_v28 = vld [vmem:[#allocation10 + $0x58] sm:$0xff] }
 0x548   :  { %v1677_v31 = vrot.slane %v1666_v29, %v13329_v44  ;;  %v12430_v39 = vsel %vm326_vm1, %v4318_v11, %v4320_v3  ;;  %v4326_v11 = vrot.slane %v12346_v49, 4 }
 0x549   :  { %9215 = vmatmul.mubr.msk.f32.gmra.mrb[22].mxu1 %vm631_vm8, %v12342_v1 }
 0x54a   :  { %v1679_v37 = vadd.f32 %v1677_v31, %v1671_v9  ;;  %v1680_v36 = vadd.f32 %v1677_v31, %v1672_v20  ;;  %9221 = vmatprep.mubr.msk.f32.mxu1 %vm631_vm8, %v4317_v2  ;;  %v4324_v9 = vrot.slane %v12323_v5, 4  ;;  %v12442_v31 = vsel %vm326_vm1, %v4320_v3, %v4322_v10 }
 0x54b   :  { %v4461_v3 = vrot.slane %v12306_v6, 6  ;;  %v4466_v6 = vrot.slane %v12311_v51, 6 }
 0x54c   :  { %vm1681_vm7 = vcmp.gt.f32.partialorder %v1679_v37, 0.0  ;;  %vm1682_vm12 = vcmp.gt.f32.partialorder %v1680_v36, 0.0  ;;  %v1683_v29 = vmul.f32 0.2, %v1679_v37  ;;  %v1684_v12 = vmul.f32 0.2, %v1680_v36 }
 0x54d   :  { %9222 = vmatmul.mubr.msk.f32.vlgmr.msra.gmra.mrb[16].mxu1 %vm631_vm8, %v12424_v26  ;;  %v12448_v25 = vsel %vm326_vm1, %v4322_v10, %v4324_v9 }
 0x54e   :  { %v12433_v20 = vsel %vm1681_vm7, %v1679_v37, %v1683_v29  ;;  %v12435_v2 = vsel %vm1682_vm12, %v1680_v36, %v1684_v12  ;;  %9224 = vmatprep.mubr.msk.f32.mxu1 %vm631_vm8, %v12430_v39  ;;  %10069 = vmatpush3.bf16.msra.mxu1 %v10066_v0  ;;  %v4328_v12 = vrot.slane %v12342_v1, 4  ;;  %v12454_v0 = vsel %vm326_vm1, %v4324_v9, %v4326_v11  ;;  %v4041_v9 = vld [vmem:[#allocation10 + $0x50] sm:$0xff] }
 0x54f   :  { %10071 = vmatprep.subr.bf16.mxu1 %v10070_v38  ;;  %v4462_v37 = vrot.slane %v12303_v35, 6  ;;  %v13362_v36 = vrot.slane %v12374_v47, 4  ;;  %v4464_v29 = vrot.slane %v12314_v27, 6  ;;  %v10074_v30 = vpack.c.bf16 %v4042_v28, %v4041_v9 }
 0x550   :  { %v12459_v18 = vsel %vm326_vm1, %v4326_v11, %v4328_v12  ;;  %vm5236_vm7 = vcmp.eq.s32.totalorder %v12250_v46, 1  ;;  %vm5235_vm12 = vcmp.eq.s32.totalorder %v12248_v45, 1 }
 0x551   :  { %9225 = vmatmul.mubr.msk.f32.gmra.mrb[18].mxu1 %vm631_vm8, %v12442_v31  ;;  %v12468_v10 = vsel %vm326_vm1, %v4328_v12, %v13362_v36  ;;  %v4463_v11 = vsel %vm2717_vm15, %v4461_v3, %v4462_v37  ;;  %v4465_v23 = vsel %vm2717_vm15, %v4462_v37, %v4464_v29  ;;  %v4467_v12 = vsel %vm2717_vm15, %v4464_v29, %v4466_v6 }
 0x552   :  { %9227 = vmatprep.mubr.msk.f32.mxu1 %vm631_vm8, %v12448_v25  ;;  %v4470_v36 = vrot.slane %v12323_v5, 6  ;;  %v4469_v3 = vsel %vm2717_vm15, %v4466_v6, %v4468_v32  ;;  %v4474_v37 = vrot.slane %v12342_v1, 6  ;;  %v4043_v6 = vld [vmem:[#allocation10 + $0x60] sm:$0xff] }
 0x554   :  { %v4471_v28 = vsel %vm2717_vm15, %v4468_v32, %v4470_v36  ;;  %v4473_v29 = vsel %vm2717_vm15, %v4470_v36, %v4472_v21  ;;  %v4475_v9 = vsel %vm2717_vm15, %v4472_v21, %v4474_v37  ;;  %v10078_v32 = vpack.c.bf16 %v4044_v19, %v4043_v6  ;;  %v4045_v19 = vld [vmem:[#allocation10 + $0x70] sm:$0xff]  ;;  %v4046_v21 = vld [vmem:[#allocation10 + $0x78] sm:$0xff] }
 0x555   :  { %9228 = vmatmul.mubr.msk.f32.gmra.mrb[20].mxu1 %vm631_vm8, %v12454_v0 }
 0x556   :  { %9230 = vmatprep.mubr.msk.f32.mxu1 %vm631_vm8, %v12459_v18 }
 0x559   :  { %9231 = vmatmul.mubr.msk.f32.gmra.mrb[22].mxu1 %vm631_vm8, %v12468_v10 }
 0x55a   :  { %9237 = vmatprep.mubr.msk.f32.mxu1 %vm631_vm8, %v4463_v11 }
 0x55d   :  { %9238 = vmatmul.mubr.msk.f32.vlgmr.msra.gmra.mrb[16].mxu1 %vm631_vm8, %v4465_v23 }
 0x55e   :  { %9240 = vmatprep.mubr.msk.f32.mxu1 %vm631_vm8, %v4467_v12  ;;  %10073 = vmatpush3.bf16.msra.mxu1 %v10070_v38  ;;  %v13363_v38 = vrot.slane %v12374_v47, 6 }
 0x55f   :  { %10075 = vmatprep.subr.bf16.mxu1 %v10074_v30 }
 0x560   :  { %v4477_v11 = vsel %vm2717_vm15, %v4474_v37, %v13363_v38 }
 0x561   :  { %9241 = vmatmul.mubr.msk.f32.gmra.mrb[18].mxu1 %vm631_vm8, %v4469_v3 }
 0x562   :  { %9243 = vmatprep.mubr.msk.f32.mxu1 %vm631_vm8, %v4471_v28 }
 0x565   :  { %9244 = vmatmul.mubr.msk.f32.gmra.mrb[20].mxu1 %vm631_vm8, %v4473_v29 }
 0x566   :  { %9246 = vmatprep.mubr.msk.f32.mxu1 %vm631_vm8, %v4475_v9 }
 0x569   :  { %9247 = vmatmul.mubr.msk.f32.gmra.mrb[22].mxu1 %vm631_vm8, %v4477_v11 }
 0x56a   :  { %9253 = vmatprep.mubr.msk.f32.mxu1 %vm631_vm8, %v12303_v35  ;;  %v4722_v35 = vrot.slane %v12374_v47, 2 }
 0x56d   :  { %9254 = vmatmul.mubr.msk.f32.vlgmr.msra.gmra.mrb[16].mxu1 %vm631_vm8, %v12314_v27 }
 0x56e   :  { %9256 = vmatprep.mubr.msk.f32.mxu1 %vm631_vm8, %v12311_v51  ;;  %10077 = vmatpush3.bf16.msra.mxu1 %v10074_v30  ;;  %v10082_v30 = vpack.c.bf16 %v4046_v21, %v4045_v19 }
 0x56f   :  { %10079 = vmatprep.subr.bf16.mxu1 %v10078_v32 }
 0x571   :  { %9257 = vmatmul.mubr.msk.f32.gmra.mrb[18].mxu1 %vm631_vm8, %v12326_v40 }
 0x572   :  { %9259 = vmatprep.mubr.msk.f32.mxu1 %vm631_vm8, %v12323_v5 }
 0x575   :  { %9260 = vmatmul.mubr.msk.f32.gmra.mrb[20].mxu1 %vm631_vm8, %v12346_v49 }
 0x576   :  { %9262 = vmatprep.mubr.msk.f32.mxu1 %vm631_vm8, %v12342_v1 }
 0x579   :  { %9263 = vmatmul.mubr.msk.f32.gmra.mrb[22].mxu1 %vm631_vm8, %v12374_v47 }
 0x57a   :  { %9269 = vmatprep.mubr.msk.f32.mxu1 %vm631_vm8, %v12330_v41  ;;  %v4723_v41 = vsel %vm499_vm6, %v12361_v33, %v4722_v35 }
 0x57d   :  { %9270 = vmatmul.mubr.msk.f32.vlgmr.msra.gmra.mrb[16].mxu1 %vm631_vm8, %v12333_v15  ;;  %v4047_v15 = vld [vmem:[#allocation10 + $0x80] sm:$0xff] }
 0x57e   :  { %9272 = vmatprep.mubr.msk.f32.mxu1 %vm631_vm8, %v12350_v22  ;;  %10081 = vmatpush3.bf16.msra.mxu1 %v10078_v32  ;;  %v4048_v22 = vld [vmem:[#allocation10 + $0x88] sm:$0xff] }
 0x57f   :  { %10083 = vmatprep.subr.bf16.mxu1 %v10082_v30 }
 0x581   :  { %9273 = vmatmul.mubr.msk.f32.gmra.mrb[18].mxu1 %vm631_vm8, %v12353_v57  ;;  %v10086_v57 = vpack.c.bf16 %v4048_v22, %v4047_v15 }
 0x582   :  { %9275 = vmatprep.mubr.msk.f32.mxu1 %vm631_vm8, %v12364_v34 }
 0x585   :  { %9276 = vmatmul.mubr.msk.f32.gmra.mrb[20].mxu1 %vm631_vm8, %v12368_v7 }
 0x586   :  { %9278 = vmatprep.mubr.msk.f32.mxu1 %vm631_vm8, %v4723_v41 }
 0x589   :  { %9279 = vmatmul.mubr.msk.f32.gmra.mrb[22].mxu1 %vm631_vm8, %v4722_v35 }
 0x58a   :  { %9285 = vmatprep.mubr.msk.f32.mxu1 %vm631_vm8, %v12424_v26 }
 0x58d   :  { %9286 = vmatmul.mubr.msk.f32.vlgmr.msra.gmra.mrb[16].mxu1 %vm631_vm8, %v12430_v39 }
 0x58e   :  { %9288 = vmatprep.mubr.msk.f32.mxu1 %vm631_vm8, %v12442_v31  ;;  %10085 = vmatpush3.bf16.msra.mxu1 %v10082_v30 }
 0x58f   :  { %10087 = vmatprep.subr.bf16.mxu1 %v10086_v57 }
 0x591   :  { %9289 = vmatmul.mubr.msk.f32.gmra.mrb[18].mxu1 %vm631_vm8, %v12448_v25 }
 0x592   :  { %9291 = vmatprep.mubr.msk.f32.mxu1 %vm631_vm8, %v12454_v0 }
 0x595   :  { %9292 = vmatmul.mubr.msk.f32.gmra.mrb[20].mxu1 %vm631_vm8, %v12459_v18 }
 0x596   :  { %9294 = vmatprep.mubr.msk.f32.mxu1 %vm631_vm8, %v12468_v10 }
 0x599   :  { %9295 = vmatmul.mubr.msk.f32.gmra.mrb[22].mxu1 %vm631_vm8, %v12391_v52 }
 0x59a   :  { %9301 = vmatprep.mubr.msk.f32.mxu1 %vm631_vm8, %v4465_v23  ;;  %v5363_v23 = vld [vmem:[#allocation12 + $0x20] sm:$0xff] }
 0x59d   :  { %9302 = vmatmul.mubr.msk.f32.vlgmr.msra.gmra.mrb[16].mxu1 %vm631_vm8, %v4467_v12 }
 0x59e   :  { %9304 = vmatprep.mubr.msk.f32.mxu1 %vm631_vm8, %v4469_v3  ;;  %10089 = vmatpush3.bf16.msra.mxu1 %v10086_v57 }
 0x59f   :  { %10090 = vmatprep.subr.bf16.mxu1 %v13338_v54 }
 0x5a1   :  { %9305 = vmatmul.mubr.msk.f32.gmra.mrb[18].mxu1 %vm631_vm8, %v4471_v28 }
 0x5a2   :  { %9307 = vmatprep.mubr.msk.f32.mxu1 %vm631_vm8, %v4473_v29 }
 0x5a5   :  { %9308 = vmatmul.mubr.msk.f32.gmra.mrb[20].mxu1 %vm631_vm8, %v4475_v9 }
 0x5a6   :  { %9310 = vmatprep.mubr.msk.f32.mxu1 %vm631_vm8, %v4477_v11 }
 0x5a9   :  { %9311 = vmatmul.mubr.msk.f32.gmra.mrb[22].mxu1 %vm631_vm8, %v12396_v48 }
 0x5aa   :  { %9317 = vmatprep.mubr.msk.f32.mxu1 %vm631_vm8, %v12314_v27  ;;  %v5365_v27 = vld [vmem:[#allocation12 + $0x30] sm:$0xff] }
 0x5ad   :  { %9318 = vmatmul.mubr.msk.f32.vlgmr.msra.gmra.mrb[16].mxu1 %vm631_vm8, %v12311_v51  ;;  %v5364_v51 = vld [vmem:[#allocation12 + $0x28] sm:$0xff] }
 0x5ae   :  { %9320 = vmatprep.mubr.msk.f32.mxu1 %vm631_vm8, %v12326_v40  ;;  %v10091_v40 = vpack.c.bf16 %v5364_v51, %v5363_v23 }
 0x5b0   :  { %10092 = vmatpush3.bf16.msra.mxu1 %v10091_v40 }
 0x5b1   :  { %9321 = vmatmul.mubr.msk.f32.gmra.mrb[18].mxu1 %vm631_vm8, %v12323_v5  ;;  %v5366_v5 = vld [vmem:[#allocation12 + $0x38] sm:$0xff]  ;;  %10093 = vmatprep.subr.bf16.mxu1 %v13338_v54 }
 0x5b2   :  { %9323 = vmatprep.mubr.msk.f32.mxu1 %vm631_vm8, %v12346_v49  ;;  %v10094_v33 = vpack.c.bf16 %v5366_v5, %v5365_v27 }
 0x5b4   :  { %10095 = vmatpush3.bf16.msra.mxu1 %v10094_v33 }
 0x5b5   :  { %9324 = vmatmul.mubr.msk.f32.gmra.mrb[20].mxu1 %vm631_vm8, %v12342_v1  ;;  %10096 = vmatprep.subr.bf16.mxu1 %v13338_v54 }
 0x5b6   :  { %9326 = vmatprep.mubr.msk.f32.mxu1 %vm631_vm8, %v12374_v47 }
 0x5b9   :  { %9327 = vmatmul.mubr.msk.f32.gmra.mrb[22].mxu1 %vm631_vm8, %v12372_v17  ;;  %vm5231_vm8 = vcmp.eq.s32.totalorder %v12240_v24, 1 }
 0x5ba   :  { %9337 = vmatprep.mubr.msk.f32.mxu1 %vm11076_vm0, %v13352_v43 }
 0x680   :  { %v12576_v1 = vpop.f32.mrb[16].mxu1 }
 0x681   :  { %v5240_v49 = vsel %vm5232_vm10, %v12576_v1, 0.0  ;;  %v12580_v34 = vpop.f32.mrb[17].mxu1  ;;  %vm5238_vm10 = vcmp.eq.s32.totalorder %v12254_v4, 1 }
 0x682   :  { %v5248_v7 = vsel %vm1062_vm13, %v5240_v49, 0.0  ;;  %v5270_v17 = vmul.f32 %v5240_v49, %v5240_v49  ;;  %v5239_v47 = vsel %vm5231_vm8, %v12580_v34, 0.0  ;;  %vm5237_vm8 = vcmp.eq.s32.totalorder %v12252_v53, 1 }
 0x683   :  { %v5247_v52 = vsel %vm1062_vm13, %v5239_v47, 0.0  ;;  %v5269_v48 = vmul.f32 %v5239_v47, %v5239_v47 }
 0x684   :  { %v5278_v13 = vsel %vm1062_vm13, %v5270_v17, 0.0  ;;  %v5249_v26 = vadd.f32 %v5248_v7, %v5247_v52  ;;  %v12587_v39 = vpop.f32.mrb[18].mxu1 }
 0x685   :  { %v5277_v24 = vsel %vm1062_vm13, %v5269_v48, 0.0  ;;  %v5242_v31 = vsel %vm5234_vm3, %v12587_v39, 0.0  ;;  %v12592_v25 = vpop.f32.mrb[19].mxu1 }
 0x686   :  { %v5279_v0 = vadd.f32 %v5278_v13, %v5277_v24  ;;  %v5241_v18 = vsel %vm5233_vm5, %v12592_v25, 0.0  ;;  %v5272_v10 = vmul.f32 %v5242_v31, %v5242_v31  ;;  %v5252_v29 = vsel %vm1062_vm13, %v5242_v31, 0.0 }
 0x687   :  { %v5250_v12 = vsel %vm1062_vm13, %v5241_v18, 0.0  ;;  %v5271_v50 = vmul.f32 %v5241_v18, %v5241_v18 }
 0x688   :  { %v5251_v36 = vadd.f32 %v5250_v12, %v5249_v26  ;;  %v12597_v3 = vpop.f32.mrb[20].mxu1  ;;  %v5282_v6 = vsel %vm1062_vm13, %v5272_v10, 0.0 }
 0x689   :  { %v5280_v42 = vsel %vm1062_vm13, %v5271_v50, 0.0  ;;  %v5244_v28 = vsel %vm5236_vm7, %v12597_v3, 0.0  ;;  %v12602_v37 = vpop.f32.mrb[21].mxu1 }
 0x68a   :  { %v5281_v9 = vadd.f32 %v5280_v42, %v5279_v0  ;;  %v5274_v38 = vmul.f32 %v5244_v28, %v5244_v28  ;;  %v5243_v11 = vsel %vm5235_vm12, %v12602_v37, 0.0  ;;  %v5253_v46 = vadd.f32 %v5252_v29, %v5251_v36 }
 0x68b   :  { %v5254_v32 = vsel %vm1062_vm13, %v5243_v11, 0.0  ;;  %v5273_v19 = vmul.f32 %v5243_v11, %v5243_v11  ;;  %v5256_v22 = vsel %vm1062_vm13, %v5244_v28, 0.0 }
 0x68c   :  { %v5283_v45 = vadd.f32 %v5282_v6, %v5281_v9  ;;  %v9328_v21 = vpop.f32.mrb[22].mxu1  ;;  %v5255_v30 = vadd.f32 %v5254_v32, %v5253_v46  ;;  %v5286_v57 = vsel %vm1062_vm13, %v5274_v38, 0.0  ;;  %v5304_v32 = vld [vmem:[%s13364_s19] sm:$0x1] }
 0x68d   :  { %v5284_v35 = vsel %vm1062_vm13, %v5273_v19, 0.0  ;;  %v5246_v41 = vsel %vm5238_vm10, %v9328_v21, 0.0  ;;  %v5174_v15 = vpop.f32.mrb[23].mxu1 }
 0x68e   :  { %v5285_v23 = vadd.f32 %v5284_v35, %v5283_v45  ;;  %v5245_v51 = vsel %vm5237_vm8, %v5174_v15, 0.0  ;;  %v5276_v27 = vmul.f32 %v5246_v41, %v5246_v41  ;;  %v5257_v40 = vadd.f32 %v5256_v22, %v5255_v30  ;;  %v5306_v30 = vld [vmem:[%s13365_s22] sm:$0x1] }
 0x68f   :  { %v5258_v5 = vsel %vm1062_vm13, %v5245_v51, 0.0  ;;  %v5275_v4 = vmul.f32 %v5245_v51, %v5245_v51  ;;  %v5260_v7 = vsel %vm1064_vm11, %v5246_v41, 0.0 }
 0x690   :  { %v5287_v33 = vadd.f32 %v5286_v57, %v5285_v23  ;;  %v5259_v49 = vadd.f32 %v5258_v5, %v5257_v40  ;;  %v5290_v47 = vsel %vm1064_vm11, %v5276_v27, 0.0 }
 0x691   :  { %v5288_v53 = vsel %vm1062_vm13, %v5275_v4, 0.0 }
 0x692   :  { %v5289_v17 = vadd.f32 %v5288_v53, %v5287_v33  ;;  %v5261_v52 = vadd.f32 %v5260_v7, %v5259_v49 }
 0x694   :  { %v5291_v48 = vadd.f32 %v5290_v47, %v5289_v17  ;;  %v5262_v13 = vrot.slane %v5261_v52, 4 }
 0x696   :  { %v5292_v26 = vrot.slane %v5291_v48, 4  ;;  %v5263_v24 = vadd.f32 %v5262_v13, %v5261_v52 }
 0x698   :  { %v5293_v31 = vadd.f32 %v5292_v26, %v5291_v48  ;;  %v5264_v0 = vrot.slane %v5263_v24, 2 }
 0x69a   :  { %v5294_v18 = vrot.slane %v5293_v31, 2  ;;  %v5265_v10 = vadd.f32 %v5264_v0, %v5263_v24 }
 0x69c   :  { %v5295_v12 = vadd.f32 %v5294_v18, %v5293_v31  ;;  %v5266_v50 = vrot.slane %v5265_v10, 1 }
 0x69e   :  { %v5296_v36 = vrot.slane %v5295_v12, 1  ;;  %v5267_v42 = vadd.f32 %v5266_v50, %v5265_v10  ;;  %v5361_v10 = vld [vmem:[#allocation12 + $0x10] sm:$0xff] }
 0x6a0   :  { %v5297_v28 = vadd.f32 %v5296_v36, %v5295_v12  ;;  %v5268_v29 = vmul.f32 0.03125, %v5267_v42  ;;  %v5362_v12 = vld [vmem:[#allocation12 + $0x18] sm:$0xff] }
 0x6a2   :  { %v5298_v9 = vmul.f32 0.03125, %v5297_v28  ;;  %v5299_v38 = vmul.f32 %v5268_v29, %v5268_v29 }
 0x6a4   :  { %v5300_v11 = vsub.f32 %v5298_v9, %v5299_v38 }
 0x6a6   :  { %v5301_v6 = vmax.f32 %v5300_v11, 0.0 }
 0x6a8   :  { %v5302_v46 = vadd.f32 1e-05, %v5301_v6 }
 0x6aa   :  { %10752 = vrsqrt.f32 %v5302_v46 }
 0x6b4   :  { %v10753_v19 = vpop.eup %10752 }
 0x6b5   :  { %v5305_v45 = vmul.f32 %v10753_v19, %v5304_v32 }
 0x6b7   :  { %v5307_v35 = vmul.f32 %v5305_v45, %v5268_v29  ;;  %v5312_v41 = vrot.slane %v5305_v45, %v13329_v44  ;;  %v10100_v29 = vpack.c.bf16 %v5362_v12, %v5361_v10 }
 0x6b9   :  { %v5308_v22 = vsub.f32 %v5306_v30, %v5307_v35  ;;  %v5319_v57 = vmul.f32 %v5312_v41, %v5174_v15  ;;  %v5313_v23 = vmul.f32 %v5312_v41, %v12580_v34  ;;  %v5314_v51 = vmul.f32 %v12576_v1, %v5312_v41  ;;  %v5359_v1 = vld [vmem:[#allocation12] sm:$0xff] }
 0x6ba   :  { %v5315_v27 = vmul.f32 %v5312_v41, %v12592_v25  ;;  %v5316_v40 = vmul.f32 %v12587_v39, %v5312_v41  ;;  %v5317_v5 = vmul.f32 %v5312_v41, %v12602_v37  ;;  %v5318_v4 = vmul.f32 %v12597_v3, %v5312_v41  ;;  %v5360_v39 = vld [vmem:[#allocation12 + $0x8] sm:$0xff] }
 0x6bb   :  { %v5325_v33 = vrot.slane %v5308_v22, %v13329_v44  ;;  %v5320_v49 = vmul.f32 %v9328_v21, %v5312_v41  ;;  %v10097_v26 = vpack.c.bf16 %v5360_v39, %v5359_v1 }
 0x6bd   :  { %v5333_v53 = vadd.f32 %v5325_v33, %v5319_v57  ;;  %v5327_v7 = vadd.f32 %v5325_v33, %v5313_v23  ;;  %v5328_v17 = vadd.f32 %v5325_v33, %v5314_v51  ;;  %v5329_v47 = vadd.f32 %v5325_v33, %v5315_v27  ;;  %v5367_v51 = vld [vmem:[#allocation12 + $0x40] sm:$0xff]  ;;  %v5368_v27 = vld [vmem:[#allocation12 + $0x48] sm:$0xff] }
 0x6be   :  { %v5330_v15 = vadd.f32 %v5325_v33, %v5316_v40  ;;  %v5331_v52 = vadd.f32 %v5325_v33, %v5317_v5  ;;  %v5332_v34 = vadd.f32 %v5325_v33, %v5318_v4  ;;  %v12627_v48 = vadd.f32 %v5325_v33, %v5320_v49  ;;  %v5369_v5 = vld [vmem:[#allocation12 + $0x50] sm:$0xff]  ;;  %v5370_v4 = vld [vmem:[#allocation12 + $0x58] sm:$0xff]  ;;  %v5371_v49 = vld [vmem:[#allocation12 + $0x60] sm:$0xff] }
 0x6bf   :  { %vm5335_vm11 = vcmp.gt.f32.partialorder %v5327_v7, 0.0  ;;  %vm5336_vm3 = vcmp.gt.f32.partialorder %v5328_v17, 0.0  ;;  %v5343_v25 = vmul.f32 0.2, %v5327_v7  ;;  %v5344_v37 = vmul.f32 0.2, %v5328_v17 }
 0x6c0   :  { %vm5337_vm5 = vcmp.gt.f32.partialorder %v5329_v47, 0.0  ;;  %v5345_v3 = vmul.f32 0.2, %v5329_v47  ;;  %v5346_v24 = vmul.f32 0.2, %v5330_v15  ;;  %vm5338_vm7 = vcmp.gt.f32.partialorder %v5330_v15, 0.0 }
 0x6c1   :  { %v12629_v13 = vsel %vm5335_vm11, %v5327_v7, %v5343_v25  ;;  %v12631_v21 = vsel %vm5336_vm3, %v5328_v17, %v5344_v37  ;;  %v5347_v28 = vmul.f32 0.2, %v5331_v52  ;;  %vm5339_vm12 = vcmp.gt.f32.partialorder %v5331_v52, 0.0 }
 0x6c2   :  { %v5386_v31 = vrot.slane %v12629_v13, 2  ;;  %v5387_v0 = vrot.slane %v12631_v21, 2  ;;  %v12635_v18 = vsel %vm5337_vm5, %v5329_v47, %v5345_v3  ;;  %v12640_v42 = vsel %vm5338_vm7, %v5330_v15, %v5346_v24  ;;  %v5373_v15 = vld [vmem:[#allocation12 + $0x70] sm:$0xff] }
 0x6c3   :  { %v5389_v36 = vrot.slane %v12635_v18, 2  ;;  %v5391_v38 = vrot.slane %v12640_v42, 2  ;;  %v12648_v11 = vsel %vm5339_vm12, %v5331_v52, %v5347_v28  ;;  %v5348_v6 = vmul.f32 0.2, %v5332_v34  ;;  %v5374_v52 = vld [vmem:[#allocation12 + $0x78] sm:$0xff] }
 0x6c4   :  { %v5388_v50 = vsel %vm499_vm6, %v5386_v31, %v5387_v0  ;;  %vm5340_vm10 = vcmp.gt.f32.partialorder %v5332_v34, 0.0  ;;  %v5393_v32 = vrot.slane %v12648_v11, 2  ;;  %v5349_v19 = vmul.f32 0.2, %v5333_v53 }
 0x6c5   :  { %9338 = vmatmul.mubr.msk.f32.vlgmr.msra.gmra.mrb[24].mxu1 %vm1062_vm13, %v5388_v50  ;;  %v5390_v9 = vsel %vm499_vm6, %v5387_v0, %v5389_v36  ;;  %v5392_v46 = vsel %vm499_vm6, %v5389_v36, %v5391_v38  ;;  %v12656_v45 = vsel %vm5340_vm10, %v5332_v34, %v5348_v6  ;;  %vm5341_vm8 = vcmp.gt.f32.partialorder %v5333_v53, 0.0 }
 0x6c6   :  { %10098 = vmatpush3.bf16.msra.mxu1 %v10097_v26  ;;  %9340 = vmatprep.mubr.msk.f32.mxu1 %vm11076_vm0, %v13352_v43  ;;  %v5394_v30 = vsel %vm499_vm6, %v5391_v38, %v5393_v32  ;;  %v5395_v35 = vrot.slane %v12656_v45, 2  ;;  %v12662_v41 = vsel %vm5341_vm8, %v5333_v53, %v5349_v19  ;;  %v10103_v40 = vpack.c.bf16 %v5368_v27, %v5367_v51  ;;  %v5372_v53 = vld [vmem:[#allocation12 + $0x68] sm:$0xff]  ;;  %v5378_v19 = vld [vmem:[#allocation12 + $0x98] sm:$0xff] }
 0x6c7   :  { %10099 = vmatprep.subr.bf16.mxu1 %v13338_v54  ;;  %v5397_v57 = vrot.slane %v12662_v41, 2  ;;  %v10106_v33 = vpack.c.bf16 %v5370_v4, %v5369_v5  ;;  %v5628_v7 = vrot.slane %v12629_v13, 4  ;;  %v5629_v17 = vrot.slane %v12631_v21, 4 }
 0x6c8   :  { %v5396_v22 = vsel %vm499_vm6, %v5393_v32, %v5395_v35  ;;  %v10109_v47 = vpack.c.bf16 %v5372_v53, %v5371_v49  ;;  %v5631_v1 = vrot.slane %v12635_v18, 4  ;;  %v10112_v39 = vpack.c.bf16 %v5374_v52, %v5373_v15  ;;  %v5377_v32 = vld [vmem:[#allocation12 + $0x90] sm:$0xff]  ;;  %v6176_v52 = vld [vmem:[#allocation13 + $0x78] sm:$0xff] }
 0x6c9   :  { %9341 = vmatmul.mubr.msk.f32.gmra.mrb[26].mxu1 %vm1062_vm13, %v5390_v9  ;;  %v5398_v23 = vsel %vm499_vm6, %v5395_v35, %v5397_v57  ;;  %v5630_v34 = vsel %vm326_vm1, %v5628_v7, %v5629_v17  ;;  %v5633_v37 = vrot.slane %v12640_v42, 4  ;;  %v5635_v26 = vrot.slane %v12648_v11, 4  ;;  %v5376_v9 = vld [vmem:[#allocation12 + $0x88] sm:$0xff]  ;;  %v6172_v7 = vld [vmem:[#allocation13 + $0x58] sm:$0xff] }
 0x6ca   :  { %9343 = vmatprep.mubr.msk.f32.mxu1 %vm11076_vm0, %v13352_v43  ;;  %10101 = vmatpush3.bf16.msra.mxu1 %v10100_v29  ;;  %v5632_v25 = vsel %vm326_vm1, %v5629_v17, %v5631_v1  ;;  %v5637_v31 = vrot.slane %v12656_v45, 4  ;;  %v5350_v0 = vmul.f32 0.2, %v12627_v48  ;;  %vm5342_vm11 = vcmp.gt.f32.partialorder %v12627_v48, 0.0  ;;  %v5375_v29 = vld [vmem:[#allocation12 + $0x80] sm:$0xff] }
 0x6cb   :  { %10102 = vmatprep.subr.bf16.mxu1 %v13338_v54  ;;  %v5634_v3 = vsel %vm326_vm1, %v5631_v1, %v5633_v37  ;;  %v5636_v24 = vsel %vm326_vm1, %v5633_v37, %v5635_v26  ;;  %v5639_v12 = vrot.slane %v12662_v41, 4  ;;  %v5764_v6 = vrot.slane %v12629_v13, 6 }
 0x6cc   :  { %v5638_v10 = vsel %vm326_vm1, %v5635_v26, %v5637_v31  ;;  %v5358_v50 = vsel %vm5342_vm11, %v12627_v48, %v5350_v0  ;;  %v10115_v48 = vpack.c.bf16 %v5376_v9, %v5375_v29  ;;  %v5767_v35 = vrot.slane %v12635_v18, 6 }
 0x6cd   :  { %9344 = vmatmul.mubr.msk.f32.gmra.mrb[28].mxu1 %vm1062_vm13, %v5392_v46  ;;  %v5640_v36 = vsel %vm326_vm1, %v5637_v31, %v5639_v12  ;;  %v5641_v28 = vrot.slane %v5358_v50, 4  ;;  %v5765_v46 = vrot.slane %v12631_v21, 6  ;;  %v5771_v51 = vrot.slane %v12648_v11, 6 }
 0x6ce   :  { %9346 = vmatprep.mubr.msk.f32.mxu1 %vm11076_vm0, %v13352_v43  ;;  %v5775_v4 = vrot.slane %v12662_v41, 6  ;;  %v5777_v49 = vrot.slane %v5358_v50, 6  ;;  %vm6045_vm3 = vcmp.eq.s32.totalorder %v12258_v56, 1  ;;  %vm6046_vm5 = vcmp.eq.s32.totalorder %v12260_v8, 1 }
 0x6cf   :  { %v5642_v38 = vsel %vm326_vm1, %v5639_v12, %v5641_v28  ;;  %vm6047_vm7 = vcmp.eq.s32.totalorder %v12262_v58, 1  ;;  %vm6048_vm12 = vcmp.eq.s32.totalorder %v12264_v61, 1  ;;  %vm6049_vm10 = vcmp.eq.s32.totalorder %v12266_v59, 1 }
 0x6d0   :  { %v5778_v53 = vsel %vm2717_vm15, %v5775_v4, %v5777_v49  ;;  %vm6069_vm8 = vcmask 521216   ;;  %vm6050_vm11 = vcmp.eq.s32.totalorder %v12268_v60, 1 }
 0x6d1   :  { %9347 = vmatmul.mubr.msk.f32.gmra.mrb[30].mxu1 %vm1062_vm13, %v5394_v30  ;;  %v5766_v30 = vsel %vm2717_vm15, %v5764_v6, %v5765_v46 }
 0x6d2   :  { %9349 = vmatprep.mubr.msk.f32.mxu1 %vm11076_vm0, %v13352_v43 }
 0x6d5   :  { %9350 = vmatmul.mubr.msk.f32.gmra.mrb[32].mxu1 %vm1062_vm13, %v5396_v22  ;;  %v5768_v22 = vsel %vm2717_vm15, %v5765_v46, %v5767_v35 }
 0x6d6   :  { %9352 = vmatprep.mubr.msk.f32.mxu1 %vm11076_vm0, %v13352_v43 }
 0x6d9   :  { %9353 = vmatmul.mubr.msk.f32.gmra.mrb[34].mxu1 %vm1062_vm13, %v5398_v23 }
 0x6da   :  { %9355 = vmatprep.mubr.msk.f32.mxu1 %vm11076_vm0, %v13352_v43 }
 0x6dd   :  { %9356 = vmatmul.mubr.msk.f32.gmra.mrb[36].mxu1 %vm1062_vm13, %v5397_v57  ;;  %v5769_v57 = vrot.slane %v12640_v42, 6 }
 0x6de   :  { %9366 = vmatprep.mubr.msk.f32.mxu1 %vm11076_vm0, %v13352_v43 }
 0x6df   :  { %v5770_v23 = vsel %vm2717_vm15, %v5767_v35, %v5769_v57  ;;  %v5772_v27 = vsel %vm2717_vm15, %v5769_v57, %v5771_v51 }
 0x6e1   :  { %9367 = vmatmul.mubr.msk.f32.vlgmr.msra.gmra.mrb[24].mxu1 %vm1062_vm13, %v12629_v13  ;;  %v10118_v13 = vpack.c.bf16 %v5378_v19, %v5377_v32 }
 0x6e2   :  { %10104 = vmatpush3.bf16.msra.mxu1 %v10103_v40  ;;  %9369 = vmatprep.mubr.msk.f32.mxu1 %vm11076_vm0, %v13352_v43  ;;  %v5773_v40 = vrot.slane %v12656_v45, 6 }
 0x6e3   :  { %10105 = vmatprep.subr.bf16.mxu1 %v13338_v54 }
 0x6e4   :  { %v5774_v5 = vsel %vm2717_vm15, %v5771_v51, %v5773_v40 }
 0x6e5   :  { %9370 = vmatmul.mubr.msk.f32.gmra.mrb[26].mxu1 %vm1062_vm13, %v12631_v21 }
 0x6e6   :  { %9372 = vmatprep.mubr.msk.f32.mxu1 %vm11076_vm0, %v13352_v43  ;;  %10107 = vmatpush3.bf16.msra.mxu1 %v10106_v33  ;;  %v5776_v33 = vsel %vm2717_vm15, %v5773_v40, %v5775_v4 }
 0x6e7   :  { %10108 = vmatprep.subr.bf16.mxu1 %v13338_v54 }
 0x6e9   :  { %9373 = vmatmul.mubr.msk.f32.gmra.mrb[28].mxu1 %vm1062_vm13, %v12635_v18 }
 0x6ea   :  { %9375 = vmatprep.mubr.msk.f32.mxu1 %vm11076_vm0, %v13352_v43 }
 0x6ed   :  { %9376 = vmatmul.mubr.msk.f32.gmra.mrb[30].mxu1 %vm1062_vm13, %v12640_v42 }
 0x6ee   :  { %9378 = vmatprep.mubr.msk.f32.mxu1 %vm11076_vm0, %v13352_v43 }
 0x6f1   :  { %9379 = vmatmul.mubr.msk.f32.gmra.mrb[32].mxu1 %vm1062_vm13, %v12648_v11 }
 0x6f2   :  { %9381 = vmatprep.mubr.msk.f32.mxu1 %vm11076_vm0, %v13352_v43 }
 0x6f5   :  { %9382 = vmatmul.mubr.msk.f32.gmra.mrb[34].mxu1 %vm1062_vm13, %v12656_v45 }
 0x6f6   :  { %9384 = vmatprep.mubr.msk.f32.mxu1 %vm11076_vm0, %v13352_v43 }
 0x6f9   :  { %9385 = vmatmul.mubr.msk.f32.gmra.mrb[36].mxu1 %vm1062_vm13, %v12662_v41 }
 0x6fa   :  { %9395 = vmatprep.mubr.msk.f32.mxu1 %vm11076_vm0, %v13352_v43 }
 0x6fd   :  { %9396 = vmatmul.mubr.msk.f32.vlgmr.msra.gmra.mrb[24].mxu1 %vm1062_vm13, %v5630_v34 }
 0x6fe   :  { %10110 = vmatpush3.bf16.msra.mxu1 %v10109_v47  ;;  %9398 = vmatprep.mubr.msk.f32.mxu1 %vm11076_vm0, %v13352_v43  ;;  %v6174_v47 = vld [vmem:[#allocation13 + $0x68] sm:$0xff] }
 0x6ff   :  { %10111 = vmatprep.subr.bf16.mxu1 %v13338_v54 }
 0x701   :  { %9399 = vmatmul.mubr.msk.f32.gmra.mrb[26].mxu1 %vm1062_vm13, %v5632_v25 }
 0x702   :  { %9401 = vmatprep.mubr.msk.f32.mxu1 %vm11076_vm0, %v13352_v43  ;;  %10113 = vmatpush3.bf16.msra.mxu1 %v10112_v39 }
 0x703   :  { %10114 = vmatprep.subr.bf16.mxu1 %v13338_v54 }
 0x705   :  { %9402 = vmatmul.mubr.msk.f32.gmra.mrb[28].mxu1 %vm1062_vm13, %v5634_v3 }
 0x706   :  { %9404 = vmatprep.mubr.msk.f32.mxu1 %vm11076_vm0, %v13352_v43 }
 0x709   :  { %9405 = vmatmul.mubr.msk.f32.gmra.mrb[30].mxu1 %vm1062_vm13, %v5636_v24 }
 0x70a   :  { %9407 = vmatprep.mubr.msk.f32.mxu1 %vm11076_vm0, %v13352_v43 }
 0x70d   :  { %9408 = vmatmul.mubr.msk.f32.gmra.mrb[32].mxu1 %vm1062_vm13, %v5638_v10 }
 0x70e   :  { %9410 = vmatprep.mubr.msk.f32.mxu1 %vm11076_vm0, %v13352_v43 }
 0x711   :  { %9411 = vmatmul.mubr.msk.f32.gmra.mrb[34].mxu1 %vm1062_vm13, %v5640_v36 }
 0x712   :  { %9413 = vmatprep.mubr.msk.f32.mxu1 %vm11076_vm0, %v13352_v43 }
 0x715   :  { %9414 = vmatmul.mubr.msk.f32.gmra.mrb[36].mxu1 %vm1062_vm13, %v5642_v38 }
 0x716   :  { %9424 = vmatprep.mubr.msk.f32.mxu1 %vm11076_vm0, %v13352_v43 }
 0x719   :  { %9425 = vmatmul.mubr.msk.f32.vlgmr.msra.gmra.mrb[24].mxu1 %vm1062_vm13, %v5766_v30 }
 0x71a   :  { %10116 = vmatpush3.bf16.msra.mxu1 %v10115_v48  ;;  %9427 = vmatprep.mubr.msk.f32.mxu1 %vm11076_vm0, %v13352_v43 }
 0x71b   :  { %10117 = vmatprep.subr.bf16.mxu1 %v13338_v54 }
 0x71d   :  { %9428 = vmatmul.mubr.msk.f32.gmra.mrb[26].mxu1 %vm1062_vm13, %v5768_v22 }
 0x71e   :  { %9430 = vmatprep.mubr.msk.f32.mxu1 %vm11076_vm0, %v13352_v43  ;;  %10119 = vmatpush3.bf16.msra.mxu1 %v10118_v13 }
 0x721   :  { %9431 = vmatmul.mubr.msk.f32.gmra.mrb[28].mxu1 %vm1062_vm13, %v5770_v23 }
 0x722   :  { %9433 = vmatprep.mubr.msk.f32.mxu1 %vm11076_vm0, %v13352_v43 }
 0x725   :  { %9434 = vmatmul.mubr.msk.f32.gmra.mrb[30].mxu1 %vm1062_vm13, %v5772_v27 }
 0x726   :  { %9436 = vmatprep.mubr.msk.f32.mxu1 %vm11076_vm0, %v13352_v43 }
 0x729   :  { %9437 = vmatmul.mubr.msk.f32.gmra.mrb[32].mxu1 %vm1062_vm13, %v5774_v5 }
 0x72a   :  { %9439 = vmatprep.mubr.msk.f32.mxu1 %vm11076_vm0, %v13352_v43 }
 0x72d   :  { %9440 = vmatmul.mubr.msk.f32.gmra.mrb[34].mxu1 %vm1062_vm13, %v5776_v33 }
 0x72e   :  { %9442 = vmatprep.mubr.msk.f32.mxu1 %vm11076_vm0, %v13352_v43 }
 0x731   :  { %9443 = vmatmul.mubr.msk.f32.gmra.mrb[36].mxu1 %vm1062_vm13, %v5778_v53 }
 0x732   :  { %9453 = vmatprep.mubr.msk.f32.mxu1 %vm11076_vm0, %v13352_v43 }
 0x735   :  { %9454 = vmatmul.mubr.msk.f32.vlgmr.msra.gmra.mrb[24].mxu1 %vm1062_vm13, %v12631_v21  ;;  %v6169_v21 = vld [vmem:[#allocation13 + $0x40] sm:$0xff] }
 0x736   :  { %9456 = vmatprep.mubr.msk.f32.mxu1 %vm11076_vm0, %v13352_v43 }
 0x739   :  { %9457 = vmatmul.mubr.msk.f32.gmra.mrb[26].mxu1 %vm1062_vm13, %v12635_v18  ;;  %v6170_v18 = vld [vmem:[#allocation13 + $0x48] sm:$0xff] }
 0x73a   :  { %9459 = vmatprep.mubr.msk.f32.mxu1 %vm11076_vm0, %v13352_v43 }
 0x73d   :  { %9460 = vmatmul.mubr.msk.f32.gmra.mrb[28].mxu1 %vm1062_vm13, %v12640_v42  ;;  %v6171_v42 = vld [vmem:[#allocation13 + $0x50] sm:$0xff] }
 0x73e   :  { %9462 = vmatprep.mubr.msk.f32.mxu1 %vm11076_vm0, %v13352_v43  ;;  %v10124_v17 = vpack.c.bf16 %v6172_v7, %v6171_v42 }
 0x741   :  { %9463 = vmatmul.mubr.msk.f32.gmra.mrb[30].mxu1 %vm1062_vm13, %v12648_v11  ;;  %v10121_v11 = vpack.c.bf16 %v6170_v18, %v6169_v21 }
 0x742   :  { %9465 = vmatprep.mubr.msk.f32.mxu1 %vm11076_vm0, %v13352_v43 }
 0x743   :  { %10122 = vmatpush3.bf16.msra.mxu0 %v10121_v11 }
 0x744   :  { %10123 = vmatprep.subr.bf16.mxu0 %v13338_v54 }
 0x745   :  { %9466 = vmatmul.mubr.msk.f32.gmra.mrb[32].mxu1 %vm1062_vm13, %v12656_v45  ;;  %v6173_v45 = vld [vmem:[#allocation13 + $0x60] sm:$0xff] }
 0x746   :  { %9468 = vmatprep.mubr.msk.f32.mxu1 %vm11076_vm0, %v13352_v43  ;;  %v10127_v15 = vpack.c.bf16 %v6174_v47, %v6173_v45 }
 0x747   :  { %10125 = vmatpush3.bf16.msra.mxu0 %v10124_v17 }
 0x748   :  { %10126 = vmatprep.subr.bf16.mxu0 %v13338_v54 }
 0x749   :  { %9469 = vmatmul.mubr.msk.f32.gmra.mrb[34].mxu1 %vm1062_vm13, %v12662_v41  ;;  %v6175_v41 = vld [vmem:[#allocation13 + $0x70] sm:$0xff] }
 0x74a   :  { %9471 = vmatprep.mubr.msk.f32.mxu1 %vm11076_vm0, %v13352_v43  ;;  %v10130_v34 = vpack.c.bf16 %v6176_v52, %v6175_v41 }
 0x74b   :  { %10128 = vmatpush3.bf16.msra.mxu0 %v10127_v15 }
 0x74c   :  { %10129 = vmatprep.subr.bf16.mxu0 %v13338_v54 }
 0x74d   :  { %9472 = vmatmul.mubr.msk.f32.gmra.mrb[36].mxu1 %vm1062_vm13, %v5358_v50  ;;  %vm6044_vm13 = vcmp.eq.s32.totalorder %v12256_v55, 1 }
 0x74f   :  { %10131 = vmatpush3.bf16.msra.mxu0 %v10130_v34 }
 0x750   :  { %10132 = vmatprep.subr.bf16.mxu0 %v13338_v54 }
 0x808   :  { %v12815_v1 = vpop.f32.mrb[24].mxu1 }
 0x809   :  { %v6051_v39 = vsel %vm6044_vm13, %v12815_v1, 0.0  ;;  %v9455_v25 = vpop.f32.mrb[25].mxu1 }
 0x80a   :  { %v6079_v37 = vmul.f32 %v6051_v39, %v6051_v39  ;;  %v6058_v31 = vsel %vm1389_vm2, %v6051_v39, 0.0 }
 0x80c   :  { %v12819_v3 = vpop.f32.mrb[26].mxu1  ;;  %v6086_v55 = vsel %vm1389_vm2, %v6079_v37, 0.0 }
 0x80d   :  { %v6052_v26 = vsel %vm6045_vm3, %v12819_v3, 0.0  ;;  %v9458_v24 = vpop.f32.mrb[27].mxu1 }
 0x80e   :  { %v6059_v0 = vsel %vm1389_vm2, %v6052_v26, 0.0  ;;  %v6080_v10 = vmul.f32 %v6052_v26, %v6052_v26 }
 0x80f   :  { %v6060_v12 = vadd.f32 %v6059_v0, %v6058_v31 }
 0x810   :  { %v6087_v50 = vsel %vm1389_vm2, %v6080_v10, 0.0  ;;  %v12827_v36 = vpop.f32.mrb[28].mxu1 }
 0x811   :  { %v6088_v56 = vadd.f32 %v6087_v50, %v6086_v55  ;;  %v6053_v28 = vsel %vm6046_vm5, %v12827_v36, 0.0  ;;  %v9461_v29 = vpop.f32.mrb[29].mxu1 }
 0x812   :  { %v6061_v9 = vsel %vm1389_vm2, %v6053_v28, 0.0  ;;  %v6081_v38 = vmul.f32 %v6053_v28, %v6053_v28 }
 0x813   :  { %v6062_v6 = vadd.f32 %v6061_v9, %v6060_v12 }
 0x814   :  { %v6089_v46 = vsel %vm1389_vm2, %v6081_v38, 0.0  ;;  %v12833_v48 = vpop.f32.mrb[30].mxu1 }
 0x815   :  { %v6090_v8 = vadd.f32 %v6089_v46, %v6088_v56  ;;  %v6054_v32 = vsel %vm6047_vm7, %v12833_v48, 0.0  ;;  %v9464_v19 = vpop.f32.mrb[31].mxu1  ;;  %v6111_v46 = vld [vmem:[%s13366_s23] sm:$0x1] }
 0x816   :  { %v6063_v30 = vsel %vm1389_vm2, %v6054_v32, 0.0  ;;  %v6082_v35 = vmul.f32 %v6054_v32, %v6054_v32  ;;  %v6113_v19 = vld [vmem:[%s13367_s26] sm:$0x1] }
 0x817   :  { %v6064_v13 = vadd.f32 %v6063_v30, %v6062_v6 }
 0x818   :  { %v6091_v22 = vsel %vm1389_vm2, %v6082_v35, 0.0  ;;  %v5988_v57 = vpop.f32.mrb[32].mxu1 }
 0x819   :  { %v6092_v23 = vadd.f32 %v6091_v22, %v6090_v8  ;;  %v6055_v51 = vsel %vm6048_vm12, %v5988_v57, 0.0  ;;  %v9467_v58 = vpop.f32.mrb[33].mxu1 }
 0x81a   :  { %v6065_v27 = vsel %vm1389_vm2, %v6055_v51, 0.0  ;;  %v6083_v40 = vmul.f32 %v6055_v51, %v6055_v51  ;;  %v6161_v58 = vld [vmem:[#allocation13] sm:$0xff] }
 0x81b   :  { %v6066_v5 = vadd.f32 %v6065_v27, %v6064_v13  ;;  %v6162_v27 = vld [vmem:[#allocation13 + $0x8] sm:$0xff] }
 0x81c   :  { %v6093_v4 = vsel %vm1389_vm2, %v6083_v40, 0.0  ;;  %v5993_v33 = vpop.f32.mrb[34].mxu1 }
 0x81d   :  { %v6094_v49 = vadd.f32 %v6093_v4, %v6092_v23  ;;  %v6056_v53 = vsel %vm6049_vm10, %v5993_v33, 0.0  ;;  %v9470_v21 = vpop.f32.mrb[35].mxu1 }
 0x81e   :  { %v6067_v61 = vsel %vm1389_vm2, %v6056_v53, 0.0  ;;  %v6084_v18 = vmul.f32 %v6056_v53, %v6056_v53  ;;  %v12853_v21 = vld [vmem:[#allocation13 + $0x10] sm:$0xff] }
 0x81f   :  { %v6068_v42 = vadd.f32 %v6067_v61, %v6066_v5  ;;  %v12855_v61 = vld [vmem:[#allocation13 + $0x18] sm:$0xff] }
 0x820   :  { %v6095_v11 = vsel %vm1389_vm2, %v6084_v18, 0.0  ;;  %v5998_v7 = vpop.f32.mrb[36].mxu1  ;;  %v10133_v18 = vpack.c.bf16 %v6162_v27, %v6161_v58 }
 0x821   :  { %v6096_v17 = vadd.f32 %v6095_v11, %v6094_v49  ;;  %v6057_v45 = vsel %vm6050_vm11, %v5998_v7, 0.0  ;;  %v9473_v47 = vpop.f32.mrb[37].mxu1 }
 0x822   :  { %v6070_v59 = vsel %vm6069_vm8, %v6057_v45, 0.0  ;;  %v6085_v15 = vmul.f32 %v6057_v45, %v6057_v45 }
 0x823   :  { %v6071_v41 = vadd.f32 %v6070_v59, %v6068_v42 }
 0x824   :  { %v6097_v52 = vsel %vm6069_vm8, %v6085_v15, 0.0 }
 0x825   :  { %v6072_v34 = vrot.slane %v6071_v41, 4  ;;  %v6098_v39 = vadd.f32 %v6097_v52, %v6096_v17  ;;  %v10136_v17 = vpack.c.bf16 %v12855_v61, %v12853_v21  ;;  %v6168_v21 = vld [vmem:[#allocation13 + $0x38] sm:$0xff] }
 0x827   :  { %v6073_v25 = vadd.f32 %v6072_v34, %v6071_v41  ;;  %v6099_v37 = vrot.slane %v6098_v39, 4 }
 0x829   :  { %v6074_v26 = vrot.slane %v6073_v25, 2  ;;  %v6100_v24 = vadd.f32 %v6099_v37, %v6098_v39 }
 0x82b   :  { %v6075_v31 = vadd.f32 %v6074_v26, %v6073_v25  ;;  %v6101_v0 = vrot.slane %v6100_v24, 2 }
 0x82d   :  { %v6076_v60 = vrot.slane %v6075_v31, 1  ;;  %v6102_v10 = vadd.f32 %v6101_v0, %v6100_v24 }
 0x82f   :  { %v6077_v12 = vadd.f32 %v6076_v60, %v6075_v31  ;;  %v6103_v55 = vrot.slane %v6102_v10, 1 }
 0x831   :  { %v6078_v50 = vmul.f32 0.0625, %v6077_v12  ;;  %v6104_v56 = vadd.f32 %v6103_v55, %v6102_v10 }
 0x833   :  { %v6105_v28 = vmul.f32 0.0625, %v6104_v56  ;;  %v6106_v29 = vmul.f32 %v6078_v50, %v6078_v50 }
 0x835   :  { %v6107_v9 = vsub.f32 %v6105_v28, %v6106_v29 }
 0x837   :  { %v6108_v38 = vmax.f32 %v6107_v9, 0.0 }
 0x839   :  { %v6109_v6 = vadd.f32 1e-05, %v6108_v38 }
 0x83b   :  { %10754 = vrsqrt.f32 %v6109_v6 }
 0x845   :  { %v10755_v8 = vpop.eup %10754 }
 0x846   :  { %v6112_v32 = vmul.f32 %v10755_v8, %v6111_v46 }
 0x848   :  { %v6114_v30 = vmul.f32 %v6112_v32, %v6078_v50  ;;  %v6119_v35 = vrot.slane %v6112_v32, %v13329_v44  ;;  %v6165_v32 = vld [vmem:[#allocation13 + $0x20] sm:$0xff] }
 0x84a   :  { %v6115_v13 = vsub.f32 %v6113_v19, %v6114_v30  ;;  %v6126_v22 = vmul.f32 %v6119_v35, %v5998_v7  ;;  %v6120_v23 = vmul.f32 %v6119_v35, %v12815_v1  ;;  %v6121_v51 = vmul.f32 %v6119_v35, %v12819_v3  ;;  %v6166_v19 = vld [vmem:[#allocation13 + $0x28] sm:$0xff] }
 0x84b   :  { %v6122_v40 = vmul.f32 %v6119_v35, %v12827_v36  ;;  %v6123_v5 = vmul.f32 %v6119_v35, %v12833_v48  ;;  %v6124_v4 = vmul.f32 %v6119_v35, %v5988_v57  ;;  %v6125_v49 = vmul.f32 %v6119_v35, %v5993_v33 }
 0x84c   :  { %v6131_v53 = vrot.slane %v6115_v13, %v13329_v44 }
 0x84e   :  { %v6139_v42 = vadd.f32 %v6131_v53, %v6126_v22  ;;  %v6133_v11 = vadd.f32 %v6131_v53, %v6120_v23  ;;  %v6134_v1 = vadd.f32 %v6131_v53, %v6121_v51  ;;  %v6135_v7 = vadd.f32 %v6131_v53, %v6122_v40 }
 0x84f   :  { %v6136_v3 = vadd.f32 %v6131_v53, %v6123_v5  ;;  %v6137_v36 = vadd.f32 %v6131_v53, %v6124_v4  ;;  %v6138_v45 = vadd.f32 %v6131_v53, %v6125_v49  ;;  %v10139_v49 = vpack.c.bf16 %v6166_v19, %v6165_v32  ;;  %v6167_v53 = vld [vmem:[#allocation13 + $0x30] sm:$0xff] }
 0x850   :  { %vm6146_vm13 = vcmp.gt.f32.partialorder %v6139_v42, 0.0  ;;  %v6153_v48 = vmul.f32 0.2, %v6139_v42  ;;  %vm6140_vm3 = vcmp.gt.f32.partialorder %v6133_v11, 0.0  ;;  %vm6141_vm5 = vcmp.gt.f32.partialorder %v6134_v1, 0.0 }
 0x851   :  { %v6147_v57 = vmul.f32 0.2, %v6133_v11  ;;  %v6148_v33 = vmul.f32 0.2, %v6134_v1  ;;  %vm6142_vm7 = vcmp.gt.f32.partialorder %v6135_v7, 0.0  ;;  %vm6143_vm12 = vcmp.gt.f32.partialorder %v6136_v3, 0.0 }
 0x852   :  { %v12859_v47 = vsel %vm6146_vm13, %v6139_v42, %v6153_v48  ;;  %v6149_v59 = vmul.f32 0.2, %v6135_v7  ;;  %v6150_v15 = vmul.f32 0.2, %v6136_v3  ;;  %vm6144_vm10 = vcmp.gt.f32.partialorder %v6137_v36, 0.0  ;;  %v6178_v42 = vld [vmem:[#allocation13 + $0x88] sm:$0xff] }
 0x853   :  { %v12861_v41 = vsel %vm6140_vm3, %v6133_v11, %v6147_v57  ;;  %v12863_v52 = vsel %vm6141_vm5, %v6134_v1, %v6148_v33  ;;  %v6151_v34 = vmul.f32 0.2, %v6137_v36  ;;  %vm6145_vm8 = vcmp.gt.f32.partialorder %v6138_v45, 0.0  ;;  %v6179_v1 = vld [vmem:[#allocation13 + $0x90] sm:$0xff]  ;;  %v6184_v57 = vld [vmem:[#allocation13 + $0xb8] sm:$0xff] }
 0x854   :  { %v6192_v39 = vrot.slane %v12861_v41, 2  ;;  %v6193_v25 = vrot.slane %v12863_v52, 2  ;;  %v12867_v37 = vsel %vm6142_vm7, %v6135_v7, %v6149_v59  ;;  %v12869_v26 = vsel %vm6143_vm12, %v6136_v3, %v6150_v15  ;;  %v6180_v7 = vld [vmem:[#allocation13 + $0x98] sm:$0xff]  ;;  %v6183_v48 = vld [vmem:[#allocation13 + $0xb0] sm:$0xff] }
 0x855   :  { %v6195_v24 = vrot.slane %v12867_v37, 2  ;;  %v6197_v31 = vrot.slane %v12869_v26, 2  ;;  %v12873_v0 = vsel %vm6144_vm10, %v6137_v36, %v6151_v34  ;;  %v6152_v60 = vmul.f32 0.2, %v6138_v45  ;;  %v6182_v36 = vld [vmem:[#allocation13 + $0xa8] sm:$0xff] }
 0x856   :  { %v6194_v10 = vsel %vm499_vm6, %v6192_v39, %v6193_v25  ;;  %v6199_v12 = vrot.slane %v12873_v0, 2  ;;  %v6203_v55 = vrot.slane %v12859_v47, 2  ;;  %v6433_v50 = vrot.slane %v12861_v41, 4  ;;  %v6727_v39 = vld [vmem:[%s13370_s28 + $0xa8] sm:$0xff] }
 0x857   :  { %9491 = vmatmul.mubr.msk.f32.vlgmr.msra.gmra.mrb[18].mxu0 %vm1389_vm2, %v6194_v10  ;;  %v6196_v56 = vsel %vm499_vm6, %v6193_v25, %v6195_v24  ;;  %v6198_v28 = vsel %vm499_vm6, %v6195_v24, %v6197_v31  ;;  %v12883_v29 = vsel %vm6145_vm8, %v6138_v45, %v6152_v60  ;;  %v6434_v9 = vrot.slane %v12863_v52, 4  ;;  %v6732_v60 = vld [vmem:[%s13370_s28 + $0xd0] sm:$0xff] }
 0x858   :  { %10134 = vmatpush3.bf16.msra.mxu0 %v10133_v18  ;;  %9493 = vmatprep.mubr.msk.f32.mxu0 %vm11076_vm0, %v13352_v43  ;;  %v6200_v38 = vsel %vm499_vm6, %v6197_v31, %v6199_v12  ;;  %v6201_v6 = vrot.slane %v12883_v29, 2  ;;  %v6436_v46 = vrot.slane %v12867_v37, 4  ;;  %v6438_v8 = vrot.slane %v12869_v26, 4  ;;  %v6177_v18 = vld [vmem:[#allocation13 + $0x80] sm:$0xff] }
 0x859   :  { %10135 = vmatprep.subr.bf16.mxu0 %v13338_v54  ;;  %v12894_v30 = vsel %vm326_vm1, %v6433_v50, %v6434_v9  ;;  %v6440_v35 = vrot.slane %v12873_v0, 4  ;;  %v6442_v13 = vrot.slane %v12883_v29, 4  ;;  %v6444_v22 = vrot.slane %v12859_v47, 4  ;;  %v6730_v31 = vld [vmem:[%s13370_s28 + $0xc0] sm:$0xff] }
 0x85a   :  { %v6202_v23 = vsel %vm499_vm6, %v6199_v12, %v6201_v6  ;;  %v6204_v51 = vsel %vm499_vm6, %v6201_v6, %v6203_v55  ;;  %v12902_v58 = vsel %vm326_vm1, %v6434_v9, %v6436_v46  ;;  %v12905_v27 = vsel %vm326_vm1, %v6436_v46, %v6438_v8  ;;  %v6733_v12 = vld [vmem:[%s13370_s28 + $0xd8] sm:$0xff]  ;;  %v6734_v50 = vld [vmem:[%s13370_s28 + $0xe0] sm:$0xff]  ;;  %v6707_v46 = vld [vmem:[%s13370_s28 + $0x8] sm:$0xff] }
 0x85b   :  { %9494 = vmatmul.mubr.msk.f32.gmra.mrb[20].mxu0 %vm1389_vm2, %v6196_v56  ;;  %v12909_v40 = vsel %vm326_vm1, %v6438_v8, %v6440_v35  ;;  %v12912_v5 = vsel %vm326_vm1, %v6440_v35, %v6442_v13  ;;  %v12917_v4 = vsel %vm326_vm1, %v6442_v13, %v6444_v22  ;;  %v10142_v61 = vpack.c.bf16 %v6168_v21, %v6167_v53  ;;  %v6735_v56 = vld [vmem:[%s13370_s28 + $0xe8] sm:$0xff]  ;;  %v6737_v9 = vld [vmem:[%s13370_s28 + $0xf8] sm:$0xff]  ;;  %v6706_v6 = vld [vmem:[%s13370_s28] sm:$0xff] }
 0x85c   :  { %9496 = vmatprep.mubr.msk.f32.mxu0 %vm11076_vm0, %v13352_v43  ;;  %10137 = vmatpush3.bf16.msra.mxu0 %v10136_v17  ;;  %v10145_v11 = vpack.c.bf16 %v6178_v42, %v6177_v18  ;;  %v10148_v3 = vpack.c.bf16 %v6180_v7, %v6179_v1  ;;  %v6181_v17 = vld [vmem:[#allocation13 + $0xa0] sm:$0xff]  ;;  %v10154_v33 = vpack.c.bf16 %v6184_v57, %v6183_v48  ;;  %vm13368_vm1 = vmmov 1  }
 0x85d   :  { %10138 = vmatprep.subr.bf16.mxu0 %v13338_v54  ;;  %v10151_v45 = vpack.c.bf16 %v6182_v36, %v6181_v17  ;;  %vm10286_vm11 = vmpackc.low %vm1636_vm14, %vm13368_vm1  ;;  %v13369_v59 = vpack.c.bf16 %v12435_v2, %v12433_v20  ;;  %v6722_v20 = vld [vmem:[%s13370_s28 + $0x80] sm:$0xff]  ;;  %v6723_v2 = vld [vmem:[%s13370_s28 + $0x88] sm:$0xff]  ;;  %v13024_v8 = vpack.c.bf16 %v6707_v46, %v6706_v6  ;;  %vm6603_vm14 = vcmp.eq.s32.totalorder %v12272_v63, 1 }
 0x85e   :  { %v10156_v15 = vpack.c.bf16 %v6723_v2, %v6722_v20  ;;  %vm6604_vm13 = vcmp.eq.s32.totalorder %v12274_v14, 1  ;;  %vm6605_vm3 = vcmp.eq.s32.totalorder %v12276_v16, 1  ;;  %v13373_v2 = vld [vmem:[#allocation46_spill] sm:$0xff] }
 0x85f   :  { %9497 = vmatmul.mubr.msk.f32.gmra.mrb[22].mxu0 %vm1389_vm2, %v6198_v28  ;;  %v10180_v28 = vpack.c.bf16 %v6735_v56, %v6734_v50  ;;  %vm6608_vm12 = vcmp.eq.s32.totalorder %v13373_v2, 1 }
 0x860   :  { %9499 = vmatprep.mubr.msk.f32.mxu0 %vm11076_vm0, %v13352_v43  ;;  %10140 = vmatpush3.bf16.msra.mxu0 %v10139_v49 }
 0x861   :  { %10141 = vmatprep.subr.bf16.mxu0 %v13338_v54  ;;  %10157 = vmatprep.subr.bf16.mxu1 %v10156_v15 }
 0x862   :  { %10159 = vmatpush3.bf16.msra.mxu1 %v10156_v15 }
 0x863   :  { %9500 = vmatmul.mubr.msk.f32.gmra.mrb[24].mxu0 %vm1389_vm2, %v6200_v38 }
 0x864   :  { %9502 = vmatprep.mubr.msk.f32.mxu0 %vm11076_vm0, %v13352_v43  ;;  %10143 = vmatpush3.bf16.msra.mxu0 %v10142_v61 }
 0x865   :  { %10144 = vmatprep.subr.bf16.mxu0 %v13338_v54 }
 0x867   :  { %9503 = vmatmul.mubr.msk.f32.gmra.mrb[26].mxu0 %vm1389_vm2, %v6202_v23 }
 0x868   :  { %9505 = vmatprep.mubr.msk.f32.mxu0 %vm11076_vm0, %v13352_v43 }
 0x86b   :  { %9506 = vmatmul.mubr.msk.f32.gmra.mrb[28].mxu0 %vm1389_vm2, %v6204_v51 }
 0x86c   :  { %9508 = vmatprep.mubr.msk.f32.mxu0 %vm11076_vm0, %v13352_v43 }
 0x86f   :  { %9509 = vmatmul.mubr.msk.f32.gmra.mrb[30].mxu0 %vm1389_vm2, %v6203_v55  ;;  %v10176_v55 = vpack.c.bf16 %v6733_v12, %v6732_v60 }
 0x870   :  { %9527 = vmatprep.mubr.msk.f32.mxu0 %vm11076_vm0, %v13352_v43 }
 0x873   :  { %9528 = vmatmul.mubr.msk.f32.vlgmr.msra.gmra.mrb[18].mxu0 %vm1389_vm2, %v12861_v41  ;;  %v6724_v41 = vld [vmem:[%s13370_s28 + $0x90] sm:$0xff] }
 0x874   :  { %10146 = vmatpush3.bf16.msra.mxu0 %v10145_v11  ;;  %9530 = vmatprep.mubr.msk.f32.mxu0 %vm11076_vm0, %v13352_v43  ;;  %v13371_v11 = vld [vmem:[#allocation44_spill] sm:$0xff] }
 0x875   :  { %10147 = vmatprep.subr.bf16.mxu0 %v13338_v54  ;;  %vm6606_vm5 = vcmp.eq.s32.totalorder %v13371_v11, 1 }
 0x877   :  { %9531 = vmatmul.mubr.msk.f32.gmra.mrb[20].mxu0 %vm1389_vm2, %v12863_v52  ;;  %v6725_v52 = vld [vmem:[%s13370_s28 + $0x98] sm:$0xff] }
 0x878   :  { %9533 = vmatprep.mubr.msk.f32.mxu0 %vm11076_vm0, %v13352_v43  ;;  %10149 = vmatpush3.bf16.msra.mxu0 %v10148_v3  ;;  %v10160_v34 = vpack.c.bf16 %v6725_v52, %v6724_v41 }
 0x879   :  { %10150 = vmatprep.subr.bf16.mxu0 %v13338_v54 }
 0x87a   :  { %10161 = vmatprep.subr.bf16.mxu1 %v10160_v34 }
 0x87b   :  { %9534 = vmatmul.mubr.msk.f32.gmra.mrb[22].mxu0 %vm1389_vm2, %v12867_v37  ;;  %10163 = vmatpush3.bf16.msra.mxu1 %v10160_v34  ;;  %v6728_v37 = vld [vmem:[%s13370_s28 + $0xb0] sm:$0xff] }
 0x87c   :  { %9536 = vmatprep.mubr.msk.f32.mxu0 %vm11076_vm0, %v13352_v43  ;;  %10152 = vmatpush3.bf16.msra.mxu0 %v10151_v45  ;;  %v13372_v45 = vld [vmem:[#allocation45_spill] sm:$0xff] }
 0x87d   :  { %10153 = vmatprep.subr.bf16.mxu0 %v13338_v54  ;;  %vm6607_vm7 = vcmp.eq.s32.totalorder %v13372_v45, 1 }
 0x87f   :  { %9537 = vmatmul.mubr.msk.f32.gmra.mrb[24].mxu0 %vm1389_vm2, %v12869_v26  ;;  %v6729_v26 = vld [vmem:[%s13370_s28 + $0xb8] sm:$0xff] }
 0x880   :  { %9539 = vmatprep.mubr.msk.f32.mxu0 %vm11076_vm0, %v13352_v43  ;;  %10155 = vmatpush3.bf16.msra.mxu0 %v10154_v33  ;;  %v10168_v24 = vpack.c.bf16 %v6729_v26, %v6728_v37 }
 0x881   :  { %10284 = vmatprep.subr.bf16.mxu0 %v13338_v54 }
 0x883   :  { %9540 = vmatmul.mubr.msk.f32.gmra.mrb[26].mxu0 %vm1389_vm2, %v12873_v0  ;;  %v6731_v0 = vld [vmem:[%s13370_s28 + $0xc8] sm:$0xff] }
 0x884   :  { %9542 = vmatprep.mubr.msk.f32.mxu0 %vm11076_vm0, %v13352_v43  ;;  %v10172_v10 = vpack.c.bf16 %v6731_v0, %v6730_v31 }
 0x887   :  { %9543 = vmatmul.mubr.msk.f32.gmra.mrb[28].mxu0 %vm1389_vm2, %v12883_v29  ;;  %v6736_v29 = vld [vmem:[%s13370_s28 + $0xf0] sm:$0xff] }
 0x888   :  { %9545 = vmatprep.mubr.msk.f32.mxu0 %vm11076_vm0, %v13352_v43  ;;  %v10184_v38 = vpack.c.bf16 %v6737_v9, %v6736_v29 }
 0x88b   :  { %9546 = vmatmul.mubr.msk.f32.gmra.mrb[30].mxu0 %vm1389_vm2, %v12859_v47  ;;  %v6726_v47 = vld [vmem:[%s13370_s28 + $0xa0] sm:$0xff] }
 0x88c   :  { %9564 = vmatprep.mubr.msk.f32.mxu0 %vm11076_vm0, %v13352_v43  ;;  %v10164_v25 = vpack.c.bf16 %v6727_v39, %v6726_v47 }
 0x88e   :  { %10165 = vmatprep.subr.bf16.mxu1 %v10164_v25 }
 0x88f   :  { %9565 = vmatmul.mubr.msk.f32.vlgmr.msra.gmra.mrb[18].mxu0 %vm1389_vm2, %v12894_v30  ;;  %10167 = vmatpush3.bf16.msra.mxu1 %v10164_v25 }
 0x890   :  { %10287 = vmatpush3.bf16.msk.msra.mxu0 %vm10286_vm11, %v13369_v59  ;;  %9567 = vmatprep.mubr.msk.f32.mxu0 %vm11076_vm0, %v13352_v43 }
 0x891   :  { %10288 = vmatprep.subr.bf16.mxu0 %v13338_v54  ;;  %10169 = vmatprep.subr.bf16.mxu1 %v10168_v24 }
 0x893   :  { %9568 = vmatmul.mubr.msk.f32.gmra.mrb[20].mxu0 %vm1389_vm2, %v12902_v58  ;;  %10171 = vmatpush3.bf16.msra.mxu1 %v10168_v24 }
 0x894   :  { %9570 = vmatprep.mubr.msk.f32.mxu0 %vm11076_vm0, %v13352_v43  ;;  %10173 = vmatprep.subr.bf16.mxu1 %v10172_v10 }
 0x897   :  { %9571 = vmatmul.mubr.msk.f32.gmra.mrb[22].mxu0 %vm1389_vm2, %v12905_v27  ;;  %10175 = vmatpush3.bf16.msra.mxu1 %v10172_v10 }
 0x898   :  { %9573 = vmatprep.mubr.msk.f32.mxu0 %vm11076_vm0, %v13352_v43  ;;  %10177 = vmatprep.subr.bf16.mxu1 %v10176_v55 }
 0x89b   :  { %9574 = vmatmul.mubr.msk.f32.gmra.mrb[24].mxu0 %vm1389_vm2, %v12909_v40  ;;  %10179 = vmatpush3.bf16.msra.mxu1 %v10176_v55 }
 0x89c   :  { %9576 = vmatprep.mubr.msk.f32.mxu0 %vm11076_vm0, %v13352_v43  ;;  %10181 = vmatprep.subr.bf16.mxu1 %v10180_v28 }
 0x89f   :  { %9577 = vmatmul.mubr.msk.f32.gmra.mrb[26].mxu0 %vm1389_vm2, %v12912_v5  ;;  %10183 = vmatpush3.bf16.msra.mxu1 %v10180_v28 }
 0x8a0   :  { %9579 = vmatprep.mubr.msk.f32.mxu0 %vm11076_vm0, %v13352_v43  ;;  %10185 = vmatprep.subr.bf16.mxu1 %v10184_v38 }
 0x8a3   :  { %9580 = vmatmul.mubr.msk.f32.gmra.mrb[28].mxu0 %vm1389_vm2, %v12917_v4  ;;  %10187 = vmatpush3.bf16.msra.mxu1 %v10184_v38 }
 0x8a4   :  { %9582 = vmatprep.mubr.msk.f32.mxu0 %vm11076_vm0, %v13352_v43  ;;  %10189 = vmatprep.subr.bf16.mxu1 %v13024_v8 }
 0x8a7   :  { %9583 = vmatmul.mubr.msk.f32.gmra.mrb[30].mxu0 %vm1389_vm2, %v6444_v22  ;;  %vm6602_vm2 = vcmp.eq.s32.totalorder %v12270_v62, 1 }
 0x8a8   :  { %9753 = vmatprep.mubr.msk.f32.mxu0 %vm11076_vm0, %v13352_v43 }
 0x962   :  { %v13028_v32 = vpop.f32.mrb[18].mxu0 }
 0x963   :  { %v6609_v19 = vsel %vm6602_vm2, %v13028_v32, 0.0  ;;  %v9566_v30 = vpop.f32.mrb[19].mxu0 }
 0x964   :  { %v6630_v23 = vmul.f32 %v6609_v19, %v6609_v19 }
 0x966   :  { %v13032_v35 = vpop.f32.mrb[20].mxu0 }
 0x967   :  { %v6610_v13 = vsel %vm6603_vm14, %v13032_v35, 0.0  ;;  %v9569_v22 = vpop.f32.mrb[21].mxu0 }
 0x968   :  { %v6616_v51 = vadd.f32 %v6610_v13, %v6609_v19  ;;  %v6631_v58 = vmul.f32 %v6610_v13, %v6610_v13  ;;  %v6656_v22 = vld [vmem:[%s13374_s1] sm:$0x1] }
 0x96a   :  { %v6637_v27 = vadd.f32 %v6631_v58, %v6630_v23  ;;  %v13036_v40 = vpop.f32.mrb[22].mxu0  ;;  %v6658_v58 = vld [vmem:[%s13375_s21] sm:$0x1] }
 0x96b   :  { %v6611_v62 = vsel %vm6604_vm13, %v13036_v40, 0.0  ;;  %v9572_v5 = vpop.f32.mrb[23].mxu0 }
 0x96c   :  { %v6617_v4 = vadd.f32 %v6616_v51, %v6611_v62  ;;  %v6632_v49 = vmul.f32 %v6611_v62, %v6611_v62 }
 0x96e   :  { %v6638_v63 = vadd.f32 %v6637_v27, %v6632_v49  ;;  %v6541_v53 = vpop.f32.mrb[24].mxu0 }
 0x96f   :  { %v6612_v21 = vsel %vm6605_vm3, %v6541_v53, 0.0  ;;  %v9575_v61 = vpop.f32.mrb[25].mxu0 }
 0x970   :  { %v6618_v18 = vadd.f32 %v6617_v4, %v6612_v21  ;;  %v6633_v42 = vmul.f32 %v6612_v21, %v6612_v21  ;;  %v6708_v21 = vld [vmem:[%s13370_s28 + $0x10] sm:$0xff]  ;;  %v6709_v61 = vld [vmem:[%s13370_s28 + $0x18] sm:$0xff] }
 0x972   :  { %v6639_v1 = vadd.f32 %v6638_v63, %v6633_v42  ;;  %v6546_v14 = vpop.f32.mrb[26].mxu0 }
 0x973   :  { %v6613_v7 = vsel %vm6606_vm5, %v6546_v14, 0.0  ;;  %v9578_v3 = vpop.f32.mrb[27].mxu0 }
 0x974   :  { %v6619_v17 = vadd.f32 %v6618_v18, %v6613_v7  ;;  %v6634_v36 = vmul.f32 %v6613_v7, %v6613_v7  ;;  %v6710_v3 = vld [vmem:[%s13370_s28 + $0x20] sm:$0xff] }
 0x976   :  { %v6640_v48 = vadd.f32 %v6639_v1, %v6634_v36  ;;  %v6551_v57 = vpop.f32.mrb[28].mxu0  ;;  %v13056_v36 = vpack.c.bf16 %v6709_v61, %v6708_v21 }
 0x977   :  { %v6614_v33 = vsel %vm6607_vm7, %v6551_v57, 0.0  ;;  %v9581_v16 = vpop.f32.mrb[29].mxu0 }
 0x978   :  { %v6620_v59 = vadd.f32 %v6619_v17, %v6614_v33  ;;  %v6635_v20 = vmul.f32 %v6614_v33, %v6614_v33  ;;  %v6711_v17 = vld [vmem:[%s13370_s28 + $0x28] sm:$0xff] }
 0x97a   :  { %v6641_v15 = vadd.f32 %v6640_v48, %v6635_v20  ;;  %v6556_v41 = vpop.f32.mrb[30].mxu0  ;;  %v13058_v20 = vpack.c.bf16 %v6711_v17, %v6710_v3 }
 0x97b   :  { %v6615_v52 = vsel %vm6608_vm12, %v6556_v41, 0.0  ;;  %v9584_v34 = vpop.f32.mrb[31].mxu0 }
 0x97c   :  { %v6621_v47 = vsel %vm2717_vm15, %v6615_v52, 0.0  ;;  %v6636_v39 = vmul.f32 %v6615_v52, %v6615_v52 }
 0x97d   :  { %v6622_v25 = vadd.f32 %v6621_v47, %v6620_v59 }
 0x97e   :  { %v6642_v37 = vsel %vm2717_vm15, %v6636_v39, 0.0 }
 0x97f   :  { %v6623_v26 = vrot.slane %v6622_v25, 4  ;;  %v6643_v24 = vadd.f32 %v6642_v37, %v6641_v15 }
 0x981   :  { %v6624_v31 = vadd.f32 %v6623_v26, %v6622_v25  ;;  %v6644_v0 = vrot.slane %v6643_v24, 4 }
 0x983   :  { %v6625_v60 = vrot.slane %v6624_v31, 2  ;;  %v6645_v10 = vadd.f32 %v6644_v0, %v6643_v24 }
 0x985   :  { %v6626_v12 = vadd.f32 %v6625_v60, %v6624_v31  ;;  %v6646_v55 = vrot.slane %v6645_v10, 2 }
 0x987   :  { %v6627_v50 = vrot.slane %v6626_v12, 1  ;;  %v6647_v56 = vadd.f32 %v6646_v55, %v6645_v10 }
 0x989   :  { %v6628_v28 = vadd.f32 %v6627_v50, %v6626_v12  ;;  %v6648_v29 = vrot.slane %v6647_v56, 1 }
 0x98b   :  { %v6629_v9 = vmul.f32 0.125, %v6628_v28  ;;  %v6649_v38 = vadd.f32 %v6648_v29, %v6647_v56 }
 0x98d   :  { %v6650_v6 = vmul.f32 0.125, %v6649_v38  ;;  %v6651_v46 = vmul.f32 %v6629_v9, %v6629_v9 }
 0x98f   :  { %v6652_v19 = vsub.f32 %v6650_v6, %v6651_v46 }
 0x991   :  { %v6653_v30 = vmax.f32 %v6652_v19, 0.0 }
 0x993   :  { %v6654_v13 = vadd.f32 1e-05, %v6653_v30 }
 0x995   :  { %10756 = vrsqrt.f32 %v6654_v13 }
 0x99f   :  { %v10757_v23 = vpop.eup %10756 }
 0x9a0   :  { %v6657_v51 = vmul.f32 %v10757_v23, %v6656_v22 }
 0x9a2   :  { %v6659_v27 = vmul.f32 %v6657_v51, %v6629_v9  ;;  %v6664_v62 = vrot.slane %v6657_v51, %v13329_v44 }
 0x9a4   :  { %v6660_v5 = vsub.f32 %v6658_v58, %v6659_v27  ;;  %v6671_v4 = vmul.f32 %v6664_v62, %v6556_v41  ;;  %v6665_v49 = vmul.f32 %v6664_v62, %v13028_v32  ;;  %v6666_v63 = vmul.f32 %v6664_v62, %v13032_v35  ;;  %v6712_v27 = vld [vmem:[%s13370_s28 + $0x30] sm:$0xff] }
 0x9a5   :  { %v6667_v18 = vmul.f32 %v6664_v62, %v13036_v40  ;;  %v6668_v42 = vmul.f32 %v6664_v62, %v6541_v53  ;;  %v6669_v11 = vmul.f32 %v6664_v62, %v6546_v14  ;;  %v6670_v1 = vmul.f32 %v6664_v62, %v6551_v57  ;;  %v6713_v62 = vld [vmem:[%s13370_s28 + $0x38] sm:$0xff] }
 0x9a6   :  { %v6676_v7 = vrot.slane %v6660_v5, %v13329_v44  ;;  %v10200_v3 = vpack.c.bf16 %v6713_v62, %v6712_v27  ;;  %v6758_v62 = vld [vmem:[%s13370_s28 + $0x1a0] sm:$0xff] }
 0x9a8   :  { %v6684_v45 = vadd.f32 %v6676_v7, %v6671_v4  ;;  %v6678_v48 = vadd.f32 %v6676_v7, %v6665_v49  ;;  %v6679_v33 = vadd.f32 %v6676_v7, %v6666_v63  ;;  %v6680_v16 = vadd.f32 %v6676_v7, %v6667_v18 }
 0x9a9   :  { %v6681_v32 = vadd.f32 %v6676_v7, %v6668_v42  ;;  %v6682_v59 = vadd.f32 %v6676_v7, %v6669_v11  ;;  %v6683_v35 = vadd.f32 %v6676_v7, %v6670_v1 }
 0x9aa   :  { %vm6691_vm15 = vcmp.gt.f32.partialorder %v6684_v45, 0.0  ;;  %v6698_v40 = vmul.f32 0.2, %v6684_v45  ;;  %vm6685_vm10 = vcmp.gt.f32.partialorder %v6678_v48, 0.0  ;;  %vm6686_vm8 = vcmp.gt.f32.partialorder %v6679_v33, 0.0 }
 0x9ab   :  { %v6692_v53 = vmul.f32 0.2, %v6678_v48  ;;  %v6693_v14 = vmul.f32 0.2, %v6679_v33  ;;  %vm6687_vm11 = vcmp.gt.f32.partialorder %v6680_v16, 0.0  ;;  %vm6688_vm2 = vcmp.gt.f32.partialorder %v6681_v32, 0.0 }
 0x9ac   :  { %v6694_v57 = vmul.f32 0.2, %v6680_v16  ;;  %v6695_v2 = vmul.f32 0.2, %v6681_v32  ;;  %vm6689_vm14 = vcmp.gt.f32.partialorder %v6682_v59, 0.0  ;;  %vm6690_vm13 = vcmp.gt.f32.partialorder %v6683_v35, 0.0 }
 0x9ad   :  { %v6699_v15 = vsel %vm6685_vm10, %v6678_v48, %v6692_v53  ;;  %v13060_v41 = vsel %vm6686_vm8, %v6679_v33, %v6693_v14  ;;  %v6696_v52 = vmul.f32 0.2, %v6682_v59  ;;  %v6697_v34 = vmul.f32 0.2, %v6683_v35  ;;  %v6714_v48 = vld [vmem:[%s13370_s28 + $0x40] sm:$0xff]  ;;  %v6715_v33 = vld [vmem:[%s13370_s28 + $0x48] sm:$0xff] }
 0x9ae   :  { %v6776_v47 = vrot.slane %v6699_v15, 1  ;;  %v6777_v39 = vrot.slane %v13060_v41, 1  ;;  %v13063_v25 = vsel %vm6687_vm11, %v6680_v16, %v6694_v57  ;;  %v13065_v37 = vsel %vm6688_vm2, %v6681_v32, %v6695_v2  ;;  %v6716_v32 = vld [vmem:[%s13370_s28 + $0x50] sm:$0xff]  ;;  %v6719_v53 = vld [vmem:[%s13370_s28 + $0x68] sm:$0xff] }
 0x9af   :  { %v6779_v26 = vrot.slane %v13063_v25, 1  ;;  %v6781_v24 = vrot.slane %v13065_v37, 1  ;;  %v13069_v31 = vsel %vm6689_vm14, %v6682_v59, %v6696_v52  ;;  %v13071_v0 = vsel %vm6690_vm13, %v6683_v35, %v6697_v34  ;;  %v6717_v59 = vld [vmem:[%s13370_s28 + $0x58] sm:$0xff]  ;;  %v6720_v57 = vld [vmem:[%s13370_s28 + $0x70] sm:$0xff]  ;;  %v6739_v52 = vld [vmem:[%s13370_s28 + $0x108] sm:$0xff] }
 0x9b0   :  { %v6778_v60 = vsel %vm313_vm4, %v6776_v47, %v6777_v39  ;;  %v6783_v10 = vrot.slane %v13069_v31, 1  ;;  %v6785_v12 = vrot.slane %v13071_v0, 1  ;;  %v6984_v55 = vrot.slane %v6699_v15, 2  ;;  %v6740_v47 = vld [vmem:[%s13370_s28 + $0x110] sm:$0xff] }
 0x9b1   :  { %9617 = vmatprep.mubr.f32.mxu1 %v6778_v60  ;;  %v6780_v50 = vsel %vm313_vm4, %v6777_v39, %v6779_v26  ;;  %v6782_v56 = vsel %vm313_vm4, %v6779_v26, %v6781_v24  ;;  %v6985_v28 = vrot.slane %v13060_v41, 2  ;;  %v6987_v29 = vrot.slane %v13063_v25, 2  ;;  %v6741_v39 = vld [vmem:[%s13370_s28 + $0x118] sm:$0xff]  ;;  %v6743_v60 = vld [vmem:[%s13370_s28 + $0x128] sm:$0xff] }
 0x9b2   :  { %9618 = vmatmul.mubr.f32.vlgmr.msra.gmra.mrb[38].mxu1 %v6780_v50  ;;  %v6784_v9 = vsel %vm313_vm4, %v6781_v24, %v6783_v10  ;;  %v6786_v38 = vsel %vm313_vm4, %v6783_v10, %v6785_v12  ;;  %v6989_v6 = vrot.slane %v13065_v37, 2  ;;  %v6991_v46 = vrot.slane %v13069_v31, 2  ;;  %v6742_v24 = vld [vmem:[%s13370_s28 + $0x120] sm:$0xff] }
 0x9b3   :  { %10191 = vmatpush3.bf16.msra.mxu1 %v13024_v8  ;;  %9620 = vmatprep.mubr.f32.mxu1 %v6782_v56  ;;  %v13086_v19 = vsel %vm499_vm6, %v6984_v55, %v6985_v28  ;;  %v13089_v30 = vsel %vm499_vm6, %v6985_v28, %v6987_v29  ;;  %v6993_v13 = vrot.slane %v13071_v0, 2  ;;  %v6705_v22 = vsel %vm6691_vm15, %v6684_v45, %v6698_v40  ;;  %v6718_v40 = vld [vmem:[%s13370_s28 + $0x60] sm:$0xff]  ;;  %v6745_v55 = vld [vmem:[%s13370_s28 + $0x138] sm:$0xff] }
 0x9b4   :  { %10193 = vmatprep.subr.bf16.mxu1 %v13056_v36  ;;  %v13095_v23 = vsel %vm499_vm6, %v6987_v29, %v6989_v6  ;;  %v13098_v51 = vsel %vm499_vm6, %v6989_v6, %v6991_v46  ;;  %v6995_v8 = vrot.slane %v6705_v22, 2  ;;  %v7104_v58 = vrot.slane %v6699_v15, 3  ;;  %v6746_v56 = vld [vmem:[%s13370_s28 + $0x140] sm:$0xff]  ;;  %v6753_v6 = vld [vmem:[%s13370_s28 + $0x178] sm:$0xff] }
 0x9b5   :  { %v13103_v5 = vsel %vm499_vm6, %v6991_v46, %v6993_v13  ;;  %v7105_v4 = vrot.slane %v13060_v41, 3  ;;  %v7107_v49 = vrot.slane %v13063_v25, 3  ;;  %v7109_v63 = vrot.slane %v13065_v37, 3  ;;  %v6750_v29 = vld [vmem:[%s13370_s28 + $0x160] sm:$0xff] }
 0x9b6   :  { %9621 = vmatmul.mubr.f32.gmra.mrb[40].mxu1 %v6784_v9  ;;  %v13109_v21 = vsel %vm499_vm6, %v6993_v13, %v6995_v8  ;;  %v7111_v61 = vrot.slane %v13069_v31, 3  ;;  %v7113_v18 = vrot.slane %v13071_v0, 3  ;;  %v7115_v42 = vrot.slane %v6705_v22, 3  ;;  %v6751_v9 = vld [vmem:[%s13370_s28 + $0x168] sm:$0xff]  ;;  %v6756_v8 = vld [vmem:[%s13370_s28 + $0x190] sm:$0xff] }
 0x9b7   :  { %10195 = vmatpush3.bf16.msra.mxu1 %v13056_v36  ;;  %9623 = vmatprep.mubr.f32.mxu1 %v6786_v38  ;;  %v13115_v11 = vsel %vm875_vm9, %v7104_v58, %v7105_v4  ;;  %v13118_v1 = vsel %vm875_vm9, %v7105_v4, %v7107_v49  ;;  %v13121_v7 = vsel %vm875_vm9, %v7107_v49, %v7109_v63  ;;  %v6752_v38 = vld [vmem:[%s13370_s28 + $0x170] sm:$0xff]  ;;  %v6755_v13 = vld [vmem:[%s13370_s28 + $0x188] sm:$0xff]  ;;  %v6757_v58 = vld [vmem:[%s13370_s28 + $0x198] sm:$0xff]  ;;  %vm7349_vm6 = vcmask 89088  }
 0x9b8   :  { %10197 = vmatprep.subr.bf16.mxu1 %v13058_v20  ;;  %v13125_v17 = vsel %vm875_vm9, %v7109_v63, %v7111_v61  ;;  %v13128_v36 = vsel %vm875_vm9, %v7111_v61, %v7113_v18  ;;  %v13131_v45 = vsel %vm875_vm9, %v7113_v18, %v7115_v42  ;;  %v10204_v16 = vpack.c.bf16 %v6715_v33, %v6714_v48  ;;  %v6759_v4 = vld [vmem:[%s13370_s28 + $0x1a8] sm:$0xff]  ;;  %v6760_v63 = vld [vmem:[%s13370_s28 + $0x1b0] sm:$0xff]  ;;  %v6761_v61 = vld [vmem:[%s13370_s28 + $0x1b8] sm:$0xff] }
 0x9b9   :  { %v10208_v35 = vpack.c.bf16 %v6717_v59, %v6716_v32  ;;  %v10212_v14 = vpack.c.bf16 %v6719_v53, %v6718_v40  ;;  %v10224_v26 = vpack.c.bf16 %v6741_v39, %v6740_v47  ;;  %v10228_v10 = vpack.c.bf16 %v6743_v60, %v6742_v24  ;;  %v6762_v42 = vld [vmem:[%s13370_s28 + $0x1c0] sm:$0xff]  ;;  %v6767_v33 = vld [vmem:[%s13370_s28 + $0x1e8] sm:$0xff]  ;;  %v6768_v32 = vld [vmem:[%s13370_s28 + $0x1f0] sm:$0xff] }
 0x9ba   :  { %9624 = vmatmul.mubr.f32.gmra.mrb[42].mxu1 %v6785_v12  ;;  %v6744_v12 = vld [vmem:[%s13370_s28 + $0x130] sm:$0xff]  ;;  %v10248_v46 = vpack.c.bf16 %v6753_v6, %v6752_v38  ;;  %v10256_v27 = vpack.c.bf16 %v6757_v58, %v6756_v8  ;;  %v10260_v49 = vpack.c.bf16 %v6759_v4, %v6758_v62  ;;  %v10264_v18 = vpack.c.bf16 %v6761_v61, %v6760_v63  ;;  %v6766_v48 = vld [vmem:[%s13370_s28 + $0x1e0] sm:$0xff]  ;;  %v6769_v59 = vld [vmem:[%s13370_s28 + $0x1f8] sm:$0xff]  ;;  %v7250_v6 = vpop.permute.xlu0 %7249 }
 0x9bb   :  { %10199 = vmatpush3.bf16.msra.mxu1 %v13058_v20  ;;  %9658 = vmatprep.mubr.f32.mxu1 %v6699_v15  ;;  %v6721_v20 = vld [vmem:[%s13370_s28 + $0x78] sm:$0xff]  ;;  %v6738_v15 = vld [vmem:[%s13370_s28 + $0x100] sm:$0xff]  ;;  %v10232_v50 = vpack.c.bf16 %v6745_v55, %v6744_v12  ;;  %v7505_v40 = vld [vmem:[#allocation15 + $0x8] sm:$0xff]  ;;  %vm7258_vm12 = vcmp.eq.s32.totalorder %v7250_v6, 1 }
 0x9bc   :  { %10201 = vmatprep.subr.bf16.mxu1 %v10200_v3  ;;  %v10216_v2 = vpack.c.bf16 %v6721_v20, %v6720_v57  ;;  %v10220_v34 = vpack.c.bf16 %v6739_v52, %v6738_v15  ;;  %v7510_v57 = vld [vmem:[#allocation15 + $0x30] sm:$0xff]  ;;  %v7511_v20 = vld [vmem:[#allocation15 + $0x38] sm:$0xff]  ;;  %v7512_v15 = vld [vmem:[#allocation15 + $0x40] sm:$0xff] }
 0x9bd   :  { %v7513_v52 = vld [vmem:[#allocation15 + $0x48] sm:$0xff]  ;;  %v7514_v47 = vld [vmem:[#allocation15 + $0x50] sm:$0xff]  ;;  %v7515_v39 = vld [vmem:[#allocation15 + $0x58] sm:$0xff] }
 0x9be   :  { %v7516_v24 = vld [vmem:[#allocation15 + $0x60] sm:$0xff]  ;;  %v7517_v60 = vld [vmem:[#allocation15 + $0x68] sm:$0xff]  ;;  %v7518_v12 = vld [vmem:[#allocation15 + $0x70] sm:$0xff] }
 0x9bf   :  { %10203 = vmatpush3.bf16.msra.mxu1 %v10200_v3  ;;  %v6764_v3 = vld [vmem:[%s13370_s28 + $0x1d0] sm:$0xff]  ;;  %v7519_v55 = vld [vmem:[#allocation15 + $0x78] sm:$0xff] }
 0x9c0   :  { %10205 = vmatprep.subr.bf16.mxu1 %v10204_v16 }
 0x9c3   :  { %10207 = vmatpush3.bf16.msra.mxu1 %v10204_v16  ;;  %v10276_v16 = vpack.c.bf16 %v6767_v33, %v6766_v48 }
 0x9c4   :  { %10209 = vmatprep.subr.bf16.mxu1 %v10208_v35 }
 0x9c7   :  { %10211 = vmatpush3.bf16.msra.mxu1 %v10208_v35  ;;  %v7504_v35 = vld [vmem:[#allocation15] sm:$0xff] }
 0x9c8   :  { %10213 = vmatprep.subr.bf16.mxu1 %v10212_v14  ;;  %v10323_v53 = vpack.c.bf16 %v7505_v40, %v7504_v35 }
 0x9cb   :  { %10215 = vmatpush3.bf16.msra.mxu1 %v10212_v14 }
 0x9cc   :  { %10217 = vmatprep.subr.bf16.mxu1 %v10216_v2 }
 0x9cf   :  { %10219 = vmatpush3.bf16.msra.mxu1 %v10216_v2  ;;  %v10332_v2 = vpack.c.bf16 %v7511_v20, %v7510_v57 }
 0x9d0   :  { %10221 = vmatprep.subr.bf16.mxu1 %v10220_v34 }
 0x9d2   :  { %9659 = vmatmul.mubr.f32.vlgmr.msra.gmra.mrb[38].mxu1 %v13060_v41  ;;  %v6747_v41 = vld [vmem:[%s13370_s28 + $0x148] sm:$0xff] }
 0x9d3   :  { %9661 = vmatprep.mubr.f32.mxu1 %v13063_v25  ;;  %10223 = vmatpush3.bf16.msra.mxu1 %v10220_v34  ;;  %v10236_v25 = vpack.c.bf16 %v6747_v41, %v6746_v56  ;;  %v10335_v34 = vpack.c.bf16 %v7513_v52, %v7512_v15  ;;  %v7247_v56 = vpop.permute.xlu1 %7246  ;;  %v13377_v41 = vld [vmem:[#allocation48_spill] sm:$0xff] }
 0x9d4   :  { %10225 = vmatprep.subr.bf16.mxu1 %v10224_v26  ;;  %vm7255_vm9 = vcmp.eq.s32.totalorder %v13377_v41, 1  ;;  %vm7257_vm7 = vcmp.eq.s32.totalorder %v7247_v56, 1 }
 0x9d6   :  { %9662 = vmatmul.mubr.f32.gmra.mrb[40].mxu1 %v13065_v37  ;;  %v6748_v37 = vld [vmem:[%s13370_s28 + $0x150] sm:$0xff] }
 0x9d7   :  { %9664 = vmatprep.mubr.f32.mxu1 %v13069_v31  ;;  %10227 = vmatpush3.bf16.msra.mxu1 %v10224_v26  ;;  %v6749_v31 = vld [vmem:[%s13370_s28 + $0x158] sm:$0xff]  ;;  %v10338_v26 = vpack.c.bf16 %v7515_v39, %v7514_v47 }
 0x9d8   :  { %10229 = vmatprep.subr.bf16.mxu1 %v10228_v10  ;;  %v10240_v28 = vpack.c.bf16 %v6749_v31, %v6748_v37  ;;  %v13378_v37 = vld [vmem:[#allocation47_spill] sm:$0xff] }
 0x9d9   :  { %vm7254_vm3 = vcmp.eq.s32.totalorder %v13378_v37, 1 }
 0x9da   :  { %9665 = vmatmul.mubr.f32.gmra.mrb[42].mxu1 %v13071_v0  ;;  %v10244_v0 = vpack.c.bf16 %v6751_v9, %v6750_v29 }
 0x9db   :  { %10231 = vmatpush3.bf16.msra.mxu1 %v10228_v10  ;;  %9699 = vmatprep.mubr.f32.mxu1 %v13086_v19  ;;  %v6754_v19 = vld [vmem:[%s13370_s28 + $0x180] sm:$0xff]  ;;  %v10341_v10 = vpack.c.bf16 %v7517_v60, %v7516_v24 }
 0x9dc   :  { %10233 = vmatprep.subr.bf16.mxu1 %v10232_v50  ;;  %v10252_v22 = vpack.c.bf16 %v6755_v13, %v6754_v19  ;;  %v13379_v19 = vld [vmem:[#allocation49_spill] sm:$0xff]  ;;  %v7253_v13 = vpop.permute.xlu1 %7252 }
 0x9dd   :  { %vm7256_vm5 = vcmp.eq.s32.totalorder %v13379_v19, 1  ;;  %vm7259_vm15 = vcmp.eq.s32.totalorder %v7253_v13, 1 }
 0x9df   :  { %10235 = vmatpush3.bf16.msra.mxu1 %v10232_v50  ;;  %v10344_v50 = vpack.c.bf16 %v7519_v55, %v7518_v12 }
 0x9e0   :  { %10237 = vmatprep.subr.bf16.mxu1 %v10236_v25 }
 0x9e3   :  { %10239 = vmatpush3.bf16.msra.mxu1 %v10236_v25 }
 0x9e4   :  { %10241 = vmatprep.subr.bf16.mxu1 %v10240_v28 }
 0x9e7   :  { %10243 = vmatpush3.bf16.msra.mxu1 %v10240_v28 }
 0x9e8   :  { %10245 = vmatprep.subr.bf16.mxu1 %v10244_v0 }
 0x9eb   :  { %10247 = vmatpush3.bf16.msra.mxu1 %v10244_v0 }
 0x9ec   :  { %10249 = vmatprep.subr.bf16.mxu1 %v10248_v46 }
 0x9ef   :  { %10251 = vmatpush3.bf16.msra.mxu1 %v10248_v46 }
 0x9f0   :  { %10253 = vmatprep.subr.bf16.mxu1 %v10252_v22 }
 0x9f2   :  { %9700 = vmatmul.mubr.f32.vlgmr.msra.gmra.mrb[38].mxu1 %v13089_v30  ;;  %v6763_v30 = vld [vmem:[%s13370_s28 + $0x1c8] sm:$0xff] }
 0x9f3   :  { %9702 = vmatprep.mubr.f32.mxu1 %v13095_v23  ;;  %10255 = vmatpush3.bf16.msra.mxu1 %v10252_v22  ;;  %v10268_v23 = vpack.c.bf16 %v6763_v30, %v6762_v42 }
 0x9f4   :  { %10257 = vmatprep.subr.bf16.mxu1 %v10256_v27 }
 0x9f6   :  { %9703 = vmatmul.mubr.f32.gmra.mrb[40].mxu1 %v13098_v51  ;;  %v6765_v51 = vld [vmem:[%s13370_s28 + $0x1d8] sm:$0xff] }
 0x9f7   :  { %9705 = vmatprep.mubr.f32.mxu1 %v13103_v5  ;;  %10259 = vmatpush3.bf16.msra.mxu1 %v10256_v27  ;;  %v10272_v5 = vpack.c.bf16 %v6765_v51, %v6764_v3 }
 0x9f8   :  { %10261 = vmatprep.subr.bf16.mxu1 %v10260_v49 }
 0x9fa   :  { %9706 = vmatmul.mubr.f32.gmra.mrb[42].mxu1 %v13109_v21  ;;  %v10280_v21 = vpack.c.bf16 %v6769_v59, %v6768_v32 }
 0x9fb   :  { %10263 = vmatpush3.bf16.msra.mxu1 %v10260_v49  ;;  %9740 = vmatprep.mubr.f32.mxu1 %v13115_v11  ;;  %v7348_v11 = vld [vmem:[%s13376_s30] sm:$0x3] }
 0x9fc   :  { %10265 = vmatprep.subr.bf16.mxu1 %v10264_v18  ;;  %9754 = vmatmul.mubr.msk.f32.vlgmr.msra.gmra.mrb[32].mxu0 %vm7349_vm6, %v7348_v11  ;;  %vm10296_vm6 = vmpackc.low %vm313_vm4, %vm13368_vm1 }
 0x9fd   :  { %9768 = vmatprep.mubr.msk.f32.mxu0 %vm11076_vm0, %v13352_v43 }
 0x9ff   :  { %10267 = vmatpush3.bf16.msra.mxu1 %v10264_v18 }
 0xa00   :  { %10269 = vmatprep.subr.bf16.mxu1 %v10268_v23 }
 0xa03   :  { %10271 = vmatpush3.bf16.msra.mxu1 %v10268_v23 }
 0xa04   :  { %10273 = vmatprep.subr.bf16.mxu1 %v10272_v5 }
 0xa07   :  { %10275 = vmatpush3.bf16.msra.mxu1 %v10272_v5 }
 0xa08   :  { %10277 = vmatprep.subr.bf16.mxu1 %v10276_v16 }
 0xa0b   :  { %10279 = vmatpush3.bf16.msra.mxu1 %v10276_v16 }
 0xa0c   :  { %10281 = vmatprep.subr.bf16.mxu1 %v10280_v21 }
 0xa0f   :  { %10283 = vmatpush3.bf16.msra.mxu1 %v10280_v21 }
 0xa10   :  { %10322 = vmatprep.subr.bf16.mxu1 %v13338_v54 }
 0xa12   :  { %9741 = vmatmul.mubr.f32.vlgmr.msra.gmra.mrb[38].mxu1 %v13118_v1  ;;  %v7506_v1 = vld [vmem:[#allocation15 + $0x10] sm:$0xff] }
 0xa13   :  { %9743 = vmatprep.mubr.f32.mxu1 %v13121_v7  ;;  %v7507_v7 = vld [vmem:[#allocation15 + $0x18] sm:$0xff]  ;;  %10324 = vmatpush3.bf16.msra.mxu1 %v10323_v53 }
 0xa14   :  { %10325 = vmatprep.subr.bf16.mxu1 %v13338_v54 }
 0xa16   :  { %9744 = vmatmul.mubr.f32.gmra.mrb[40].mxu1 %v13125_v17  ;;  %v10326_v17 = vpack.c.bf16 %v7507_v7, %v7506_v1 }
 0xa17   :  { %9746 = vmatprep.mubr.f32.mxu1 %v13128_v36  ;;  %v7508_v36 = vld [vmem:[#allocation15 + $0x20] sm:$0xff] }
 0xa18   :  { %10327 = vmatpush3.bf16.msra.mxu1 %v10326_v17 }
 0xa19   :  { %10328 = vmatprep.subr.bf16.mxu1 %v13338_v54 }
 0xa1a   :  { %9747 = vmatmul.mubr.f32.gmra.mrb[42].mxu1 %v13131_v45  ;;  %v7509_v45 = vld [vmem:[#allocation15 + $0x28] sm:$0xff] }
 0xa1b   :  { %9838 = vmatprep.mubr.msk.f32.mxu1 %vm11076_vm0, %v13352_v43  ;;  %v10329_v14 = vpack.c.bf16 %v7509_v45, %v7508_v36 }
 0xa1d   :  { %10330 = vmatpush3.bf16.msra.mxu1 %v10329_v14 }
 0xa1e   :  { %10331 = vmatprep.subr.bf16.mxu1 %v13338_v54 }
 0xa21   :  { %10333 = vmatpush3.bf16.msra.mxu1 %v10332_v2 }
 0xa22   :  { %10334 = vmatprep.subr.bf16.mxu1 %v13338_v54 }
 0xa25   :  { %10336 = vmatpush3.bf16.msra.mxu1 %v10335_v34 }
 0xa26   :  { %10337 = vmatprep.subr.bf16.mxu1 %v13338_v54 }
 0xa29   :  { %10339 = vmatpush3.bf16.msra.mxu1 %v10338_v26  ;;  %v7303_v26 = vld [vmem:[%s13380_s14] sm:$0x1] }
 0xa2a   :  { %10340 = vmatprep.subr.bf16.mxu1 %v13338_v54 }
 0xa2d   :  { %10342 = vmatpush3.bf16.msra.mxu1 %v10341_v10  ;;  %v7305_v10 = vld [vmem:[%s13381_s2] sm:$0x1] }
 0xa2e   :  { %10343 = vmatprep.subr.bf16.mxu1 %v13338_v54 }
 0xa31   :  { %10345 = vmatpush3.bf16.msra.mxu1 %v10344_v50 }
 0xae5   :  { %v13205_v25 = vpop.f32.mrb[38].mxu1 }
 0xae6   :  { %v7261_v31 = vsel %vm7255_vm9, %v13205_v25, 0.0  ;;  %v7189_v28 = vpop.f32.mrb[39].mxu1  ;;  %vm7427_vm9 = vcmask 384000  }
 0xae7   :  { %v7280_v29 = vmul.f32 %v7261_v31, %v7261_v31  ;;  %v7260_v9 = vsel %vm7254_vm3, %v7189_v28, 0.0 }
 0xae8   :  { %v7266_v0 = vadd.f32 %v7261_v31, %v7260_v9  ;;  %v7279_v38 = vmul.f32 %v7260_v9, %v7260_v9 }
 0xae9   :  { %v9745_v46 = vpop.f32.mrb[40].mxu1 }
 0xaea   :  { %v7285_v22 = vadd.f32 %v7280_v29, %v7279_v38  ;;  %v7199_v8 = vpop.f32.mrb[41].mxu1  ;;  %v7263_v58 = vsel %vm7257_vm7, %v9745_v46, 0.0 }
 0xaeb   :  { %v7262_v27 = vsel %vm7256_vm5, %v7199_v8, 0.0  ;;  %v7282_v63 = vmul.f32 %v7263_v58, %v7263_v58 }
 0xaec   :  { %v7267_v62 = vadd.f32 %v7266_v0, %v7262_v27  ;;  %v7281_v4 = vmul.f32 %v7262_v27, %v7262_v27 }
 0xaed   :  { %v9748_v49 = vpop.f32.mrb[42].mxu1 }
 0xaee   :  { %v7286_v61 = vadd.f32 %v7285_v22, %v7281_v4  ;;  %v7265_v18 = vsel %vm7259_vm15, %v9748_v49, 0.0  ;;  %v7209_v42 = vpop.f32.mrb[43].mxu1  ;;  %v7268_v30 = vadd.f32 %v7267_v62, %v7263_v58 }
 0xaef   :  { %v7284_v23 = vmul.f32 %v7265_v18, %v7265_v18  ;;  %v7264_v3 = vsel %vm7258_vm12, %v7209_v42, 0.0  ;;  %v7270_v33 = vsel %vm313_vm4, %v7265_v18, 0.0 }
 0xaf0   :  { %v7269_v51 = vadd.f32 %v7268_v30, %v7264_v3  ;;  %v7283_v5 = vmul.f32 %v7264_v3, %v7264_v3  ;;  %v7287_v48 = vadd.f32 %v7286_v61, %v7282_v63  ;;  %v7520_v3 = vld [vmem:[#allocation16] sm:$0xff] }
 0xaf1   :  { %v7289_v59 = vsel %vm313_vm4, %v7284_v23, 0.0 }
 0xaf2   :  { %v7271_v16 = vadd.f32 %v7270_v33, %v7269_v51  ;;  %v7288_v32 = vadd.f32 %v7287_v48, %v7283_v5  ;;  %v7521_v51 = vld [vmem:[#allocation16 + $0x8] sm:$0xff]  ;;  %v7426_v5 = vld [vmem:[%s13382_s4] sm:$0x3]  ;;  %v7522_v33 = vld [vmem:[#allocation16 + $0x10] sm:$0xff] }
 0xaf3   :  { %v10299_v48 = vpack.c.bf16 %v7521_v51, %v7520_v3 }
 0xaf4   :  { %v7272_v21 = vrot.slane %v7271_v16, 4  ;;  %v7290_v11 = vadd.f32 %v7289_v59, %v7288_v32  ;;  %v7524_v59 = vld [vmem:[#allocation16 + $0x20] sm:$0xff] }
 0xaf6   :  { %v7273_v35 = vadd.f32 %v7272_v21, %v7271_v16  ;;  %v7291_v40 = vrot.slane %v7290_v11, 4  ;;  %v7523_v16 = vld [vmem:[#allocation16 + $0x18] sm:$0xff]  ;;  %v7525_v21 = vld [vmem:[#allocation16 + $0x28] sm:$0xff] }
 0xaf7   :  { %v10302_v32 = vpack.c.bf16 %v7523_v16, %v7522_v33 }
 0xaf8   :  { %v7274_v1 = vrot.slane %v7273_v35, 2  ;;  %v7292_v53 = vadd.f32 %v7291_v40, %v7290_v11  ;;  %v10305_v11 = vpack.c.bf16 %v7525_v21, %v7524_v59  ;;  %v7527_v40 = vld [vmem:[#allocation16 + $0x38] sm:$0xff] }
 0xafa   :  { %v7275_v7 = vadd.f32 %v7274_v1, %v7273_v35  ;;  %v7293_v17 = vrot.slane %v7292_v53, 2  ;;  %v7526_v35 = vld [vmem:[#allocation16 + $0x30] sm:$0xff] }
 0xafb   :  { %v10308_v1 = vpack.c.bf16 %v7527_v40, %v7526_v35 }
 0xafc   :  { %v7276_v36 = vrot.slane %v7275_v7, 1  ;;  %v7294_v45 = vadd.f32 %v7293_v17, %v7292_v53  ;;  %v7528_v53 = vld [vmem:[#allocation16 + $0x40] sm:$0xff] }
 0xafe   :  { %v7277_v14 = vadd.f32 %v7276_v36, %v7275_v7  ;;  %v7295_v57 = vrot.slane %v7294_v45, 1  ;;  %v7529_v7 = vld [vmem:[#allocation16 + $0x48] sm:$0xff]  ;;  %v7530_v36 = vld [vmem:[#allocation16 + $0x50] sm:$0xff] }
 0xaff   :  { %v10311_v17 = vpack.c.bf16 %v7529_v7, %v7528_v53 }
 0xb00   :  { %v7278_v20 = vmul.f32 0.5, %v7277_v14  ;;  %v7296_v2 = vadd.f32 %v7295_v57, %v7294_v45  ;;  %v7531_v45 = vld [vmem:[#allocation16 + $0x58] sm:$0xff]  ;;  %v7532_v57 = vld [vmem:[#allocation16 + $0x60] sm:$0xff] }
 0xb01   :  { %v10314_v14 = vpack.c.bf16 %v7531_v45, %v7530_v36 }
 0xb02   :  { %v7297_v15 = vmul.f32 0.5, %v7296_v2  ;;  %v7298_v52 = vmul.f32 %v7278_v20, %v7278_v20 }
 0xb04   :  { %v7299_v34 = vsub.f32 %v7297_v15, %v7298_v52  ;;  %v7534_v15 = vld [vmem:[#allocation16 + $0x70] sm:$0xff]  ;;  %v7535_v52 = vld [vmem:[#allocation16 + $0x78] sm:$0xff] }
 0xb06   :  { %v7300_v47 = vmax.f32 %v7299_v34, 0.0  ;;  %v10320_v34 = vpack.c.bf16 %v7535_v52, %v7534_v15 }
 0xb08   :  { %v7301_v39 = vadd.f32 1e-05, %v7300_v47  ;;  %v7422_v47 = vpop.f32.mrb[32].mxu0 }
 0xb09   :  { %9839 = vmatmul.mubr.f32.vlgmr.msra.gmra.mrb[44].mxu1 %v7422_v47 }
 0xb0a   :  { %10758 = vrsqrt.f32 %v7301_v39  ;;  %v9755_v39 = vpop.f32.mrb[33].mxu0 }
 0xb14   :  { %v10759_v24 = vpop.eup %10758 }
 0xb15   :  { %v7304_v60 = vmul.f32 %v10759_v24, %v7303_v26  ;;  %v7685_v26 = vld [vmem:[#allocation18] sm:$0xff]  ;;  %v7686_v24 = vld [vmem:[#allocation18 + $0x8] sm:$0xff] }
 0xb17   :  { %v7306_v12 = vmul.f32 %v7304_v60, %v7278_v20  ;;  %v7311_v55 = vrot.slane %v7304_v60, %v13329_v44  ;;  %v7533_v20 = vld [vmem:[#allocation16 + $0x68] sm:$0xff]  ;;  %v10347_v60 = vpack.c.bf16 %v7686_v24, %v7685_v26 }
 0xb18   :  { %v10317_v2 = vpack.c.bf16 %v7533_v20, %v7532_v57 }
 0xb19   :  { %v7307_v50 = vsub.f32 %v7305_v10, %v7306_v12  ;;  %v7316_v56 = vmul.f32 %v7311_v55, %v7209_v42  ;;  %v7317_v41 = vmul.f32 %v9748_v49, %v7311_v55  ;;  %v7312_v37 = vmul.f32 %v7311_v55, %v7189_v28  ;;  %v7687_v10 = vld [vmem:[#allocation18 + $0x10] sm:$0xff]  ;;  %v7688_v12 = vld [vmem:[#allocation18 + $0x18] sm:$0xff] }
 0xb1a   :  { %v7313_v31 = vmul.f32 %v13205_v25, %v7311_v55  ;;  %v7314_v29 = vmul.f32 %v7311_v55, %v7199_v8  ;;  %v7315_v9 = vmul.f32 %v9745_v46, %v7311_v55 }
 0xb1b   :  { %v7322_v0 = vrot.slane %v7307_v50, %v13329_v44 }
 0xb1d   :  { %v7328_v38 = vadd.f32 %v7322_v0, %v7316_v56  ;;  %v7329_v6 = vadd.f32 %v7322_v0, %v7317_v41  ;;  %v7324_v19 = vadd.f32 %v7322_v0, %v7312_v37  ;;  %v7325_v13 = vadd.f32 %v7322_v0, %v7313_v31  ;;  %v7689_v41 = vld [vmem:[#allocation18 + $0x20] sm:$0xff]  ;;  %v7690_v37 = vld [vmem:[#allocation18 + $0x28] sm:$0xff] }
 0xb1e   :  { %v7326_v22 = vadd.f32 %v7322_v0, %v7314_v29  ;;  %v7327_v58 = vadd.f32 %v7322_v0, %v7315_v9  ;;  %v10350_v56 = vpack.c.bf16 %v7688_v12, %v7687_v10  ;;  %v10353_v31 = vpack.c.bf16 %v7690_v37, %v7689_v41  ;;  %v7691_v29 = vld [vmem:[#allocation18 + $0x30] sm:$0xff]  ;;  %v7692_v9 = vld [vmem:[#allocation18 + $0x38] sm:$0xff] }
 0xb1f   :  { %vm7334_vm10 = vcmp.gt.f32.partialorder %v7328_v38, 0.0  ;;  %vm7335_vm8 = vcmp.gt.f32.partialorder %v7329_v6, 0.0  ;;  %v7340_v27 = vmul.f32 0.2, %v7328_v38  ;;  %v7341_v62 = vmul.f32 0.2, %v7329_v6 }
 0xb20   :  { %vm7330_vm11 = vcmp.gt.f32.partialorder %v7324_v19, 0.0  ;;  %vm7331_vm2 = vcmp.gt.f32.partialorder %v7325_v13, 0.0  ;;  %v7336_v4 = vmul.f32 0.2, %v7324_v19  ;;  %v7337_v28 = vmul.f32 0.2, %v7325_v13 }
 0xb21   :  { %v7346_v49 = vsel %vm7334_vm10, %v7328_v38, %v7340_v27  ;;  %v7347_v25 = vsel %vm7335_vm8, %v7329_v6, %v7341_v62  ;;  %vm7332_vm14 = vcmp.gt.f32.partialorder %v7326_v22, 0.0  ;;  %vm7333_vm13 = vcmp.gt.f32.partialorder %v7327_v58, 0.0  ;;  %v7693_v38 = vld [vmem:[#allocation18 + $0x40] sm:$0xff]  ;;  %v7694_v6 = vld [vmem:[#allocation18 + $0x48] sm:$0xff] }
 0xb22   :  { %v10295_v46 = vpack.c.bf16 %v7347_v25, %v7346_v49  ;;  %v7342_v44 = vsel %vm7330_vm11, %v7324_v19, %v7336_v4  ;;  %v7343_v8 = vsel %vm7331_vm2, %v7325_v13, %v7337_v28  ;;  %v7338_v63 = vmul.f32 0.2, %v7326_v22  ;;  %v7696_v13 = vld [vmem:[#allocation18 + $0x58] sm:$0xff]  ;;  %v7697_v62 = vld [vmem:[#allocation18 + $0x60] sm:$0xff]  ;;  %v7698_v4 = vld [vmem:[#allocation18 + $0x68] sm:$0xff] }
 0xb23   :  { %v10289_v61 = vpack.c.bf16 %v7343_v8, %v7342_v44  ;;  %v7339_v18 = vmul.f32 0.2, %v7327_v58  ;;  %v10356_v0 = vpack.c.bf16 %v7692_v9, %v7691_v29  ;;  %v10359_v19 = vpack.c.bf16 %v7694_v6, %v7693_v38  ;;  %v7699_v28 = vld [vmem:[#allocation18 + $0x70] sm:$0xff]  ;;  %v7700_v25 = vld [vmem:[#allocation18 + $0x78] sm:$0xff]  ;;  %v8161_v8 = vld [vmem:[%s11253_s24] ss:$0 sm:$0xff] }
 0xb24   :  { %v7344_v42 = vsel %vm7332_vm14, %v7326_v22, %v7338_v63  ;;  %v10365_v49 = vpack.c.bf16 %v7698_v4, %v7697_v62 }
 0xb25   :  { %10290 = vmatpush3.bf16.msra.mxu0 %v10289_v61  ;;  %v7345_v30 = vsel %vm7333_vm13, %v7327_v58, %v7339_v18 }
 0xb26   :  { %10291 = vmatprep.subr.bf16.mxu0 %v13338_v54  ;;  %v10292_v23 = vpack.c.bf16 %v7345_v30, %v7344_v42  ;;  %v8162_v30 = vld [vmem:[%s11263_s8] ss:$0 sm:$0xff] }
 0xb29   :  { %10293 = vmatpush3.bf16.msra.mxu0 %v10292_v23 }
 0xb2a   :  { %10294 = vmatprep.subr.bf16.mxu0 %v13338_v54 }
 0xb2d   :  { %10297 = vmatpush3.bf16.msk.msra.mxu0 %vm10296_vm6, %v10295_v46  ;;  %v10368_v46 = vpack.c.bf16 %v7700_v25, %v7699_v28 }
 0xb2e   :  { %10298 = vmatprep.subr.bf16.mxu0 %v13338_v54 }
 0xb30   :  { %9769 = vmatmul.mubr.msk.f32.vlgmr.msra.gmra.mrb[34].mxu0 %vm7427_vm9, %v7426_v5 }
 0xb31   :  { %10300 = vmatpush3.bf16.msra.mxu0 %v10299_v48  ;;  %9803 = vmatprep.mubr.msk.f32.mxu0 %vm11076_vm0, %v13352_v43 }
 0xb32   :  { %10301 = vmatprep.subr.bf16.mxu0 %v13338_v54 }
 0xb35   :  { %10303 = vmatpush3.bf16.msra.mxu0 %v10302_v32 }
 0xb36   :  { %10304 = vmatprep.subr.bf16.mxu0 %v13338_v54 }
 0xb39   :  { %10306 = vmatpush3.bf16.msra.mxu0 %v10305_v11 }
 0xb3a   :  { %10307 = vmatprep.subr.bf16.mxu0 %v13338_v54 }
 0xb3d   :  { %10309 = vmatpush3.bf16.msra.mxu0 %v10308_v1 }
 0xb3e   :  { %10310 = vmatprep.subr.bf16.mxu0 %v13338_v54 }
 0xb41   :  { %10312 = vmatpush3.bf16.msra.mxu0 %v10311_v17 }
 0xb42   :  { %10313 = vmatprep.subr.bf16.mxu0 %v13338_v54 }
 0xb45   :  { %10315 = vmatpush3.bf16.msra.mxu0 %v10314_v14 }
 0xb46   :  { %10316 = vmatprep.subr.bf16.mxu0 %v13338_v54 }
 0xb49   :  { %10318 = vmatpush3.bf16.msra.mxu0 %v10317_v2 }
 0xb4a   :  { %10319 = vmatprep.subr.bf16.mxu0 %v13338_v54 }
 0xb4d   :  { %10321 = vmatpush3.bf16.msra.mxu0 %v10320_v34 }
 0xb4e   :  { %10346 = vmatprep.subr.bf16.mxu0 %v13338_v54 }
 0xbdc   :  { %v7672_v58 = vpop.f32.mrb[44].mxu1 }
 0xbdd   :  { %v9840_v27 = vpop.f32.mrb[45].mxu1 }
 0xc03   :  { %v7500_v55 = vpop.f32.mrb[34].mxu0 }
 0xc04   :  { %v9770_v50 = vpop.f32.mrb[35].mxu0  ;;  %9804 = vmatmul.mubr.f32.vlgmr.msra.gmra.mrb[36].mxu0 %v7500_v55 }
 0xc05   :  { %10348 = vmatpush3.bf16.msra.mxu0 %v10347_v60  ;;  %9873 = vmatprep.mubr.msk.f32.mxu0 %vm11076_vm0, %v13352_v43  ;;  %v7695_v43 = vld [vmem:[#allocation18 + $0x50] sm:$0xff] }
 0xc06   :  { %10349 = vmatprep.subr.bf16.mxu0 %v13338_v54  ;;  %v10362_v22 = vpack.c.bf16 %v7696_v13, %v7695_v43 }
 0xc09   :  { %10351 = vmatpush3.bf16.msra.mxu0 %v10350_v56 }
 0xc0a   :  { %10352 = vmatprep.subr.bf16.mxu0 %v13338_v54 }
 0xc0d   :  { %10354 = vmatpush3.bf16.msra.mxu0 %v10353_v31 }
 0xc0e   :  { %10355 = vmatprep.subr.bf16.mxu0 %v13338_v54 }
 0xc11   :  { %10357 = vmatpush3.bf16.msra.mxu0 %v10356_v0 }
 0xc12   :  { %10358 = vmatprep.subr.bf16.mxu0 %v13338_v54 }
 0xc15   :  { %10360 = vmatpush3.bf16.msra.mxu0 %v10359_v19 }
 0xc16   :  { %10361 = vmatprep.subr.bf16.mxu0 %v13338_v54 }
 0xc19   :  { %10363 = vmatpush3.bf16.msra.mxu0 %v10362_v22 }
 0xc1a   :  { %10364 = vmatprep.subr.bf16.mxu0 %v13338_v54 }
 0xc1d   :  { %10366 = vmatpush3.bf16.msra.mxu0 %v10365_v49 }
 0xc1e   :  { %10367 = vmatprep.subr.bf16.mxu0 %v13338_v54 }
 0xc21   :  { %10369 = vmatpush3.bf16.msra.mxu0 %v10368_v46 }
 0xcd7   :  { %v7602_v44 = vpop.f32.mrb[36].mxu0 }
 0xcd8   :  { %v7673_v63 = vadd.f32 %v7672_v58, %v7602_v44  ;;  %v9805_v61 = vpop.f32.mrb[37].mxu0 }
 0xcda   :  { %v7683_v18 = vadd.f32 %v8161_v8, %v7673_v63 }
 0xcdc   :  { %v7684_v42 = vmax.f32 %v7683_v18, 0.0 }
 0xcde   :  { %9874 = vmatmul.mubr.f32.vlgmr.msra.gmra.mrb[38].mxu0 %v7684_v42 }
 0xdb1   :  { %v7774_v23 = vpop.f32.mrb[38].mxu0 }
 0xdb2   :  { %v7775_v3 = vadd.f32 %v8162_v30, %v7774_v23  ;;  %v9875_v51 = vpop.f32.mrb[39].mxu0 }
 0xdb4   :  { %v7778_v5 = vsub.f32 0.0, %v7775_v3 }
 0xdb6   :  { %v7779_v48 = vmul.f32 1.442695, %v7778_v5 }
 0xdb8   :  { %10760 = vpow2.f32 %v7779_v48 }
 0xdc2   :  { %v10761_v33 = vpop.eup %10760 }
 0xdc3   :  { %v7781_v16 = vadd.f32 1.0, %v10761_v33 }
 0xdc5   :  { %10762 = vrcp.f32 %v7781_v16 }
 0xdcf   :  { %v10763_v54 = vpop.eup %10762 }
 0xdd0   :  { %7783 = vst [vmem:[%s11268_s3] sm:$0x3] %v10763_v54 }
 0xdd1   :  { %7788 = vsyncpa [#allocation3], 1 }
 0xdd2   :  { %7789 = vsyncpa [#allocation5], 1 }
 0xdd3   :  { %7790 = vsyncpa [#allocation8], 1 }
 0xdd4   :  { %7791 = vsyncpa [#allocation11], 1 }
 0xdd5   :  { %7792 = vsyncpa [#allocation14], 1 }
 0xdd6   :  { %7793 = vsyncpa [#allocation17], 1 }

</bundles_post_ra>
